<compile_context>
chip_gen: v6e
topology: v6e:2x2x1
jax: 0.10.0
libtpu: 0.0.40
codegen_flags: <defaults>
</compile_context>

<pallas_src>
import functools
import math

import jax
import jax.numpy as jnp
import numpy as np
from jax.experimental import pallas as pl
from jax.experimental.pallas import tpu as pltpu

# ---------------------------------------------------------------------------
# Tiling / dtype policy
# ---------------------------------------------------------------------------
_COMPUTE_DTYPE = jnp.bfloat16   # MXU operand dtype; accumulation stays f32
_TM_MAX = 256                   # tile M only when M > 256 (safe for v7x VMEM)
_TN_MAX = 256
_TK_MAX = 2048                  # single full-extent K block up to this size
_TK_TILE = 512                  # K tile when K is genuinely large
_M_SPLIT_MIN = 64               # split M into >=2 blocks when M >= 128 (v7x: 2 TCs)
_HEAD_PAD = 128                 # lane-dense padding for tiny head outputs


def _round_up(x, m):
    return -(-x // m) * m


def _maybe_cast(a, dtype):
    return a if a.dtype == dtype else a.astype(dtype)


def _pick_m_tile(M):
    """Pick an M tile: full extent when small, >=2 blocks when M >= 128
    (keeps both v7x TensorCores busy), capped at _TM_MAX."""
    if M > _TM_MAX:
        tm = _TM_MAX
    elif M >= 2 * _M_SPLIT_MIN:
        tm = _round_up(-(-M // 2), 8)
    else:
        tm = M
    Mp = M if M % tm == 0 else _round_up(M, tm)
    return tm, Mp


# ---------------------------------------------------------------------------
# Pallas kernel: single GEMM  Y = act(X @ W [+ b])
# ---------------------------------------------------------------------------
def _mm_kernel_single(*refs, activation, has_bias):
    x_ref, w_ref = refs[0], refs[1]
    o_ref = refs[-1]
    y = jnp.dot(x_ref[...], w_ref[...], preferred_element_type=jnp.float32)
    if has_bias:
        y = y + refs[2][...]            # (tm,tn) + (1,tn) broadcast, f32
    if activation == "relu":
        y = jnp.maximum(y, 0.0)
    o_ref[...] = y.astype(o_ref.dtype)


def _mm_kernel_acc(*refs, activation, has_bias):
    """Tiled K: accumulate straight into the resident f32 output block."""
    x_ref, w_ref = refs[0], refs[1]
    o_ref = refs[-1]

    @pl.when(pl.program_id(2) == 0)
    def _():
        o_ref[...] = jnp.zeros_like(o_ref)

    o_ref[...] += jnp.dot(x_ref[...], w_ref[...],
                          preferred_element_type=jnp.float32)

    @pl.when(pl.program_id(2) == pl.num_programs(2) - 1)
    def _():
        y = o_ref[...]
        if has_bias:
            y = y + refs[2][...]
        if activation == "relu":
            y = jnp.maximum(y, 0.0)
        o_ref[...] = y


def matmul_bias(x, w, b=None, activation=None, out_dtype=jnp.float32):
    """x: (M,K), w: (K,N), optional b: (N,) -> (M,N) in out_dtype."""
    M, K = x.shape
    K2, N = w.shape
    assert K == K2
    has_bias = b is not None

    xp = _maybe_cast(x, _COMPUTE_DTYPE)
    wp = _maybe_cast(w, _COMPUTE_DTYPE)

    # ---- K: full-extent block unless genuinely large (no padding passes) ---
    if K <= _TK_MAX:
        tk, Kp = K, K
    else:
        tk = _TK_TILE
        Kp = _round_up(K, tk)
        xp = jnp.pad(xp, ((0, 0), (0, Kp - K)))
        wp = jnp.pad(wp, ((0, Kp - K), (0, 0)))

    tm, Mp = _pick_m_tile(M)
    if Mp != M:
        xp = jnp.pad(xp, ((0, Mp - M), (0, 0)))

    if N <= _TN_MAX:
        tn, Np = N, N
    else:
        tn = _TN_MAX
        Np = _round_up(N, tn)
        wp = jnp.pad(wp, ((0, 0), (0, Np - N)))

    operands = [xp, wp]
    if has_bias:
        bp = b.astype(jnp.float32).reshape(1, N)
        if Np != N:
            bp = jnp.pad(bp, ((0, 0), (0, Np - N)))
        operands.append(bp)

    nm, nn, nk = Mp // tm, Np // tn, Kp // tk

    if nk == 1:
        grid = (nm, nn)
        kernel = functools.partial(_mm_kernel_single,
                                   activation=activation, has_bias=has_bias)
        in_specs = [pl.BlockSpec((tm, tk), lambda i, j: (i, 0)),
                    pl.BlockSpec((tk, tn), lambda i, j: (0, j))]
        if has_bias:
            in_specs.append(pl.BlockSpec((1, tn), lambda i, j: (0, j)))
        out_specs = pl.BlockSpec((tm, tn), lambda i, j: (i, j))
        dim_sem = ("parallel", "parallel")
        res_dtype = out_dtype
    else:
        grid = (nm, nn, nk)
        kernel = functools.partial(_mm_kernel_acc,
                                   activation=activation, has_bias=has_bias)
        in_specs = [pl.BlockSpec((tm, tk), lambda i, j, k: (i, k)),
                    pl.BlockSpec((tk, tn), lambda i, j, k: (k, j))]
        if has_bias:
            # bias block index constant over k -> pipeline keeps it resident
            in_specs.append(pl.BlockSpec((1, tn), lambda i, j, k: (0, j)))
        out_specs = pl.BlockSpec((tm, tn), lambda i, j, k: (i, j))
        dim_sem = ("parallel", "parallel", "arbitrary")
        res_dtype = jnp.float32   # accumulate directly in the output block

    out = pl.pallas_call(
        kernel,
        out_shape=jax.ShapeDtypeStruct((Mp, Np), res_dtype),
        grid_spec=pltpu.PrefetchScalarGridSpec(
            num_scalar_prefetch=0, grid=grid,
            in_specs=in_specs, out_specs=out_specs),
        compiler_params=pltpu.CompilerParams(dimension_semantics=dim_sem),
    )(*operands)

    if (Mp, Np) != (M, N):
        out = out[:M, :N]
    if out.dtype != out_dtype:
        out = out.astype(out_dtype)
    return out


# ---------------------------------------------------------------------------
# Pallas kernel: fused MLP chain — intermediates stay in VMEM / vregs
# ---------------------------------------------------------------------------
def _fused_mlp_kernel(*refs, activations):
    x_ref, o_ref = refs[0], refs[-1]
    h = x_ref[...]
    for li, act in enumerate(activations):
        w_ref, b_ref = refs[1 + 2 * li], refs[2 + 2 * li]
        y = jnp.dot(h.astype(w_ref.dtype), w_ref[...],
                    preferred_element_type=jnp.float32)
        y = y + b_ref[...]
        if act == "relu":
            y = jnp.maximum(y, 0.0)
        h = y
    o_ref[...] = h.astype(o_ref.dtype)


def fused_mlp(x, layers, out_dtype=jnp.float32):
    """Run x @ W1 (+b1, act1) @ W2 (+b2, act2) ... in ONE pallas_call.

    layers: list of (w(K_l, N_l), b(N_l,), activation). All weights are small
    (they fit in VMEM whole), so they are passed as full-extent blocks and
    only the rows of x are tiled / pipelined.
    """
    M, K = x.shape
    xp = _maybe_cast(x, _COMPUTE_DTYPE)
    tm, Mp = _pick_m_tile(M)
    if Mp != M:
        xp = jnp.pad(xp, ((0, Mp - M), (0, 0)))
    nm = Mp // tm

    in_specs = [pl.BlockSpec((tm, K), lambda i: (i, 0))]
    operands = [xp]
    activations = []
    prev = K
    for (w, b, act) in layers:
        kdim, ndim = w.shape
        assert kdim == prev
        prev = ndim
        in_specs.append(pl.BlockSpec((kdim, ndim), lambda i: (0, 0)))
        in_specs.append(pl.BlockSpec((1, ndim), lambda i: (0, 0)))
        operands.append(_maybe_cast(w, _COMPUTE_DTYPE))
        operands.append(b.astype(jnp.float32).reshape(1, ndim))
        activations.append(act)
    n_out = prev

    out = pl.pallas_call(
        functools.partial(_fused_mlp_kernel, activations=tuple(activations)),
        out_shape=jax.ShapeDtypeStruct((Mp, n_out), out_dtype),
        grid_spec=pltpu.PrefetchScalarGridSpec(
            num_scalar_prefetch=0, grid=(nm,),
            in_specs=in_specs,
            out_specs=pl.BlockSpec((tm, n_out), lambda i: (i, 0))),
        compiler_params=pltpu.CompilerParams(dimension_semantics=("parallel",)),
    )(*operands)
    if Mp != M:
        out = out[:M]
    return out


# ---------------------------------------------------------------------------
# Pallas kernel: batched RoI-pool GEMM (constant interp matrix per image,
# channels stay on the lane axis -> no HBM transpose, no zero-bias DMA)
# ---------------------------------------------------------------------------
def _roi_kernel(interp_ref, feat_ref, o_ref):
    o_ref[...] = jnp.dot(interp_ref[...], feat_ref[...],
                         preferred_element_type=jnp.float32).astype(o_ref.dtype)


def roi_pool_gemm(interp, feats, out_dtype=_COMPUTE_DTYPE):
    """interp: (P, S) constant bilinear matrix; feats: (N, S, C) -> (N, P, C)."""
    P, S = interp.shape
    n_img, S2, C = feats.shape
    assert S == S2
    return pl.pallas_call(
        _roi_kernel,
        out_shape=jax.ShapeDtypeStruct((n_img, P, C), out_dtype),
        grid_spec=pltpu.PrefetchScalarGridSpec(
            num_scalar_prefetch=0, grid=(n_img,),
            in_specs=[pl.BlockSpec((P, S), lambda n: (0, 0)),
                      pl.BlockSpec((None, S, C), lambda n: (n, 0, 0))],
            out_specs=pl.BlockSpec((None, P, C), lambda n: (n, 0, 0))),
        compiler_params=pltpu.CompilerParams(dimension_semantics=("parallel",)),
    )(_maybe_cast(interp, _COMPUTE_DTYPE), _maybe_cast(feats, _COMPUTE_DTYPE))


# ---------------------------------------------------------------------------
# Conv2d = im2col (glue) + Pallas GEMM
# ---------------------------------------------------------------------------
def _im2col(x, kh, kw, stride, padding):
    """NHWC patch extraction -> ((N*Ho*Wo, kh*kw*Cin), (Ho, Wo)).

    TODO(synk): at real image sizes this should be fused into the Pallas
    kernel (shifted in-VMEM reads with halos) or replaced by lax.conv to
    avoid the ~9x HBM inflation; at these mini sizes the patches are tiny.
    """
    N, H, W, Cin = x.shape
    xp = jnp.pad(x, ((0, 0), (padding, padding), (padding, padding), (0, 0)))
    Ho = (H + 2 * padding - kh) // stride + 1
    Wo = (W + 2 * padding - kw) // stride + 1
    patches = []
    for i in range(kh):
        for j in range(kw):
            patches.append(
                xp[:, i:i + stride * (Ho - 1) + 1:stride,
                   j:j + stride * (Wo - 1) + 1:stride, :])
    patches = jnp.concatenate(patches, axis=-1)           # (N,Ho,Wo,kh*kw*Cin)
    return patches.reshape(N * Ho * Wo, kh * kw * Cin), (Ho, Wo)


def conv2d(x, w, b, stride=1, padding=1, activation=None,
           out_dtype=_COMPUTE_DTYPE):
    """x: (N,H,W,Cin) NHWC.  w: (kh,kw,Cin,Cout).  b: (Cout,)."""
    N, H, W, Cin = x.shape
    kh, kw, _, Cout = w.shape
    if kh == 1 and kw == 1 and stride == 1 and padding == 0:
        y = matmul_bias(x.reshape(N * H * W, Cin), w.reshape(Cin, Cout), b,
                        activation=activation, out_dtype=out_dtype)
        return y.reshape(N, H, W, Cout)
    xm, (Ho, Wo) = _im2col(x, kh, kw, stride, padding)
    y = matmul_bias(xm, w.reshape(kh * kw * Cin, Cout), b,
                    activation=activation, out_dtype=out_dtype)
    return y.reshape(N, Ho, Wo, Cout)


# ---------------------------------------------------------------------------
# Fixed proposals + constant RoI interpolation matrix
# ---------------------------------------------------------------------------
# TODO(synk): real proposal generation (anchor decode, top-k, NMS) is
# data-dependent per image and has no clean Pallas equivalent here.
_FIXED_PROPOSALS_LIST = [
    (0.0, 0.0, 16.0, 16.0),
    (0.0, 0.0, 8.0, 8.0),
    (8.0, 8.0, 16.0, 16.0),
    (0.0, 8.0, 8.0, 16.0),
]
_FIXED_PROPOSALS = jnp.array(_FIXED_PROPOSALS_LIST, jnp.float32)
_ROI_OUT = 7
_BBOX_CLIP = math.log(1000.0 / 16.0)     # torchvision clamp for dw/dh


def _build_roi_interp(proposals, feat_h, feat_w, stride, out_size=_ROI_OUT):
    """Constant (R*out^2, feat_h*feat_w) bilinear sampling matrix.

    Because the proposals are fixed, the RoI bilinear resize is a constant
    linear map -> a single batched Pallas GEMM.
    TODO(synk): true MultiScaleRoIAlign on dynamic boxes is a data-dependent
    gather and is not implemented here.
    """
    mat = np.zeros((len(proposals) * out_size * out_size, feat_h * feat_w),
                   np.float32)
    r = 0
    for (bx1, by1, bx2, by2) in proposals:
        fx1, fy1 = bx1 / stride, by1 / stride
        fx2, fy2 = bx2 / stride, by2 / stride
        bw, bh = fx2 - fx1, fy2 - fy1
        for oy in range(out_size):
            for ox in range(out_size):
                sy = min(max(fy1 + (oy + 0.5) * bh / out_size - 0.5, 0.0),
                         feat_h - 1.0)
                sx = min(max(fx1 + (ox + 0.5) * bw / out_size - 0.5, 0.0),
                         feat_w - 1.0)
                y0, x0 = int(np.floor(sy)), int(np.floor(sx))
                y1i, x1i = min(y0 + 1, feat_h - 1), min(x0 + 1, feat_w - 1)
                wy, wx = sy - y0, sx - x0
                mat[r, y0 * feat_w + x0] += (1.0 - wy) * (1.0 - wx)
                mat[r, y0 * feat_w + x1i] += (1.0 - wy) * wx
                mat[r, y1i * feat_w + x0] += wy * (1.0 - wx)
                mat[r, y1i * feat_w + x1i] += wy * wx
                r += 1
    return mat


# ---------------------------------------------------------------------------
# Deterministic parameter construction (synthetic, not a checkpoint load).
# Weights stored once as bf16; biases stay f32.
# ---------------------------------------------------------------------------
def _conv_param(key, kh, kw, cin, cout):
    k1, k2 = jax.random.split(key)
    scale = jnp.sqrt(2.0 / (kh * kw * cin))
    w = (jax.random.normal(k1, (kh, kw, cin, cout), jnp.float32) * scale)
    b = jax.random.normal(k2, (cout,), jnp.float32) * 0.01
    return w.astype(_COMPUTE_DTYPE), b


def _linear_param(key, cin, cout):
    k1, k2 = jax.random.split(key)
    scale = jnp.sqrt(2.0 / cin)
    w = jax.random.normal(k1, (cin, cout), jnp.float32) * scale
    b = jax.random.normal(k2, (cout,), jnp.float32) * 0.01
    return w.astype(_COMPUTE_DTYPE), b


def _pad_cols(w, n):
    return jnp.pad(w, ((0, 0), (0, n - w.shape[1]))) if w.shape[1] < n else w


def _pad_vec(b, n):
    return jnp.pad(b, (0, n - b.shape[0])) if b.shape[0] < n else b


def init_params(num_classes=2, fpn_channels=32, repr_size=64, num_anchors=3):
    keys = jax.random.split(jax.random.PRNGKey(0), 16)
    p = {}
    # mini backbone (stand-in for ResNet50 stages)
    p["stem"] = _conv_param(keys[0], 3, 3, 3, 16)
    p["layer2"] = _conv_param(keys[1], 3, 3, 16, 32)
    p["layer3"] = _conv_param(keys[2], 3, 3, 32, 64)
    # FPN
    p["lat2"] = _conv_param(keys[3], 1, 1, 32, fpn_channels)
    p["lat3"] = _conv_param(keys[4], 1, 1, 64, fpn_channels)
    p["smooth2"] = _conv_param(keys[5], 3, 3, fpn_channels, fpn_channels)
    p["smooth3"] = _conv_param(keys[6], 3, 3, fpn_channels, fpn_channels)
    # RPN head: objectness + bbox 1x1 heads fused along the output axis,
    # zero-padded to 128 lanes for unmasked stores (cols >= 5*A are sliced off).
    p["rpn_conv"] = _conv_param(keys[7], 3, 3, fpn_channels, fpn_channels)
    cls_w, cls_b = _conv_param(keys[8], 1, 1, fpn_channels, num_anchors)
    box_w, box_b = _conv_param(keys[9], 1, 1, fpn_channels, num_anchors * 4)
    head_w = jnp.concatenate([cls_w, box_w], axis=-1).reshape(
        fpn_channels, 5 * num_anchors)
    head_b = jnp.concatenate([cls_b, box_b], axis=0)
    p["rpn_head"] = (_pad_cols(head_w, _HEAD_PAD), _pad_vec(head_b, _HEAD_PAD))
    # Box head (TwoMLPHead) + FastRCNNPredictor(in_features, num_classes)
    # with cls_score / bbox_pred fused and lane-padded to 128.
    p["fc6"] = _linear_param(keys[10], _ROI_OUT * _ROI_OUT * fpn_channels, repr_size)
    p["fc7"] = _linear_param(keys[11], repr_size, repr_size)
    sc_w, sc_b = _linear_param(keys[12], repr_size, num_classes)
    bp_w, bp_b = _linear_param(keys[13], repr_size, num_classes * 4)
    pred_w = jnp.concatenate([sc_w, bp_w], axis=1)
    pred_b = jnp.concatenate([sc_b, bp_b], axis=0)
    p["predictor"] = (_pad_cols(pred_w, _HEAD_PAD), _pad_vec(pred_b, _HEAD_PAD))
    return p


# ---------------------------------------------------------------------------
# Forward pass (eval-mode semantics; `t` targets are ignored when None)
# ---------------------------------------------------------------------------
_IMAGENET_MEAN = jnp.array([0.485, 0.456, 0.406], jnp.float32)
_IMAGENET_STD = jnp.array([0.229, 0.224, 0.225], jnp.float32)


def faster_rcnn_forward(params, x_nchw, t=None, *, num_classes=2, num_anchors=3):
    # PyTorch feeds NCHW; convert once to NHWC (channels on the lane axis).
    x = jnp.transpose(x_nchw, (0, 2, 3, 1)).astype(jnp.float32)
    N = x.shape[0]

    # GeneralizedRCNNTransform: normalize (resize omitted at these sizes),
    # then drop to bf16 once for the whole network.
    x = ((x - _IMAGENET_MEAN) / _IMAGENET_STD).astype(_COMPUTE_DTYPE)

    # --- backbone (bf16 activations between layers) ---
    c1 = conv2d(x, *params["stem"], stride=1, padding=1, activation="relu")
    c2 = conv2d(c1, *params["layer2"], stride=2, padding=1, activation="relu")
    c3 = conv2d(c2, *params["layer3"], stride=2, padding=1, activation="relu")

    # --- FPN ---
    l2 = conv2d(c2, *params["lat2"], stride=1, padding=0)
    l3 = conv2d(c3, *params["lat3"], stride=1, padding=0)
    l3_up = jnp.repeat(jnp.repeat(l3, 2, axis=1), 2, axis=2)   # nearest 2x
    p2 = conv2d(l2 + l3_up, *params["smooth2"], stride=1, padding=1)
    p3 = conv2d(l3, *params["smooth3"], stride=1, padding=1)

    # --- RPN: both FPN levels batched along M, and the whole chain
    #     (3x3 conv GEMM -> fused objectness+bbox 1x1 heads) runs as ONE
    #     fused pallas_call with the intermediate kept in VMEM ---
    rpn_conv_w, rpn_conv_b = params["rpn_conv"]
    kh, kw, cin, cmid = rpn_conv_w.shape
    level_rows, level_shapes = [], []
    for feat in (p2, p3):
        rows, (ho, wo) = _im2col(feat, kh, kw, stride=1, padding=1)
        level_rows.append(rows)
        level_shapes.append((feat.shape[0], ho, wo))
    rpn_in = jnp.concatenate(level_rows, axis=0)
    head_w, head_b = params["rpn_head"]            # (cmid, 128) / (128,), padded
    head = fused_mlp(
        rpn_in,
        [(rpn_conv_w.reshape(kh * kw * cin, cmid), rpn_conv_b, "relu"),
         (head_w, head_b, None)],
        out_dtype=jnp.float32)
    A = num_anchors
    head = head[:, :5 * A]                         # drop lane padding
    rpn_out, off = {}, 0
    for name, (n, ho, wo) in zip(("p2", "p3"), level_shapes):
        cnt = n * ho * wo
        blk = head[off:off + cnt].reshape(n, ho, wo, 5 * A)
        rpn_out[name] = {"objectness": blk[..., :A],
                         "bbox_deltas": blk[..., A:]}
        off += cnt

    # --- RoI pooling on p2 (stride 2) with the fixed proposals: one batched
    #     constant-matrix Pallas GEMM, channels stay on the lane axis ---
    Hf, Wf, C = p2.shape[1], p2.shape[2], p2.shape[3]
    R = len(_FIXED_PROPOSALS_LIST)
    interp = jnp.asarray(
        _build_roi_interp(_FIXED_PROPOSALS_LIST, Hf, Wf, stride=2))  # (R*49, Hf*Wf)
    pooled = roi_pool_gemm(interp, p2.reshape(N, Hf * Wf, C))        # (N, R*49, C)
    box_feats = pooled.reshape(N * R, _ROI_OUT * _ROI_OUT * C)

    # --- box head: TwoMLPHead + fused FastRCNNPredictor, ONE pallas_call ---
    fc6_w, fc6_b = params["fc6"]
    fc7_w, fc7_b = params["fc7"]
    pred_w, pred_b = params["predictor"]           # (repr, 128) padded
    pred = fused_mlp(
        box_feats,
        [(fc6_w, fc6_b, "relu"), (fc7_w, fc7_b, "relu"), (pred_w, pred_b, None)],
        out_dtype=jnp.float32)
    pred = pred[:, :num_classes * 5]               # drop lane padding
    class_logits = pred[:, :num_classes]           # (N*R, num_classes)
    box_regression = pred[:, num_classes:]         # (N*R, num_classes*4)

    # --- postprocess (softmax + clamped box decode; NMS omitted) ---
    # TODO(synk): per-image score thresholding + class-wise NMS produce
    # variable-length outputs; dense tensors are returned instead.
    scores = jax.nn.softmax(class_logits, axis=-1)
    props = jnp.tile(_FIXED_PROPOSALS, (N, 1))     # (N*R, 4)
    pw = props[:, 2] - props[:, 0]
    ph = props[:, 3] - props[:, 1]
    pcx = props[:, 0] + 0.5 * pw
    pcy = props[:, 1] + 0.5 * ph
    deltas = box_regression.reshape(N * R, num_classes, 4)
    dx = deltas[..., 0] / 10.0
    dy = deltas[..., 1] / 10.0
    dw = jnp.minimum(deltas[..., 2] / 5.0, _BBOX_CLIP)   # torchvision-style clamp
    dh = jnp.minimum(deltas[..., 3] / 5.0, _BBOX_CLIP)
    cx = dx * pw[:, None] + pcx[:, None]
    cy = dy * ph[:, None] + pcy[:, None]
    bw = jnp.exp(dw) * pw[:, None]
    bh = jnp.exp(dh) * ph[:, None]
    boxes = jnp.stack(
        [cx - 0.5 * bw, cy - 0.5 * bh, cx + 0.5 * bw, cy + 0.5 * bh], axis=-1)

    return {
        "rpn": rpn_out,
        "class_logits": class_logits.reshape(N, R, num_classes),
        "box_regression": box_regression.reshape(N, R, num_classes * 4),
        "scores": scores.reshape(N, R, num_classes),
        "labels": jnp.argmax(scores, axis=-1).reshape(N, R),
        "boxes": boxes.reshape(N, R, num_classes, 4),
    }


# ---------------------------------------------------------------------------
if __name__ == "__main__":
    key = jax.random.PRNGKey(0)
    x = jax.random.uniform(key, (2, 3, 16, 16), jnp.float32)   # NCHW like PyTorch
    params = init_params(num_classes=2)

    fwd = jax.jit(faster_rcnn_forward)
    out = fwd(params, x)
    for leaf in jax.tree_util.tree_leaves(out):
        jax.block_until_ready(leaf)

    assert out["class_logits"].shape == (2, 4, 2)
    assert out["box_regression"].shape == (2, 4, 8)
    assert bool(jnp.all(jnp.isfinite(out["class_logits"])))
    assert bool(jnp.all(jnp.isfinite(out["boxes"])))
    print("KERNEL_OK")
</pallas_src>

<mosaic_0001>
module attributes {stable_mosaic.version = 11 : i64} {
  func.func @_mm_kernel_single(%arg0: i32, %arg1: i32, %arg2: memref<256x27xbf16, #tpu.memory_space<vmem>>, %arg3: memref<27x16xbf16, #tpu.memory_space<vmem>>, %arg4: memref<1x16xf32, #tpu.memory_space<vmem>>, %arg5: memref<256x16xbf16, #tpu.memory_space<vmem>>) attributes {dimension_semantics = [#tpu.dimension_semantics<parallel>, #tpu.dimension_semantics<parallel>], iteration_bounds = array<i64: 2, 1>, scalar_prefetch = 0 : i64, scratch_operands = 0 : i64, tpu.core_type = #tpu.core_type<tc>, window_params = [{transform_indices = @transform_0, window_bounds = array<i64: 256, 27>}, {transform_indices = @transform_1, window_bounds = array<i64: 27, 16>}, {transform_indices = @transform_2, window_bounds = array<i64: 1, 16>}, {transform_indices = @transform_3, window_bounds = array<i64: 256, 16>}]} {
    %c0 = arith.constant 0 : index
    %c0_0 = arith.constant 0 : index
    %0 = vector.load %arg2[%c0, %c0_0] : memref<256x27xbf16, #tpu.memory_space<vmem>>, vector<256x27xbf16>
    %c0_1 = arith.constant 0 : index
    %c0_2 = arith.constant 0 : index
    %1 = vector.load %arg3[%c0_1, %c0_2] : memref<27x16xbf16, #tpu.memory_space<vmem>>, vector<27x16xbf16>
    %cst = arith.constant dense<0.000000e+00> : vector<256x16xf32>
    %2 = tpu.matmul %0, %1, %cst {dimension_numbers = #tpu.dot_dimension_numbers<[1], [0], [0], [1], [0, 0, 1, 1], [], []>} : vector<256x27xbf16>, vector<27x16xbf16>, vector<256x16xf32> -> vector<256x16xf32>
    %c0_3 = arith.constant 0 : index
    %c0_4 = arith.constant 0 : index
    %3 = vector.load %arg4[%c0_3, %c0_4] : memref<1x16xf32, #tpu.memory_space<vmem>>, vector<1x16xf32>
    %4 = vector.broadcast %3 : vector<1x16xf32> to vector<256x16xf32>
    %5 = arith.addf %2, %4 : vector<256x16xf32>
    %cst_5 = arith.constant 0.000000e+00 : f32
    %6 = vector.broadcast %cst_5 : f32 to vector<256x16xf32>
    %7 = arith.maximumf %5, %6 : vector<256x16xf32>
    %8 = arith.truncf %7 : vector<256x16xf32> to vector<256x16xbf16>
    %c0_6 = arith.constant 0 : index
    %c0_7 = arith.constant 0 : index
    %9 = vector.load %arg5[%c0_6, %c0_7] : memref<256x16xbf16, #tpu.memory_space<vmem>>, vector<256x16xbf16>
    tpu.vector_store %arg5[%c0_6, %c0_7], %8 {strides = array<i32>} : memref<256x16xbf16, #tpu.memory_space<vmem>>, vector<256x16xbf16>,
    return
  }
  func.func @transform_0(%arg0: i32, %arg1: i32) -> (i32, i32) {
    %c0_i32 = arith.constant 0 : i32
    %c0_i32_0 = arith.constant 0 : i32
    return %arg0, %c0_i32 : i32, i32
  }
  func.func @transform_1(%arg0: i32, %arg1: i32) -> (i32, i32) {
    %c0_i32 = arith.constant 0 : i32
    %c0_i32_0 = arith.constant 0 : i32
    return %c0_i32, %arg1 : i32, i32
  }
  func.func @transform_2(%arg0: i32, %arg1: i32) -> (i32, i32) {
    %c0_i32 = arith.constant 0 : i32
    %c0_i32_0 = arith.constant 0 : i32
    return %c0_i32, %arg1 : i32, i32
  }
  func.func @transform_3(%arg0: i32, %arg1: i32) -> (i32, i32) {
    %c0_i32 = arith.constant 0 : i32
    return %arg0, %arg1 : i32, i32
  }
}

module attributes {stable_mosaic.version = 11 : i64} {
  func.func @_mm_kernel_single(%arg0: i32, %arg1: i32, %arg2: memref<64x144xbf16, #tpu.memory_space<vmem>>, %arg3: memref<144x32xbf16, #tpu.memory_space<vmem>>, %arg4: memref<1x32xf32, #tpu.memory_space<vmem>>, %arg5: memref<64x32xbf16, #tpu.memory_space<vmem>>) attributes {dimension_semantics = [#tpu.dimension_semantics<parallel>, #tpu.dimension_semantics<parallel>], iteration_bounds = array<i64: 2, 1>, scalar_prefetch = 0 : i64, scratch_operands = 0 : i64, tpu.core_type = #tpu.core_type<tc>, window_params = [{transform_indices = @transform_0, window_bounds = array<i64: 64, 144>}, {transform_indices = @transform_1, window_bounds = array<i64: 144, 32>}, {transform_indices = @transform_2, window_bounds = array<i64: 1, 32>}, {transform_indices = @transform_3, window_bounds = array<i64: 64, 32>}]} {
    %c0 = arith.constant 0 : index
    %c0_0 = arith.constant 0 : index
    %0 = vector.load %arg2[%c0, %c0_0] : memref<64x144xbf16, #tpu.memory_space<vmem>>, vector<64x144xbf16>
    %c0_1 = arith.constant 0 : index
    %c0_2 = arith.constant 0 : index
    %1 = vector.load %arg3[%c0_1, %c0_2] : memref<144x32xbf16, #tpu.memory_space<vmem>>, vector<144x32xbf16>
    %cst = arith.constant dense<0.000000e+00> : vector<64x32xf32>
    %2 = tpu.matmul %0, %1, %cst {dimension_numbers = #tpu.dot_dimension_numbers<[1], [0], [0], [1], [0, 0, 1, 1], [], []>} : vector<64x144xbf16>, vector<144x32xbf16>, vector<64x32xf32> -> vector<64x32xf32>
    %c0_3 = arith.constant 0 : index
    %c0_4 = arith.constant 0 : index
    %3 = vector.load %arg4[%c0_3, %c0_4] : memref<1x32xf32, #tpu.memory_space<vmem>>, vector<1x32xf32>
    %4 = vector.broadcast %3 : vector<1x32xf32> to vector<64x32xf32>
    %5 = arith.addf %2, %4 : vector<64x32xf32>
    %cst_5 = arith.constant 0.000000e+00 : f32
    %6 = vector.broadcast %cst_5 : f32 to vector<64x32xf32>
    %7 = arith.maximumf %5, %6 : vector<64x32xf32>
    %8 = arith.truncf %7 : vector<64x32xf32> to vector<64x32xbf16>
    %c0_6 = arith.constant 0 : index
    %c0_7 = arith.constant 0 : index
    %9 = vector.load %arg5[%c0_6, %c0_7] : memref<64x32xbf16, #tpu.memory_space<vmem>>, vector<64x32xbf16>
    tpu.vector_store %arg5[%c0_6, %c0_7], %8 {strides = array<i32>} : memref<64x32xbf16, #tpu.memory_space<vmem>>, vector<64x32xbf16>,
    return
  }
  func.func @transform_0(%arg0: i32, %arg1: i32) -> (i32, i32) {
    %c0_i32 = arith.constant 0 : i32
    %c0_i32_0 = arith.constant 0 : i32
    return %arg0, %c0_i32 : i32, i32
  }
  func.func @transform_1(%arg0: i32, %arg1: i32) -> (i32, i32) {
    %c0_i32 = arith.constant 0 : i32
    %c0_i32_0 = arith.constant 0 : i32
    return %c0_i32, %arg1 : i32, i32
  }
  func.func @transform_2(%arg0: i32, %arg1: i32) -> (i32, i32) {
    %c0_i32 = arith.constant 0 : i32
    %c0_i32_0 = arith.constant 0 : i32
    return %c0_i32, %arg1 : i32, i32
  }
  func.func @transform_3(%arg0: i32, %arg1: i32) -> (i32, i32) {
    %c0_i32 = arith.constant 0 : i32
    return %arg0, %arg1 : i32, i32
  }
}

module attributes {stable_mosaic.version = 11 : i64} {
  func.func @_mm_kernel_single(%arg0: i32, %arg1: i32, %arg2: memref<64x32xbf16, #tpu.memory_space<vmem>>, %arg3: memref<32x32xbf16, #tpu.memory_space<vmem>>, %arg4: memref<1x32xf32, #tpu.memory_space<vmem>>, %arg5: memref<64x32xbf16, #tpu.memory_space<vmem>>) attributes {dimension_semantics = [#tpu.dimension_semantics<parallel>, #tpu.dimension_semantics<parallel>], iteration_bounds = array<i64: 2, 1>, scalar_prefetch = 0 : i64, scratch_operands = 0 : i64, tpu.core_type = #tpu.core_type<tc>, window_params = [{transform_indices = @transform_0, window_bounds = array<i64: 64, 32>}, {transform_indices = @transform_1, window_bounds = array<i64: 32, 32>}, {transform_indices = @transform_2, window_bounds = array<i64: 1, 32>}, {transform_indices = @transform_3, window_bounds = array<i64: 64, 32>}]} {
    %c0 = arith.constant 0 : index
    %c0_0 = arith.constant 0 : index
    %0 = vector.load %arg2[%c0, %c0_0] : memref<64x32xbf16, #tpu.memory_space<vmem>>, vector<64x32xbf16>
    %c0_1 = arith.constant 0 : index
    %c0_2 = arith.constant 0 : index
    %1 = vector.load %arg3[%c0_1, %c0_2] : memref<32x32xbf16, #tpu.memory_space<vmem>>, vector<32x32xbf16>
    %cst = arith.constant dense<0.000000e+00> : vector<64x32xf32>
    %2 = tpu.matmul %0, %1, %cst {dimension_numbers = #tpu.dot_dimension_numbers<[1], [0], [0], [1], [0, 0, 1, 1], [], []>} : vector<64x32xbf16>, vector<32x32xbf16>, vector<64x32xf32> -> vector<64x32xf32>
    %c0_3 = arith.constant 0 : index
    %c0_4 = arith.constant 0 : index
    %3 = vector.load %arg4[%c0_3, %c0_4] : memref<1x32xf32, #tpu.memory_space<vmem>>, vector<1x32xf32>
    %4 = vector.broadcast %3 : vector<1x32xf32> to vector<64x32xf32>
    %5 = arith.addf %2, %4 : vector<64x32xf32>
    %6 = arith.truncf %5 : vector<64x32xf32> to vector<64x32xbf16>
    %c0_5 = arith.constant 0 : index
    %c0_6 = arith.constant 0 : index
    %7 = vector.load %arg5[%c0_5, %c0_6] : memref<64x32xbf16, #tpu.memory_space<vmem>>, vector<64x32xbf16>
    tpu.vector_store %arg5[%c0_5, %c0_6], %6 {strides = array<i32>} : memref<64x32xbf16, #tpu.memory_space<vmem>>, vector<64x32xbf16>,
    return
  }
  func.func @transform_0(%arg0: i32, %arg1: i32) -> (i32, i32) {
    %c0_i32 = arith.constant 0 : i32
    %c0_i32_0 = arith.constant 0 : i32
    return %arg0, %c0_i32 : i32, i32
  }
  func.func @transform_1(%arg0: i32, %arg1: i32) -> (i32, i32) {
    %c0_i32 = arith.constant 0 : i32
    %c0_i32_0 = arith.constant 0 : i32
    return %c0_i32, %arg1 : i32, i32
  }
  func.func @transform_2(%arg0: i32, %arg1: i32) -> (i32, i32) {
    %c0_i32 = arith.constant 0 : i32
    %c0_i32_0 = arith.constant 0 : i32
    return %c0_i32, %arg1 : i32, i32
  }
  func.func @transform_3(%arg0: i32, %arg1: i32) -> (i32, i32) {
    %c0_i32 = arith.constant 0 : i32
    return %arg0, %arg1 : i32, i32
  }
}

module attributes {stable_mosaic.version = 11 : i64} {
  func.func @_mm_kernel_single(%arg0: i32, %arg1: i32, %arg2: memref<32x288xbf16, #tpu.memory_space<vmem>>, %arg3: memref<288x64xbf16, #tpu.memory_space<vmem>>, %arg4: memref<1x64xf32, #tpu.memory_space<vmem>>, %arg5: memref<32x64xbf16, #tpu.memory_space<vmem>>) attributes {dimension_semantics = [#tpu.dimension_semantics<parallel>, #tpu.dimension_semantics<parallel>], iteration_bounds = array<i64: 1, 1>, scalar_prefetch = 0 : i64, scratch_operands = 0 : i64, tpu.core_type = #tpu.core_type<tc>, window_params = [{transform_indices = @transform_0, window_bounds = array<i64: 32, 288>}, {transform_indices = @transform_1, window_bounds = array<i64: 288, 64>}, {transform_indices = @transform_2, window_bounds = array<i64: 1, 64>}, {transform_indices = @transform_3, window_bounds = array<i64: 32, 64>}]} {
    %c0 = arith.constant 0 : index
    %c0_0 = arith.constant 0 : index
    %0 = vector.load %arg2[%c0, %c0_0] : memref<32x288xbf16, #tpu.memory_space<vmem>>, vector<32x288xbf16>
    %c0_1 = arith.constant 0 : index
    %c0_2 = arith.constant 0 : index
    %1 = vector.load %arg3[%c0_1, %c0_2] : memref<288x64xbf16, #tpu.memory_space<vmem>>, vector<288x64xbf16>
    %cst = arith.constant dense<0.000000e+00> : vector<32x64xf32>
    %2 = tpu.matmul %0, %1, %cst {dimension_numbers = #tpu.dot_dimension_numbers<[1], [0], [0], [1], [0, 0, 1, 1], [], []>} : vector<32x288xbf16>, vector<288x64xbf16>, vector<32x64xf32> -> vector<32x64xf32>
    %c0_3 = arith.constant 0 : index
    %c0_4 = arith.constant 0 : index
    %3 = vector.load %arg4[%c0_3, %c0_4] : memref<1x64xf32, #tpu.memory_space<vmem>>, vector<1x64xf32>
    %4 = vector.broadcast %3 : vector<1x64xf32> to vector<32x64xf32>
    %5 = arith.addf %2, %4 : vector<32x64xf32>
    %cst_5 = arith.constant 0.000000e+00 : f32
    %6 = vector.broadcast %cst_5 : f32 to vector<32x64xf32>
    %7 = arith.maximumf %5, %6 : vector<32x64xf32>
    %8 = arith.truncf %7 : vector<32x64xf32> to vector<32x64xbf16>
    %c0_6 = arith.constant 0 : index
    %c0_7 = arith.constant 0 : index
    %9 = vector.load %arg5[%c0_6, %c0_7] : memref<32x64xbf16, #tpu.memory_space<vmem>>, vector<32x64xbf16>
    tpu.vector_store %arg5[%c0_6, %c0_7], %8 {strides = array<i32>} : memref<32x64xbf16, #tpu.memory_space<vmem>>, vector<32x64xbf16>,
    return
  }
  func.func @transform_0(%arg0: i32, %arg1: i32) -> (i32, i32) {
    %c0_i32 = arith.constant 0 : i32
    %c0_i32_0 = arith.constant 0 : i32
    return %arg0, %c0_i32 : i32, i32
  }
  func.func @transform_1(%arg0: i32, %arg1: i32) -> (i32, i32) {
    %c0_i32 = arith.constant 0 : i32
    %c0_i32_0 = arith.constant 0 : i32
    return %c0_i32, %arg1 : i32, i32
  }
  func.func @transform_2(%arg0: i32, %arg1: i32) -> (i32, i32) {
    %c0_i32 = arith.constant 0 : i32
    %c0_i32_0 = arith.constant 0 : i32
    return %c0_i32, %arg1 : i32, i32
  }
  func.func @transform_3(%arg0: i32, %arg1: i32) -> (i32, i32) {
    %c0_i32 = arith.constant 0 : i32
    return %arg0, %arg1 : i32, i32
  }
}

module attributes {stable_mosaic.version = 11 : i64} {
  func.func @_mm_kernel_single(%arg0: i32, %arg1: i32, %arg2: memref<32x64xbf16, #tpu.memory_space<vmem>>, %arg3: memref<64x32xbf16, #tpu.memory_space<vmem>>, %arg4: memref<1x32xf32, #tpu.memory_space<vmem>>, %arg5: memref<32x32xbf16, #tpu.memory_space<vmem>>) attributes {dimension_semantics = [#tpu.dimension_semantics<parallel>, #tpu.dimension_semantics<parallel>], iteration_bounds = array<i64: 1, 1>, scalar_prefetch = 0 : i64, scratch_operands = 0 : i64, tpu.core_type = #tpu.core_type<tc>, window_params = [{transform_indices = @transform_0, window_bounds = array<i64: 32, 64>}, {transform_indices = @transform_1, window_bounds = array<i64: 64, 32>}, {transform_indices = @transform_2, window_bounds = array<i64: 1, 32>}, {transform_indices = @transform_3, window_bounds = array<i64: 32, 32>}]} {
    %c0 = arith.constant 0 : index
    %c0_0 = arith.constant 0 : index
    %0 = vector.load %arg2[%c0, %c0_0] : memref<32x64xbf16, #tpu.memory_space<vmem>>, vector<32x64xbf16>
    %c0_1 = arith.constant 0 : index
    %c0_2 = arith.constant 0 : index
    %1 = vector.load %arg3[%c0_1, %c0_2] : memref<64x32xbf16, #tpu.memory_space<vmem>>, vector<64x32xbf16>
    %cst = arith.constant dense<0.000000e+00> : vector<32x32xf32>
    %2 = tpu.matmul %0, %1, %cst {dimension_numbers = #tpu.dot_dimension_numbers<[1], [0], [0], [1], [0, 0, 1, 1], [], []>} : vector<32x64xbf16>, vector<64x32xbf16>, vector<32x32xf32> -> vector<32x32xf32>
    %c0_3 = arith.constant 0 : index
    %c0_4 = arith.constant 0 : index
    %3 = vector.load %arg4[%c0_3, %c0_4] : memref<1x32xf32, #tpu.memory_space<vmem>>, vector<1x32xf32>
    %4 = vector.broadcast %3 : vector<1x32xf32> to vector<32x32xf32>
    %5 = arith.addf %2, %4 : vector<32x32xf32>
    %6 = arith.truncf %5 : vector<32x32xf32> to vector<32x32xbf16>
    %c0_5 = arith.constant 0 : index
    %c0_6 = arith.constant 0 : index
    %7 = vector.load %arg5[%c0_5, %c0_6] : memref<32x32xbf16, #tpu.memory_space<vmem>>, vector<32x32xbf16>
    tpu.vector_store %arg5[%c0_5, %c0_6], %6 {strides = array<i32>} : memref<32x32xbf16, #tpu.memory_space<vmem>>, vector<32x32xbf16>,
    return
  }
  func.func @transform_0(%arg0: i32, %arg1: i32) -> (i32, i32) {
    %c0_i32 = arith.constant 0 : i32
    %c0_i32_0 = arith.constant 0 : i32
    return %arg0, %c0_i32 : i32, i32
  }
  func.func @transform_1(%arg0: i32, %arg1: i32) -> (i32, i32) {
    %c0_i32 = arith.constant 0 : i32
    %c0_i32_0 = arith.constant 0 : i32
    return %c0_i32, %arg1 : i32, i32
  }
  func.func @transform_2(%arg0: i32, %arg1: i32) -> (i32, i32) {
    %c0_i32 = arith.constant 0 : i32
    %c0_i32_0 = arith.constant 0 : i32
    return %c0_i32, %arg1 : i32, i32
  }
  func.func @transform_3(%arg0: i32, %arg1: i32) -> (i32, i32) {
    %c0_i32 = arith.constant 0 : i32
    return %arg0, %arg1 : i32, i32
  }
}

module attributes {stable_mosaic.version = 11 : i64} {
  func.func @_mm_kernel_single(%arg0: i32, %arg1: i32, %arg2: memref<64x288xbf16, #tpu.memory_space<vmem>>, %arg3: memref<288x32xbf16, #tpu.memory_space<vmem>>, %arg4: memref<1x32xf32, #tpu.memory_space<vmem>>, %arg5: memref<64x32xbf16, #tpu.memory_space<vmem>>) attributes {dimension_semantics = [#tpu.dimension_semantics<parallel>, #tpu.dimension_semantics<parallel>], iteration_bounds = array<i64: 2, 1>, scalar_prefetch = 0 : i64, scratch_operands = 0 : i64, tpu.core_type = #tpu.core_type<tc>, window_params = [{transform_indices = @transform_0, window_bounds = array<i64: 64, 288>}, {transform_indices = @transform_1, window_bounds = array<i64: 288, 32>}, {transform_indices = @transform_2, window_bounds = array<i64: 1, 32>}, {transform_indices = @transform_3, window_bounds = array<i64: 64, 32>}]} {
    %c0 = arith.constant 0 : index
    %c0_0 = arith.constant 0 : index
    %0 = vector.load %arg2[%c0, %c0_0] : memref<64x288xbf16, #tpu.memory_space<vmem>>, vector<64x288xbf16>
    %c0_1 = arith.constant 0 : index
    %c0_2 = arith.constant 0 : index
    %1 = vector.load %arg3[%c0_1, %c0_2] : memref<288x32xbf16, #tpu.memory_space<vmem>>, vector<288x32xbf16>
    %cst = arith.constant dense<0.000000e+00> : vector<64x32xf32>
    %2 = tpu.matmul %0, %1, %cst {dimension_numbers = #tpu.dot_dimension_numbers<[1], [0], [0], [1], [0, 0, 1, 1], [], []>} : vector<64x288xbf16>, vector<288x32xbf16>, vector<64x32xf32> -> vector<64x32xf32>
    %c0_3 = arith.constant 0 : index
    %c0_4 = arith.constant 0 : index
    %3 = vector.load %arg4[%c0_3, %c0_4] : memref<1x32xf32, #tpu.memory_space<vmem>>, vector<1x32xf32>
    %4 = vector.broadcast %3 : vector<1x32xf32> to vector<64x32xf32>
    %5 = arith.addf %2, %4 : vector<64x32xf32>
    %6 = arith.truncf %5 : vector<64x32xf32> to vector<64x32xbf16>
    %c0_5 = arith.constant 0 : index
    %c0_6 = arith.constant 0 : index
    %7 = vector.load %arg5[%c0_5, %c0_6] : memref<64x32xbf16, #tpu.memory_space<vmem>>, vector<64x32xbf16>
    tpu.vector_store %arg5[%c0_5, %c0_6], %6 {strides = array<i32>} : memref<64x32xbf16, #tpu.memory_space<vmem>>, vector<64x32xbf16>,
    return
  }
  func.func @transform_0(%arg0: i32, %arg1: i32) -> (i32, i32) {
    %c0_i32 = arith.constant 0 : i32
    %c0_i32_0 = arith.constant 0 : i32
    return %arg0, %c0_i32 : i32, i32
  }
  func.func @transform_1(%arg0: i32, %arg1: i32) -> (i32, i32) {
    %c0_i32 = arith.constant 0 : i32
    %c0_i32_0 = arith.constant 0 : i32
    return %c0_i32, %arg1 : i32, i32
  }
  func.func @transform_2(%arg0: i32, %arg1: i32) -> (i32, i32) {
    %c0_i32 = arith.constant 0 : i32
    %c0_i32_0 = arith.constant 0 : i32
    return %c0_i32, %arg1 : i32, i32
  }
  func.func @transform_3(%arg0: i32, %arg1: i32) -> (i32, i32) {
    %c0_i32 = arith.constant 0 : i32
    return %arg0, %arg1 : i32, i32
  }
}

module attributes {stable_mosaic.version = 11 : i64} {
  func.func @_roi_kernel(%arg0: i32, %arg1: memref<196x64xbf16, #tpu.memory_space<vmem>>, %arg2: memref<1x64x32xbf16, #tpu.memory_space<vmem>>, %arg3: memref<1x196x32xbf16, #tpu.memory_space<vmem>>) attributes {dimension_semantics = [#tpu.dimension_semantics<parallel>], iteration_bounds = array<i64: 2>, scalar_prefetch = 0 : i64, scratch_operands = 0 : i64, tpu.core_type = #tpu.core_type<tc>, window_params = [{pipeline_mode = #tpu.pipeline_mode<synchronous>, transform_indices = @transform_0, window_bounds = array<i64: 196, 64>}, {transform_indices = @transform_1, window_bounds = array<i64: 1, 64, 32>}, {transform_indices = @transform_2, window_bounds = array<i64: 1, 196, 32>}]} {
    %c0 = arith.constant 0 : index
    %c0_0 = arith.constant 0 : index
    %0 = vector.load %arg1[%c0, %c0_0] : memref<196x64xbf16, #tpu.memory_space<vmem>>, vector<196x64xbf16>
    %c0_1 = arith.constant 0 : index
    %c0_2 = arith.constant 0 : index
    %c0_3 = arith.constant 0 : index
    %1 = vector.load %arg2[%c0_1, %c0_2, %c0_3] : memref<1x64x32xbf16, #tpu.memory_space<vmem>>, vector<1x64x32xbf16>
    %2 = vector.shape_cast %1 : vector<1x64x32xbf16> to vector<64x32xbf16>
    %cst = arith.constant dense<0.000000e+00> : vector<196x32xf32>
    %3 = tpu.matmul %0, %2, %cst {dimension_numbers = #tpu.dot_dimension_numbers<[1], [0], [0], [1], [0, 0, 1, 1], [], []>} : vector<196x64xbf16>, vector<64x32xbf16>, vector<196x32xf32> -> vector<196x32xf32>
    %4 = arith.truncf %3 : vector<196x32xf32> to vector<196x32xbf16>
    %c0_4 = arith.constant 0 : index
    %c0_5 = arith.constant 0 : index
    %c0_6 = arith.constant 0 : index
    %5 = vector.load %arg3[%c0_4, %c0_5, %c0_6] : memref<1x196x32xbf16, #tpu.memory_space<vmem>>, vector<1x196x32xbf16>
    %6 = vector.shape_cast %5 : vector<1x196x32xbf16> to vector<196x32xbf16>
    %7 = vector.shape_cast %4 : vector<196x32xbf16> to vector<1x196x32xbf16>
    tpu.vector_store %arg3[%c0_4, %c0_5, %c0_6], %7 {strides = array<i32>} : memref<1x196x32xbf16, #tpu.memory_space<vmem>>, vector<1x196x32xbf16>,
    return
  }
  func.func @transform_0(%arg0: i32) -> (i32, i32) {
    %c0_i32 = arith.constant 0 : i32
    %c0_i32_0 = arith.constant 0 : i32
    %c0_i32_1 = arith.constant 0 : i32
    return %c0_i32, %c0_i32_0 : i32, i32
  }
  func.func @transform_1(%arg0: i32) -> (i32, i32, i32) {
    %c0_i32 = arith.constant 0 : i32
    %c0_i32_0 = arith.constant 0 : i32
    %c0_i32_1 = arith.constant 0 : i32
    return %arg0, %c0_i32, %c0_i32_0 : i32, i32, i32
  }
  func.func @transform_2(%arg0: i32) -> (i32, i32, i32) {
    %c0_i32 = arith.constant 0 : i32
    %c0_i32_0 = arith.constant 0 : i32
    %c0_i32_1 = arith.constant 0 : i32
    return %arg0, %c0_i32, %c0_i32_0 : i32, i32, i32
  }
}

module attributes {stable_mosaic.version = 11 : i64} {
  func.func @_fused_mlp_kernel(%arg0: i32, %arg1: memref<8x1568xbf16, #tpu.memory_space<vmem>>, %arg2: memref<1568x64xbf16, #tpu.memory_space<vmem>>, %arg3: memref<1x64xf32, #tpu.memory_space<vmem>>, %arg4: memref<64x64xbf16, #tpu.memory_space<vmem>>, %arg5: memref<1x64xf32, #tpu.memory_space<vmem>>, %arg6: memref<64x128xbf16, #tpu.memory_space<vmem>>, %arg7: memref<1x128xf32, #tpu.memory_space<vmem>>, %arg8: memref<8x128xf32, #tpu.memory_space<vmem>>) attributes {dimension_semantics = [#tpu.dimension_semantics<parallel>], iteration_bounds = array<i64: 1>, scalar_prefetch = 0 : i64, scratch_operands = 0 : i64, tpu.core_type = #tpu.core_type<tc>, window_params = [{transform_indices = @transform_0, window_bounds = array<i64: 8, 1568>}, {pipeline_mode = #tpu.pipeline_mode<synchronous>, transform_indices = @transform_1, window_bounds = array<i64: 1568, 64>}, {pipeline_mode = #tpu.pipeline_mode<synchronous>, transform_indices = @transform_2, window_bounds = array<i64: 1, 64>}, {pipeline_mode = #tpu.pipeline_mode<synchronous>, transform_indices = @transform_3, window_bounds = array<i64: 64, 64>}, {pipeline_mode = #tpu.pipeline_mode<synchronous>, transform_indices = @transform_4, window_bounds = array<i64: 1, 64>}, {pipeline_mode = #tpu.pipeline_mode<synchronous>, transform_indices = @transform_5, window_bounds = array<i64: 64, 128>}, {pipeline_mode = #tpu.pipeline_mode<synchronous>, transform_indices = @transform_6, window_bounds = array<i64: 1, 128>}, {transform_indices = @transform_7, window_bounds = array<i64: 8, 128>}]} {
    %c0 = arith.constant 0 : index
    %c0_0 = arith.constant 0 : index
    %0 = vector.load %arg1[%c0, %c0_0] : memref<8x1568xbf16, #tpu.memory_space<vmem>>, vector<8x1568xbf16>
    %c0_1 = arith.constant 0 : index
    %c0_2 = arith.constant 0 : index
    %1 = vector.load %arg2[%c0_1, %c0_2] : memref<1568x64xbf16, #tpu.memory_space<vmem>>, vector<1568x64xbf16>
    %cst = arith.constant dense<0.000000e+00> : vector<8x64xf32>
    %2 = tpu.matmul %0, %1, %cst {dimension_numbers = #tpu.dot_dimension_numbers<[1], [0], [0], [1], [0, 0, 1, 1], [], []>} : vector<8x1568xbf16>, vector<1568x64xbf16>, vector<8x64xf32> -> vector<8x64xf32>
    %c0_3 = arith.constant 0 : index
    %c0_4 = arith.constant 0 : index
    %3 = vector.load %arg3[%c0_3, %c0_4] : memref<1x64xf32, #tpu.memory_space<vmem>>, vector<1x64xf32>
    %4 = vector.broadcast %3 : vector<1x64xf32> to vector<8x64xf32>
    %5 = arith.addf %2, %4 : vector<8x64xf32>
    %cst_5 = arith.constant 0.000000e+00 : f32
    %6 = vector.broadcast %cst_5 : f32 to vector<8x64xf32>
    %7 = arith.maximumf %5, %6 : vector<8x64xf32>
    %8 = arith.truncf %7 : vector<8x64xf32> to vector<8x64xbf16>
    %c0_6 = arith.constant 0 : index
    %c0_7 = arith.constant 0 : index
    %9 = vector.load %arg4[%c0_6, %c0_7] : memref<64x64xbf16, #tpu.memory_space<vmem>>, vector<64x64xbf16>
    %cst_8 = arith.constant dense<0.000000e+00> : vector<8x64xf32>
    %10 = tpu.matmul %8, %9, %cst_8 {dimension_numbers = #tpu.dot_dimension_numbers<[1], [0], [0], [1], [0, 0, 1, 1], [], []>} : vector<8x64xbf16>, vector<64x64xbf16>, vector<8x64xf32> -> vector<8x64xf32>
    %c0_9 = arith.constant 0 : index
    %c0_10 = arith.constant 0 : index
    %11 = vector.load %arg5[%c0_9, %c0_10] : memref<1x64xf32, #tpu.memory_space<vmem>>, vector<1x64xf32>
    %12 = vector.broadcast %11 : vector<1x64xf32> to vector<8x64xf32>
    %13 = arith.addf %10, %12 : vector<8x64xf32>
    %cst_11 = arith.constant 0.000000e+00 : f32
    %14 = vector.broadcast %cst_11 : f32 to vector<8x64xf32>
    %15 = arith.maximumf %13, %14 : vector<8x64xf32>
    %16 = arith.truncf %15 : vector<8x64xf32> to vector<8x64xbf16>
    %c0_12 = arith.constant 0 : index
    %c0_13 = arith.constant 0 : index
    %17 = vector.load %arg6[%c0_12, %c0_13] : memref<64x128xbf16, #tpu.memory_space<vmem>>, vector<64x128xbf16>
    %cst_14 = arith.constant dense<0.000000e+00> : vector<8x128xf32>
    %18 = tpu.matmul %16, %17, %cst_14 {dimension_numbers = #tpu.dot_dimension_numbers<[1], [0], [0], [1], [0, 0, 1, 1], [], []>} : vector<8x64xbf16>, vector<64x128xbf16>, vector<8x128xf32> -> vector<8x128xf32>
    %c0_15 = arith.constant 0 : index
    %c0_16 = arith.constant 0 : index
    %19 = vector.load %arg7[%c0_15, %c0_16] : memref<1x128xf32, #tpu.memory_space<vmem>>, vector<1x128xf32>
    %20 = vector.broadcast %19 : vector<1x128xf32> to vector<8x128xf32>
    %21 = arith.addf %18, %20 : vector<8x128xf32>
    %c0_17 = arith.constant 0 : index
    %c0_18 = arith.constant 0 : index
    %22 = vector.load %arg8[%c0_17, %c0_18] : memref<8x128xf32, #tpu.memory_space<vmem>>, vector<8x128xf32>
    tpu.vector_store %arg8[%c0_17, %c0_18], %21 {strides = array<i32>} : memref<8x128xf32, #tpu.memory_space<vmem>>, vector<8x128xf32>,
    return
  }
  func.func @transform_0(%arg0: i32) -> (i32, i32) {
    %c0_i32 = arith.constant 0 : i32
    %c0_i32_0 = arith.constant 0 : i32
    return %arg0, %c0_i32 : i32, i32
  }
  func.func @transform_1(%arg0: i32) -> (i32, i32) {
    %c0_i32 = arith.constant 0 : i32
    %c0_i32_0 = arith.constant 0 : i32
    %c0_i32_1 = arith.constant 0 : i32
    return %c0_i32, %c0_i32_0 : i32, i32
  }
  func.func @transform_2(%arg0: i32) -> (i32, i32) {
    %c0_i32 = arith.constant 0 : i32
    %c0_i32_0 = arith.constant 0 : i32
    %c0_i32_1 = arith.constant 0 : i32
    return %c0_i32, %c0_i32_0 : i32, i32
  }
  func.func @transform_3(%arg0: i32) -> (i32, i32) {
    %c0_i32 = arith.constant 0 : i32
    %c0_i32_0 = arith.constant 0 : i32
    %c0_i32_1 = arith.constant 0 : i32
    return %c0_i32, %c0_i32_0 : i32, i32
  }
  func.func @transform_4(%arg0: i32) -> (i32, i32) {
    %c0_i32 = arith.constant 0 : i32
    %c0_i32_0 = arith.constant 0 : i32
    %c0_i32_1 = arith.constant 0 : i32
    return %c0_i32, %c0_i32_0 : i32, i32
  }
  func.func @transform_5(%arg0: i32) -> (i32, i32) {
    %c0_i32 = arith.constant 0 : i32
    %c0_i32_0 = arith.constant 0 : i32
    %c0_i32_1 = arith.constant 0 : i32
    return %c0_i32, %c0_i32_0 : i32, i32
  }
  func.func @transform_6(%arg0: i32) -> (i32, i32) {
    %c0_i32 = arith.constant 0 : i32
    %c0_i32_0 = arith.constant 0 : i32
    %c0_i32_1 = arith.constant 0 : i32
    return %c0_i32, %c0_i32_0 : i32, i32
  }
  func.func @transform_7(%arg0: i32) -> (i32, i32) {
    %c0_i32 = arith.constant 0 : i32
    %c0_i32_0 = arith.constant 0 : i32
    return %arg0, %c0_i32 : i32, i32
  }
}

module attributes {stable_mosaic.version = 11 : i64} {
  func.func @_mm_kernel_single(%arg0: i32, %arg1: i32, %arg2: memref<32x288xbf16, #tpu.memory_space<vmem>>, %arg3: memref<288x32xbf16, #tpu.memory_space<vmem>>, %arg4: memref<1x32xf32, #tpu.memory_space<vmem>>, %arg5: memref<32x32xbf16, #tpu.memory_space<vmem>>) attributes {dimension_semantics = [#tpu.dimension_semantics<parallel>, #tpu.dimension_semantics<parallel>], iteration_bounds = array<i64: 1, 1>, scalar_prefetch = 0 : i64, scratch_operands = 0 : i64, tpu.core_type = #tpu.core_type<tc>, window_params = [{transform_indices = @transform_0, window_bounds = array<i64: 32, 288>}, {transform_indices = @transform_1, window_bounds = array<i64: 288, 32>}, {transform_indices = @transform_2, window_bounds = array<i64: 1, 32>}, {transform_indices = @transform_3, window_bounds = array<i64: 32, 32>}]} {
    %c0 = arith.constant 0 : index
    %c0_0 = arith.constant 0 : index
    %0 = vector.load %arg2[%c0, %c0_0] : memref<32x288xbf16, #tpu.memory_space<vmem>>, vector<32x288xbf16>
    %c0_1 = arith.constant 0 : index
    %c0_2 = arith.constant 0 : index
    %1 = vector.load %arg3[%c0_1, %c0_2] : memref<288x32xbf16, #tpu.memory_space<vmem>>, vector<288x32xbf16>
    %cst = arith.constant dense<0.000000e+00> : vector<32x32xf32>
    %2 = tpu.matmul %0, %1, %cst {dimension_numbers = #tpu.dot_dimension_numbers<[1], [0], [0], [1], [0, 0, 1, 1], [], []>} : vector<32x288xbf16>, vector<288x32xbf16>, vector<32x32xf32> -> vector<32x32xf32>
    %c0_3 = arith.constant 0 : index
    %c0_4 = arith.constant 0 : index
    %3 = vector.load %arg4[%c0_3, %c0_4] : memref<1x32xf32, #tpu.memory_space<vmem>>, vector<1x32xf32>
    %4 = vector.broadcast %3 : vector<1x32xf32> to vector<32x32xf32>
    %5 = arith.addf %2, %4 : vector<32x32xf32>
    %6 = arith.truncf %5 : vector<32x32xf32> to vector<32x32xbf16>
    %c0_5 = arith.constant 0 : index
    %c0_6 = arith.constant 0 : index
    %7 = vector.load %arg5[%c0_5, %c0_6] : memref<32x32xbf16, #tpu.memory_space<vmem>>, vector<32x32xbf16>
    tpu.vector_store %arg5[%c0_5, %c0_6], %6 {strides = array<i32>} : memref<32x32xbf16, #tpu.memory_space<vmem>>, vector<32x32xbf16>,
    return
  }
  func.func @transform_0(%arg0: i32, %arg1: i32) -> (i32, i32) {
    %c0_i32 = arith.constant 0 : i32
    %c0_i32_0 = arith.constant 0 : i32
    return %arg0, %c0_i32 : i32, i32
  }
  func.func @transform_1(%arg0: i32, %arg1: i32) -> (i32, i32) {
    %c0_i32 = arith.constant 0 : i32
    %c0_i32_0 = arith.constant 0 : i32
    return %c0_i32, %arg1 : i32, i32
  }
  func.func @transform_2(%arg0: i32, %arg1: i32) -> (i32, i32) {
    %c0_i32 = arith.constant 0 : i32
    %c0_i32_0 = arith.constant 0 : i32
    return %c0_i32, %arg1 : i32, i32
  }
  func.func @transform_3(%arg0: i32, %arg1: i32) -> (i32, i32) {
    %c0_i32 = arith.constant 0 : i32
    return %arg0, %arg1 : i32, i32
  }
}

module attributes {stable_mosaic.version = 11 : i64} {
  func.func @_fused_mlp_kernel(%arg0: i32, %arg1: memref<80x288xbf16, #tpu.memory_space<vmem>>, %arg2: memref<288x32xbf16, #tpu.memory_space<vmem>>, %arg3: memref<1x32xf32, #tpu.memory_space<vmem>>, %arg4: memref<32x128xbf16, #tpu.memory_space<vmem>>, %arg5: memref<1x128xf32, #tpu.memory_space<vmem>>, %arg6: memref<80x128xf32, #tpu.memory_space<vmem>>) attributes {dimension_semantics = [#tpu.dimension_semantics<parallel>], iteration_bounds = array<i64: 2>, scalar_prefetch = 0 : i64, scratch_operands = 0 : i64, tpu.core_type = #tpu.core_type<tc>, window_params = [{transform_indices = @transform_0, window_bounds = array<i64: 80, 288>}, {pipeline_mode = #tpu.pipeline_mode<synchronous>, transform_indices = @transform_1, window_bounds = array<i64: 288, 32>}, {pipeline_mode = #tpu.pipeline_mode<synchronous>, transform_indices = @transform_2, window_bounds = array<i64: 1, 32>}, {pipeline_mode = #tpu.pipeline_mode<synchronous>, transform_indices = @transform_3, window_bounds = array<i64: 32, 128>}, {pipeline_mode = #tpu.pipeline_mode<synchronous>, transform_indices = @transform_4, window_bounds = array<i64: 1, 128>}, {transform_indices = @transform_5, window_bounds = array<i64: 80, 128>}]} {
    %c0 = arith.constant 0 : index
    %c0_0 = arith.constant 0 : index
    %0 = vector.load %arg1[%c0, %c0_0] : memref<80x288xbf16, #tpu.memory_space<vmem>>, vector<80x288xbf16>
    %c0_1 = arith.constant 0 : index
    %c0_2 = arith.constant 0 : index
    %1 = vector.load %arg2[%c0_1, %c0_2] : memref<288x32xbf16, #tpu.memory_space<vmem>>, vector<288x32xbf16>
    %cst = arith.constant dense<0.000000e+00> : vector<80x32xf32>
    %2 = tpu.matmul %0, %1, %cst {dimension_numbers = #tpu.dot_dimension_numbers<[1], [0], [0], [1], [0, 0, 1, 1], [], []>} : vector<80x288xbf16>, vector<288x32xbf16>, vector<80x32xf32> -> vector<80x32xf32>
    %c0_3 = arith.constant 0 : index
    %c0_4 = arith.constant 0 : index
    %3 = vector.load %arg3[%c0_3, %c0_4] : memref<1x32xf32, #tpu.memory_space<vmem>>, vector<1x32xf32>
    %4 = vector.broadcast %3 : vector<1x32xf32> to vector<80x32xf32>
    %5 = arith.addf %2, %4 : vector<80x32xf32>
    %cst_5 = arith.constant 0.000000e+00 : f32
    %6 = vector.broadcast %cst_5 : f32 to vector<80x32xf32>
    %7 = arith.maximumf %5, %6 : vector<80x32xf32>
    %8 = arith.truncf %7 : vector<80x32xf32> to vector<80x32xbf16>
    %c0_6 = arith.constant 0 : index
    %c0_7 = arith.constant 0 : index
    %9 = vector.load %arg4[%c0_6, %c0_7] : memref<32x128xbf16, #tpu.memory_space<vmem>>, vector<32x128xbf16>
    %cst_8 = arith.constant dense<0.000000e+00> : vector<80x128xf32>
    %10 = tpu.matmul %8, %9, %cst_8 {dimension_numbers = #tpu.dot_dimension_numbers<[1], [0], [0], [1], [0, 0, 1, 1], [], []>} : vector<80x32xbf16>, vector<32x128xbf16>, vector<80x128xf32> -> vector<80x128xf32>
    %c0_9 = arith.constant 0 : index
    %c0_10 = arith.constant 0 : index
    %11 = vector.load %arg5[%c0_9, %c0_10] : memref<1x128xf32, #tpu.memory_space<vmem>>, vector<1x128xf32>
    %12 = vector.broadcast %11 : vector<1x128xf32> to vector<80x128xf32>
    %13 = arith.addf %10, %12 : vector<80x128xf32>
    %c0_11 = arith.constant 0 : index
    %c0_12 = arith.constant 0 : index
    %14 = vector.load %arg6[%c0_11, %c0_12] : memref<80x128xf32, #tpu.memory_space<vmem>>, vector<80x128xf32>
    tpu.vector_store %arg6[%c0_11, %c0_12], %13 {strides = array<i32>} : memref<80x128xf32, #tpu.memory_space<vmem>>, vector<80x128xf32>,
    return
  }
  func.func @transform_0(%arg0: i32) -> (i32, i32) {
    %c0_i32 = arith.constant 0 : i32
    %c0_i32_0 = arith.constant 0 : i32
    return %arg0, %c0_i32 : i32, i32
  }
  func.func @transform_1(%arg0: i32) -> (i32, i32) {
    %c0_i32 = arith.constant 0 : i32
    %c0_i32_0 = arith.constant 0 : i32
    %c0_i32_1 = arith.constant 0 : i32
    return %c0_i32, %c0_i32_0 : i32, i32
  }
  func.func @transform_2(%arg0: i32) -> (i32, i32) {
    %c0_i32 = arith.constant 0 : i32
    %c0_i32_0 = arith.constant 0 : i32
    %c0_i32_1 = arith.constant 0 : i32
    return %c0_i32, %c0_i32_0 : i32, i32
  }
  func.func @transform_3(%arg0: i32) -> (i32, i32) {
    %c0_i32 = arith.constant 0 : i32
    %c0_i32_0 = arith.constant 0 : i32
    %c0_i32_1 = arith.constant 0 : i32
    return %c0_i32, %c0_i32_0 : i32, i32
  }
  func.func @transform_4(%arg0: i32) -> (i32, i32) {
    %c0_i32 = arith.constant 0 : i32
    %c0_i32_0 = arith.constant 0 : i32
    %c0_i32_1 = arith.constant 0 : i32
    return %c0_i32, %c0_i32_0 : i32, i32
  }
  func.func @transform_5(%arg0: i32) -> (i32, i32) {
    %c0_i32 = arith.constant 0 : i32
    %c0_i32_0 = arith.constant 0 : i32
    return %arg0, %c0_i32 : i32, i32
  }
}

</mosaic_0001>

<bundles_post_ra>
// kernel: faster_rcnn_forward.10
= control target key start
LH: loop header
LB: loop body
LE: loop exit
PB: predicated region body
PF: predicated region fallthrough
CT: control target
= control target key end

     0   :  { %s1130_s12 = smov 0   ;;  %s1132_s13 = smov 0   ;;  %s1313_s0 = inlined_call_operand.vmem [shape: bf16[512,27], index: 0, kind: input, shape index: {}]   ;;  %s1314_s1 = inlined_call_operand.vmem [shape: bf16[27,16], index: 1, kind: input, shape index: {}]   ;;  %s1315_s2 = inlined_call_operand.vmem [shape: f32[1,16], index: 2, kind: input, shape index: {}]   ;;  %s1316_s3 = inlined_call_operand.vmem [shape: bf16[512,16], index: 3, kind: output, shape index: {}]  }
   0x1   :  { %s1134_s14 = smov 0  }
   0x2 LB: > { %s25_s15 = sadd.s32 1, %s1103_s13  ;;  %p878_p0 = scmp.ge.s32.totalorder %s1107_s14, 1  ;;  %s1107_s14 = sphi %s1134_s14, %s13_s14   ;;  %s1103_s13 = sphi %s1132_s13, %s1318_s13   ;;  %s1099_s12 = sphi %s1130_s12, %s1317_s12  }
   0x3   : > { %p27_p1 = scmp.ge.s32.totalorder %s25_s15, 2  ;;  %p169_p2 = scmp.lt.s32.totalorder %s1107_s14, 3 }
   0x5   : > { %s1320_s15 = smov (%p27_p1, %s25_s15), 0  ;;  %p170_p3 = pnand %p878_p0, %p169_p2 }
   0x6   : > { %s879_s18 = sshll.u32 (!%p170_p3), %s1099_s12, 5 }
   0x7   : > { %173 = sbr.rel (%p170_p3) target bundleno = 256 (0x100), region = 32  ;;  %p204_p4 = scmp.lt.s32.totalorder (!%p170_p3), %s879_s18, 63 }
   0xc   : > { %v1067_v0 = vld [vmem:[%s1314_s1 + $0x8] sm:$0x3f]   ;;  %vm409_vm0 = vcmask 1044480   ;;  %vm410_vm1 = vcmask 1045504   ;;  %v1109_v1 = vmov 65535   ;;  %v1068_v5 = vld [vmem:[%s1314_s1] sm:$0xff]  }
   0xd   : > { %v411_v2 = vsel %vm409_vm0, 4294967295, %v1109_v1  ;;  %s1322_s18 = smov (!%p204_p4, %s879_s18), 63  ;;  %vm360_vm2 = vcmask 220160   ;;  %v1199_v22 = vld [vmem:[%s1315_s2] ss:$0 sm:$0xff]  ;;  %vm737_vm3 = vcmask 125952  }
   0xe   : > { %v412_v3 = vsel %vm410_vm1, %v411_v2, 0  ;;  %s880_s21 = sshll.u32 %s1322_s18, 2 }
   0xf   : > { %v414_v4 = vand.u32 %v1067_v0, %v412_v3  ;;  %s1162_s24 = scalar_lea.vmem %s1313_s0, %s880_s21  ;;  %s1210_s29 = scalar_lea.vmem %s1316_s3, %s880_s21 }
  0x10   : > { %v1069_v6 = vld [vmem:[%s1162_s24] sm:$0xff]   ;;  %v1071_v8 = vld [vmem:[%s1162_s24 + $0x8] sm:$0xff]   ;;  %v1073_v10 = vld [vmem:[%s1162_s24 + $0x10] sm:$0xff]  }
  0x11   : > { %1002 = vmatprep.subr.bf16.mxu0 %v414_v4  ;;  %1038 = vmatprep.subr.bf16.mxu1 %v414_v4  ;;  %v1070_v7 = vld [vmem:[%s1162_s24 + $0x40] sm:$0xff]   ;;  %v1072_v9 = vld [vmem:[%s1162_s24 + $0x48] sm:$0xff]   ;;  %v1074_v11 = vld [vmem:[%s1162_s24 + $0x50] sm:$0xff]  }
  0x12   : > { %1003 = vmatpush3.bf16.msra.mxu0 %v414_v4  ;;  %1040 = vmatpush3.bf16.msra.mxu1 %v414_v4  ;;  %v1075_v12 = vld [vmem:[%s1162_s24 + $0x18] sm:$0xff]   ;;  %v1077_v14 = vld [vmem:[%s1162_s24 + $0x20] sm:$0xff]   ;;  %v1079_v16 = vld [vmem:[%s1162_s24 + $0x28] sm:$0xff]  }
  0x13   : > { %1004 = vmatprep.subr.bf16.mxu0 %v1068_v5  ;;  %1039 = vmatprep.subr.bf16.mxu1 %v1068_v5  ;;  %v1076_v13 = vld [vmem:[%s1162_s24 + $0x58] sm:$0xff]   ;;  %v1078_v15 = vld [vmem:[%s1162_s24 + $0x60] sm:$0xff]   ;;  %v1080_v17 = vld [vmem:[%s1162_s24 + $0x68] sm:$0xff]  }
  0x14   : > { %1006 = vmatprep.mubr.msk.bf16.mxu0 %vm360_vm2, %v1069_v6  ;;  %1022 = vmatprep.mubr.msk.bf16.mxu1 %vm360_vm2, %v1070_v7  ;;  %v1081_v18 = vld [vmem:[%s1162_s24 + $0x30] sm:$0xff]   ;;  %v1083_v20 = vld [vmem:[%s1162_s24 + $0x38] sm:$0xff]  }
  0x15   : > { %v1082_v19 = vld [vmem:[%s1162_s24 + $0x70] sm:$0xff]   ;;  %v1084_v21 = vld [vmem:[%s1162_s24 + $0x78] sm:$0xff]  }
  0x16   : > { %1005 = vmatpush3.bf16.msra.mxu0 %v1068_v5  ;;  %1041 = vmatpush3.bf16.msra.mxu1 %v1068_v5 }
  0x19   : > { %1007 = vmatmul.mubr.msk.bf16.vlgmr.msra.gmra.mxu0 %vm360_vm2, %v1071_v8  ;;  %1023 = vmatmul.mubr.msk.bf16.vlgmr.msra.gmra.mxu1 %vm360_vm2, %v1072_v9 }
  0x1a   : > { %1010 = vmatprep.mubr.msk.bf16.mxu0 %vm360_vm2, %v1073_v10  ;;  %1026 = vmatprep.mubr.msk.bf16.mxu1 %vm360_vm2, %v1074_v11 }
  0x21   : > { %1011 = vmatmul.mubr.msk.bf16.gmra.mxu0 %vm360_vm2, %v1075_v12  ;;  %1027 = vmatmul.mubr.msk.bf16.gmra.mxu1 %vm360_vm2, %v1076_v13 }
  0x22   : > { %1014 = vmatprep.mubr.msk.bf16.mxu0 %vm360_vm2, %v1077_v14  ;;  %1030 = vmatprep.mubr.msk.bf16.mxu1 %vm360_vm2, %v1078_v15 }
  0x29   : > { %1015 = vmatmul.mubr.msk.bf16.gmra.mxu0 %vm360_vm2, %v1079_v16  ;;  %1031 = vmatmul.mubr.msk.bf16.gmra.mxu1 %vm360_vm2, %v1080_v17 }
  0x2a   : > { %1018 = vmatprep.mubr.msk.bf16.mxu0 %vm360_vm2, %v1081_v18  ;;  %1034 = vmatprep.mubr.msk.bf16.mxu1 %vm360_vm2, %v1082_v19 }
  0x31   : > { %1019 = vmatmul.mubr.msk.bf16.gmra.mxu0 %vm360_vm2, %v1083_v20  ;;  %1035 = vmatmul.mubr.msk.bf16.gmra.mxu1 %vm360_vm2, %v1084_v21 }
  0xd9   : > { %v1008_v23 = vpop.f32.mrf.mxu0  ;;  %v1024_v24 = vpop.f32.mrf.mxu1 }
  0xda   : > { %v459_v25 = vadd.f32 %v1008_v23, %v1199_v22  ;;  %v523_v26 = vadd.f32 %v1024_v24, %v1199_v22 }
  0xdb   : > { %v450_v27 = vpop.f32.mrf.mxu0  ;;  %v514_v28 = vpop.f32.mrf.mxu1 }
  0xdc   : > { %v579_v29 = vmax.f32 %v459_v25, 0.0  ;;  %v595_v30 = vmax.f32 %v523_v26, 0.0  ;;  %v451_v31 = vadd.f32 %v1199_v22, %v450_v27  ;;  %v515_v32 = vadd.f32 %v1199_v22, %v514_v28 }
  0xdd   : > { %v1009_v33 = vpop.f32.mrf.mxu0  ;;  %v1025_v34 = vpop.f32.mrf.mxu1 }
  0xde   : > { %v954_v35 = vpack.c.bf16 %v579_v29, %v579_v29  ;;  %v970_v36 = vpack.c.bf16 %v595_v30, %v595_v30  ;;  %v577_v37 = vmax.f32 %v451_v31, 0.0  ;;  %v593_v38 = vmax.f32 %v515_v32, 0.0 }
  0xdf   : > { %v462_v39 = vadd.f32 %v1009_v33, %v1199_v22  ;;  %v526_v40 = vadd.f32 %v1025_v34, %v1199_v22  ;;  %v453_v41 = vpop.f32.mrf.mxu0  ;;  %v517_v42 = vpop.f32.mrf.mxu1 }
  0xe0   : > { %740 = vst.msk [vmem:[%s1210_s29 + $0x8] sm:$0xf] %vm737_vm3, %v954_v35  ;;  %756 = vst.msk [vmem:[%s1210_s29 + $0x48] sm:$0xf] %vm737_vm3, %v970_v36  ;;  %v952_v43 = vpack.c.bf16 %v577_v37, %v577_v37  ;;  %v968_v44 = vpack.c.bf16 %v593_v38, %v593_v38  ;;  %v454_v45 = vadd.f32 %v1199_v22, %v453_v41 }
  0xe1   : > { %v518_v46 = vadd.f32 %v1199_v22, %v517_v42  ;;  %v580_v47 = vmax.f32 %v462_v39, 0.0  ;;  %v596_v48 = vmax.f32 %v526_v40, 0.0  ;;  %v1012_v49 = vpop.f32.mrf.mxu0  ;;  %v1028_v50 = vpop.f32.mrf.mxu1 }
  0xe2   : > { %738 = vst.msk [vmem:[%s1210_s29] sm:$0xf] %vm737_vm3, %v952_v43  ;;  %754 = vst.msk [vmem:[%s1210_s29 + $0x40] sm:$0xf] %vm737_vm3, %v968_v44  ;;  %v578_v51 = vmax.f32 %v454_v45, 0.0  ;;  %v475_v53 = vadd.f32 %v1012_v49, %v1199_v22  ;;  %v539_v54 = vadd.f32 %v1028_v50, %v1199_v22 }
  0xe3   : > { %v594_v52 = vmax.f32 %v518_v46, 0.0  ;;  %v955_v55 = vpack.c.bf16 %v580_v47, %v580_v47  ;;  %v971_v56 = vpack.c.bf16 %v596_v48, %v596_v48  ;;  %v466_v57 = vpop.f32.mrf.mxu0  ;;  %v530_v58 = vpop.f32.mrf.mxu1 }
  0xe4   : > { %v953_v59 = vpack.c.bf16 %v578_v51, %v578_v51  ;;  %v583_v61 = vmax.f32 %v475_v53, 0.0  ;;  %v599_v62 = vmax.f32 %v539_v54, 0.0  ;;  %v467_v63 = vadd.f32 %v1199_v22, %v466_v57 }
  0xe5   : > { %v969_v60 = vpack.c.bf16 %v594_v52, %v594_v52  ;;  %741 = vst.msk [vmem:[%s1210_s29 + $0xc] sm:$0xf] %vm737_vm3, %v955_v55  ;;  %757 = vst.msk [vmem:[%s1210_s29 + $0x4c] sm:$0xf] %vm737_vm3, %v971_v56  ;;  %v531_v0 = vadd.f32 %v1199_v22, %v530_v58  ;;  %v1013_v1 = vpop.f32.mrf.mxu0  ;;  %v1029_v2 = vpop.f32.mrf.mxu1 }
  0xe6   : > { %739 = vst.msk [vmem:[%s1210_s29 + $0x4] sm:$0xf] %vm737_vm3, %v953_v59  ;;  %v958_v3 = vpack.c.bf16 %v583_v61, %v583_v61  ;;  %v974_v4 = vpack.c.bf16 %v599_v62, %v599_v62  ;;  %v478_v5 = vadd.f32 %v1013_v1, %v1199_v22  ;;  %v542_v6 = vadd.f32 %v1029_v2, %v1199_v22 }
  0xe7   : > { %755 = vst.msk [vmem:[%s1210_s29 + $0x44] sm:$0xf] %vm737_vm3, %v969_v60  ;;  %v581_v7 = vmax.f32 %v467_v63, 0.0  ;;  %v597_v8 = vmax.f32 %v531_v0, 0.0  ;;  %v469_v9 = vpop.f32.mrf.mxu0  ;;  %v533_v10 = vpop.f32.mrf.mxu1 }
  0xe8   : > { %744 = vst.msk [vmem:[%s1210_s29 + $0x18] sm:$0xf] %vm737_vm3, %v958_v3  ;;  %760 = vst.msk [vmem:[%s1210_s29 + $0x58] sm:$0xf] %vm737_vm3, %v974_v4  ;;  %v584_v11 = vmax.f32 %v478_v5, 0.0  ;;  %v600_v12 = vmax.f32 %v542_v6, 0.0  ;;  %v470_v13 = vadd.f32 %v1199_v22, %v469_v9  ;;  %v534_v14 = vadd.f32 %v1199_v22, %v533_v10 }
  0xe9   : > { %v956_v15 = vpack.c.bf16 %v581_v7, %v581_v7  ;;  %v972_v16 = vpack.c.bf16 %v597_v8, %v597_v8  ;;  %v1016_v17 = vpop.f32.mrf.mxu0  ;;  %v1032_v18 = vpop.f32.mrf.mxu1 }
  0xea   : > { %v959_v19 = vpack.c.bf16 %v584_v11, %v584_v11  ;;  %v975_v20 = vpack.c.bf16 %v600_v12, %v600_v12  ;;  %v582_v21 = vmax.f32 %v470_v13, 0.0  ;;  %v598_v23 = vmax.f32 %v534_v14, 0.0 }
  0xeb   : > { %742 = vst.msk [vmem:[%s1210_s29 + $0x10] sm:$0xf] %vm737_vm3, %v956_v15  ;;  %758 = vst.msk [vmem:[%s1210_s29 + $0x50] sm:$0xf] %vm737_vm3, %v972_v16  ;;  %v491_v24 = vadd.f32 %v1016_v17, %v1199_v22  ;;  %v555_v25 = vadd.f32 %v1032_v18, %v1199_v22  ;;  %v482_v26 = vpop.f32.mrf.mxu0  ;;  %v546_v27 = vpop.f32.mrf.mxu1 }
  0xec   : > { %745 = vst.msk [vmem:[%s1210_s29 + $0x1c] sm:$0xf] %vm737_vm3, %v959_v19  ;;  %761 = vst.msk [vmem:[%s1210_s29 + $0x5c] sm:$0xf] %vm737_vm3, %v975_v20  ;;  %v957_v28 = vpack.c.bf16 %v582_v21, %v582_v21  ;;  %v973_v29 = vpack.c.bf16 %v598_v23, %v598_v23  ;;  %v483_v30 = vadd.f32 %v1199_v22, %v482_v26 }
  0xed   : > { %v547_v31 = vadd.f32 %v1199_v22, %v546_v27  ;;  %v587_v32 = vmax.f32 %v491_v24, 0.0  ;;  %v603_v33 = vmax.f32 %v555_v25, 0.0  ;;  %v1017_v34 = vpop.f32.mrf.mxu0  ;;  %v1033_v35 = vpop.f32.mrf.mxu1 }
  0xee   : > { %743 = vst.msk [vmem:[%s1210_s29 + $0x14] sm:$0xf] %vm737_vm3, %v957_v28  ;;  %759 = vst.msk [vmem:[%s1210_s29 + $0x54] sm:$0xf] %vm737_vm3, %v973_v29  ;;  %v585_v36 = vmax.f32 %v483_v30, 0.0  ;;  %v494_v38 = vadd.f32 %v1017_v34, %v1199_v22  ;;  %v558_v39 = vadd.f32 %v1033_v35, %v1199_v22 }
  0xef   : > { %v601_v37 = vmax.f32 %v547_v31, 0.0  ;;  %v962_v40 = vpack.c.bf16 %v587_v32, %v587_v32  ;;  %v978_v41 = vpack.c.bf16 %v603_v33, %v603_v33  ;;  %v485_v42 = vpop.f32.mrf.mxu0  ;;  %v549_v43 = vpop.f32.mrf.mxu1 }
  0xf0   : > { %v960_v44 = vpack.c.bf16 %v585_v36, %v585_v36  ;;  %v588_v46 = vmax.f32 %v494_v38, 0.0  ;;  %v604_v47 = vmax.f32 %v558_v39, 0.0  ;;  %v486_v48 = vadd.f32 %v1199_v22, %v485_v42 }
  0xf1   : > { %v976_v45 = vpack.c.bf16 %v601_v37, %v601_v37  ;;  %748 = vst.msk [vmem:[%s1210_s29 + $0x28] sm:$0xf] %vm737_vm3, %v962_v40  ;;  %764 = vst.msk [vmem:[%s1210_s29 + $0x68] sm:$0xf] %vm737_vm3, %v978_v41  ;;  %v550_v49 = vadd.f32 %v1199_v22, %v549_v43  ;;  %v1020_v50 = vpop.f32.mrf.mxu0  ;;  %v1036_v51 = vpop.f32.mrf.mxu1 }
  0xf2   : > { %746 = vst.msk [vmem:[%s1210_s29 + $0x20] sm:$0xf] %vm737_vm3, %v960_v44  ;;  %v963_v52 = vpack.c.bf16 %v588_v46, %v588_v46  ;;  %v979_v53 = vpack.c.bf16 %v604_v47, %v604_v47  ;;  %v507_v54 = vadd.f32 %v1020_v50, %v1199_v22  ;;  %v571_v55 = vadd.f32 %v1036_v51, %v1199_v22 }
  0xf3   : > { %762 = vst.msk [vmem:[%s1210_s29 + $0x60] sm:$0xf] %vm737_vm3, %v976_v45  ;;  %v586_v56 = vmax.f32 %v486_v48, 0.0  ;;  %v602_v57 = vmax.f32 %v550_v49, 0.0  ;;  %v498_v58 = vpop.f32.mrf.mxu0  ;;  %v562_v59 = vpop.f32.mrf.mxu1 }
  0xf4   : > { %749 = vst.msk [vmem:[%s1210_s29 + $0x2c] sm:$0xf] %vm737_vm3, %v963_v52  ;;  %765 = vst.msk [vmem:[%s1210_s29 + $0x6c] sm:$0xf] %vm737_vm3, %v979_v53  ;;  %v591_v60 = vmax.f32 %v507_v54, 0.0  ;;  %v607_v61 = vmax.f32 %v571_v55, 0.0  ;;  %v499_v62 = vadd.f32 %v1199_v22, %v498_v58  ;;  %v563_v63 = vadd.f32 %v1199_v22, %v562_v59 }
  0xf5   : > { %v961_v0 = vpack.c.bf16 %v586_v56, %v586_v56  ;;  %v977_v1 = vpack.c.bf16 %v602_v57, %v602_v57  ;;  %v1021_v2 = vpop.f32.mrf.mxu0  ;;  %v1037_v3 = vpop.f32.mrf.mxu1 }
  0xf6   : > { %v966_v4 = vpack.c.bf16 %v591_v60, %v591_v60  ;;  %v982_v5 = vpack.c.bf16 %v607_v61, %v607_v61  ;;  %v589_v6 = vmax.f32 %v499_v62, 0.0  ;;  %v605_v7 = vmax.f32 %v563_v63, 0.0 }
  0xf7   : > { %747 = vst.msk [vmem:[%s1210_s29 + $0x24] sm:$0xf] %vm737_vm3, %v961_v0  ;;  %763 = vst.msk [vmem:[%s1210_s29 + $0x64] sm:$0xf] %vm737_vm3, %v977_v1  ;;  %v510_v8 = vadd.f32 %v1021_v2, %v1199_v22  ;;  %v574_v9 = vadd.f32 %v1037_v3, %v1199_v22  ;;  %v501_v10 = vpop.f32.mrf.mxu0  ;;  %v565_v11 = vpop.f32.mrf.mxu1 }
  0xf8   : > { %752 = vst.msk [vmem:[%s1210_s29 + $0x38] sm:$0xf] %vm737_vm3, %v966_v4  ;;  %768 = vst.msk [vmem:[%s1210_s29 + $0x78] sm:$0xf] %vm737_vm3, %v982_v5  ;;  %v964_v12 = vpack.c.bf16 %v589_v6, %v589_v6  ;;  %v980_v13 = vpack.c.bf16 %v605_v7, %v605_v7  ;;  %v502_v14 = vadd.f32 %v1199_v22, %v501_v10 }
  0xf9   : > { %v566_v15 = vadd.f32 %v1199_v22, %v565_v11  ;;  %v592_v16 = vmax.f32 %v510_v8, 0.0  ;;  %v608_v17 = vmax.f32 %v574_v9, 0.0 }
  0xfa   : > { %750 = vst.msk [vmem:[%s1210_s29 + $0x30] sm:$0xf] %vm737_vm3, %v964_v12  ;;  %766 = vst.msk [vmem:[%s1210_s29 + $0x70] sm:$0xf] %vm737_vm3, %v980_v13  ;;  %v590_v18 = vmax.f32 %v502_v14, 0.0 }
  0xfb   : > { %v606_v19 = vmax.f32 %v566_v15, 0.0  ;;  %v967_v20 = vpack.c.bf16 %v592_v16, %v592_v16  ;;  %v983_v21 = vpack.c.bf16 %v608_v17, %v608_v17 }
  0xfc   : > { %v965_v23 = vpack.c.bf16 %v590_v18, %v590_v18 }
  0xfd   : > { %v981_v24 = vpack.c.bf16 %v606_v19, %v606_v19  ;;  %753 = vst.msk [vmem:[%s1210_s29 + $0x3c] sm:$0xf] %vm737_vm3, %v967_v20  ;;  %769 = vst.msk [vmem:[%s1210_s29 + $0x7c] sm:$0xf] %vm737_vm3, %v983_v21 }
  0xfe   : > { %751 = vst.msk [vmem:[%s1210_s29 + $0x34] sm:$0xf] %vm737_vm3, %v965_v23 }
  0xff   : > { %767 = vst.msk [vmem:[%s1210_s29 + $0x74] sm:$0xf] %vm737_vm3, %v981_v24 }
 0x100 PF: > { %s13_s14 = sadd.s32 1, %s1107_s14   ;;  %s1317_s12 = smov %s1103_s13 }
 0x101   : > { %p10_p5 = scmp.ge.s32.totalorder %s13_s14, 4   ;;  %s1318_s13 = smov %s1320_s15 }
 0x103   :  { %12 = sbr.rel (!%p10_p5) target bundleno = 2 (0x2), region = 68 }

// kernel: faster_rcnn_forward.11
= control target key start
LH: loop header
LB: loop body
LE: loop exit
PB: predicated region body
PF: predicated region fallthrough
CT: control target
= control target key end

     0   :  { %s743_s12 = smov 0   ;;  %s745_s13 = smov 0   ;;  %s842_s0 = inlined_call_operand.vmem [shape: bf16[128,144], index: 0, kind: input, shape index: {}]   ;;  %s843_s1 = inlined_call_operand.vmem [shape: bf16[144,32], index: 1, kind: input, shape index: {}]   ;;  %s844_s2 = inlined_call_operand.vmem [shape: f32[1,32], index: 2, kind: input, shape index: {}]   ;;  %s845_s3 = inlined_call_operand.vmem [shape: bf16[128,32], index: 3, kind: output, shape index: {}]  }
   0x1   :  { %s747_s14 = smov 0  }
   0x2 LB: > { %s25_s15 = sadd.s32 1, %s716_s13  ;;  %p587_p0 = scmp.ge.s32.totalorder %s720_s14, 1  ;;  %s720_s14 = sphi %s747_s14, %s13_s14   ;;  %s716_s13 = sphi %s745_s13, %s847_s13   ;;  %s712_s12 = sphi %s743_s12, %s846_s12  }
   0x3   : > { %p27_p1 = scmp.ge.s32.totalorder %s25_s15, 2  ;;  %p170_p2 = scmp.lt.s32.totalorder %s720_s14, 3 }
   0x5   : > { %s849_s15 = smov (%p27_p1, %s25_s15), 0  ;;  %p171_p3 = pnand %p587_p0, %p170_p2 }
   0x6   : > { %s588_s18 = sshll.u32 (!%p171_p3), %s712_s12, 3 }
   0x7   : > { %174 = sbr.rel (%p171_p3) target bundleno = 261 (0x105), region = 32  ;;  %p206_p4 = scmp.lt.s32.totalorder (!%p171_p3), %s588_s18, 15 }
   0xc   : > { %v677_v0 = vld [vmem:[%s843_s1 + $0x38] sm:$0xff]   ;;  %v722_v1 = vmov 0   ;;  %v678_v2 = vld [vmem:[%s843_s1 + $0x30] sm:$0xff]   ;;  %s851_s18 = smov (!%p206_p4, %s588_s18), 15  ;;  %v679_v3 = vld [vmem:[%s843_s1 + $0x28] sm:$0xff]   ;;  %vm352_vm0 = vcmask 130048  }
   0xd   : > { %365 = vmatprep.subr.bf16.mxu0 %v722_v1  ;;  %634 = vmatprep.subr.bf16.mxu1 %v722_v1  ;;  %s625_s23 = sshll.u32 %s851_s18, 3  ;;  %v680_v4 = vld [vmem:[%s843_s1 + $0x20] sm:$0xff]   ;;  %v681_v7 = vld [vmem:[%s843_s1 + $0x18] sm:$0xff]   ;;  %v682_v8 = vld [vmem:[%s843_s1 + $0x10] sm:$0xff]   ;;  %s592_s17 = sshll.u32 %s851_s18, 2  ;;  %vm470_vm1 = vcmask 257024  }
   0xe   : > { %366 = vmatpush1.bf16.msra.mxu0 %v677_v0  ;;  %643 = vmatpush1.bf16.msra.mxu1 %v677_v0  ;;  %s776_s26 = scalar_lea.vmem %s842_s0, %s625_s23  ;;  %v683_v9 = vld [vmem:[%s843_s1 + $0x8] sm:$0xff]   ;;  %v684_v10 = vld [vmem:[%s843_s1] sm:$0xff]   ;;  %s815_s21 = scalar_lea.vmem %s845_s3, %s592_s17 }
   0xf   : > { %367 = vmatprep.subr.bf16.mxu0 %v722_v1  ;;  %635 = vmatprep.subr.bf16.mxu1 %v722_v1  ;;  %v688_v5 = vld [vmem:[%s776_s26 + $0x4] ss:$8 sps:$4 sm:$0xff]   ;;  %v686_v12 = vld [vmem:[%s776_s26] ss:$8 sps:$4 sm:$0xff]   ;;  %v692_v14 = vld [vmem:[%s776_s26 + $0x14] ss:$8 sps:$4 sm:$0xff]  }
  0x10   : > { %v691_v6 = vld [vmem:[%s776_s26 + $0x24] ss:$8 sps:$4 sm:$0xff]   ;;  %611 = vmatprep.mubr.msk.bf16.mxu0 %vm352_vm0, %v688_v5  ;;  %v689_v13 = vld [vmem:[%s776_s26 + $0x20] ss:$8 sps:$4 sm:$0xff]   ;;  %v694_v15 = vld [vmem:[%s776_s26 + $0x34] ss:$8 sps:$4 sm:$0xff]  }
  0x11   : > { %613 = vmatprep.mubr.msk.bf16.mxu1 %vm352_vm0, %v691_v6  ;;  %v685_v11 = vld [vmem:[%s843_s1 + $0x40] sm:$0xff]   ;;  %v696_v16 = vld [vmem:[%s776_s26 + $0x10] ss:$8 sps:$4 sm:$0xff]  }
  0x12   : > { %368 = vmatpush1.bf16.msra.mxu0 %v678_v2  ;;  %644 = vmatpush1.bf16.msra.mxu1 %v678_v2  ;;  %v697_v17 = vld [vmem:[%s776_s26 + $0x30] ss:$8 sps:$4 sm:$0xff]   ;;  %v593_v18 = vld [vmem:[%s844_s2] ss:$0 sm:$0xff] }
  0x13   : > { %369 = vmatprep.subr.bf16.mxu0 %v722_v1  ;;  %636 = vmatprep.subr.bf16.mxu1 %v722_v1 }
  0x16   : > { %370 = vmatpush1.bf16.msra.mxu0 %v679_v3  ;;  %645 = vmatpush1.bf16.msra.mxu1 %v679_v3 }
  0x17   : > { %371 = vmatprep.subr.bf16.mxu0 %v722_v1  ;;  %637 = vmatprep.subr.bf16.mxu1 %v722_v1 }
  0x1a   : > { %372 = vmatpush1.bf16.msra.mxu0 %v680_v4  ;;  %646 = vmatpush1.bf16.msra.mxu1 %v680_v4 }
  0x1b   : > { %373 = vmatprep.subr.bf16.mxu0 %v722_v1  ;;  %638 = vmatprep.subr.bf16.mxu1 %v722_v1 }
  0x1e   : > { %374 = vmatpush1.bf16.msra.mxu0 %v681_v7  ;;  %647 = vmatpush1.bf16.msra.mxu1 %v681_v7 }
  0x1f   : > { %375 = vmatprep.subr.bf16.mxu0 %v722_v1  ;;  %639 = vmatprep.subr.bf16.mxu1 %v722_v1 }
  0x22   : > { %376 = vmatpush1.bf16.msra.mxu0 %v682_v8  ;;  %648 = vmatpush1.bf16.msra.mxu1 %v682_v8 }
  0x23   : > { %377 = vmatprep.subr.bf16.mxu0 %v722_v1  ;;  %640 = vmatprep.subr.bf16.mxu1 %v722_v1 }
  0x26   : > { %378 = vmatpush1.bf16.msra.mxu0 %v683_v9  ;;  %649 = vmatpush1.bf16.msra.mxu1 %v683_v9 }
  0x27   : > { %379 = vmatprep.subr.bf16.mxu0 %v722_v1  ;;  %641 = vmatprep.subr.bf16.mxu1 %v722_v1 }
  0x2a   : > { %380 = vmatpush1.bf16.msra.mxu0 %v684_v10  ;;  %650 = vmatpush1.bf16.msra.mxu1 %v684_v10 }
  0x2b   : > { %395 = vmatprep.subr.bf16.mxu0 %v722_v1  ;;  %642 = vmatprep.subr.bf16.mxu1 %v722_v1 }
  0x2e   : > { %396 = vmatpush2.bf16.msra.mxu0 %v685_v11  ;;  %651 = vmatpush2.bf16.msra.mxu1 %v685_v11 }
  0x31   : > { %398 = vmatmul.mubr.bf16.vlgmr.msra.gmra.mxu0 %v686_v12  ;;  %414 = vmatmul.mubr.bf16.vlgmr.msra.gmra.mxu1 %v689_v13 }
  0x32   : > { %612 = vmatprep.mubr.msk.bf16.mxu0 %vm352_vm0, %v692_v14  ;;  %614 = vmatprep.mubr.msk.bf16.mxu1 %vm352_vm0, %v694_v15 }
  0x39   : > { %406 = vmatmul.mubr.bf16.gmra.mxu0 %v696_v16  ;;  %422 = vmatmul.mubr.bf16.gmra.mxu1 %v697_v17 }
  0xf1   : > { %v399_v19 = vpop.f32.mrf.mxu0  ;;  %v415_v20 = vpop.f32.mrf.mxu1 }
  0xf2   : > { %v400_v21 = vadd.f32 %v593_v18, %v399_v19  ;;  %v416_v22 = vadd.f32 %v593_v18, %v415_v20 }
  0xf3   : > { %v401_v23 = vpop.f32.mrf.mxu0  ;;  %v417_v24 = vpop.f32.mrf.mxu1 }
  0xf4   : > { %v430_v25 = vmax.f32 %v400_v21, 0.0  ;;  %v434_v26 = vmax.f32 %v416_v22, 0.0 }
  0xf5   : > { %v402_v27 = vpop.f32.mrf.mxu0  ;;  %v418_v28 = vpop.f32.mrf.mxu1 }
  0xf6   : > { %v626_v29 = vpack.c.bf16 %v430_v25, %v430_v25  ;;  %v630_v30 = vpack.c.bf16 %v434_v26, %v434_v26  ;;  %v403_v31 = vadd.f32 %v593_v18, %v402_v27  ;;  %v419_v32 = vadd.f32 %v593_v18, %v418_v28 }
  0xf7   : > { %v404_v33 = vpop.f32.mrf.mxu0  ;;  %v420_v34 = vpop.f32.mrf.mxu1 }
  0xf8   : > { %471 = vst.msk [vmem:[%s815_s21] sm:$0xf] %vm470_vm1, %v626_v29  ;;  %475 = vst.msk [vmem:[%s815_s21 + $0x10] sm:$0xf] %vm470_vm1, %v630_v30  ;;  %v431_v35 = vmax.f32 %v403_v31, 0.0  ;;  %v435_v36 = vmax.f32 %v419_v32, 0.0 }
  0xf9   : > { %v407_v37 = vpop.f32.mrf.mxu0  ;;  %v423_v38 = vpop.f32.mrf.mxu1 }
  0xfa   : > { %v627_v39 = vpack.c.bf16 %v431_v35, %v431_v35  ;;  %v631_v40 = vpack.c.bf16 %v435_v36, %v435_v36  ;;  %v408_v41 = vadd.f32 %v593_v18, %v407_v37  ;;  %v424_v42 = vadd.f32 %v593_v18, %v423_v38 }
  0xfb   : > { %v409_v43 = vpop.f32.mrf.mxu0  ;;  %v425_v44 = vpop.f32.mrf.mxu1 }
  0xfc   : > { %472 = vst.msk [vmem:[%s815_s21 + $0x4] sm:$0xf] %vm470_vm1, %v627_v39  ;;  %476 = vst.msk [vmem:[%s815_s21 + $0x14] sm:$0xf] %vm470_vm1, %v631_v40  ;;  %v432_v45 = vmax.f32 %v408_v41, 0.0  ;;  %v436_v46 = vmax.f32 %v424_v42, 0.0 }
  0xfd   : > { %v410_v47 = vpop.f32.mrf.mxu0  ;;  %v426_v48 = vpop.f32.mrf.mxu1 }
  0xfe   : > { %v628_v49 = vpack.c.bf16 %v432_v45, %v432_v45  ;;  %v632_v50 = vpack.c.bf16 %v436_v46, %v436_v46  ;;  %v411_v51 = vadd.f32 %v593_v18, %v410_v47  ;;  %v427_v52 = vadd.f32 %v593_v18, %v426_v48 }
  0xff   : > { %v412_v53 = vpop.f32.mrf.mxu0  ;;  %v428_v54 = vpop.f32.mrf.mxu1 }
 0x100   : > { %473 = vst.msk [vmem:[%s815_s21 + $0x8] sm:$0xf] %vm470_vm1, %v628_v49  ;;  %477 = vst.msk [vmem:[%s815_s21 + $0x18] sm:$0xf] %vm470_vm1, %v632_v50  ;;  %v433_v55 = vmax.f32 %v411_v51, 0.0  ;;  %v437_v56 = vmax.f32 %v427_v52, 0.0 }
 0x102   : > { %v629_v57 = vpack.c.bf16 %v433_v55, %v433_v55  ;;  %v633_v58 = vpack.c.bf16 %v437_v56, %v437_v56 }
 0x104   : > { %474 = vst.msk [vmem:[%s815_s21 + $0xc] sm:$0xf] %vm470_vm1, %v629_v57  ;;  %478 = vst.msk [vmem:[%s815_s21 + $0x1c] sm:$0xf] %vm470_vm1, %v633_v58 }
 0x105 PF: > { %s13_s14 = sadd.s32 1, %s720_s14   ;;  %s846_s12 = smov %s716_s13 }
 0x106   : > { %p10_p5 = scmp.ge.s32.totalorder %s13_s14, 4   ;;  %s847_s13 = smov %s849_s15 }
 0x108   :  { %12 = sbr.rel (!%p10_p5) target bundleno = 2 (0x2), region = 68 }

// kernel: faster_rcnn_forward.13
= control target key start
LH: loop header
LB: loop body
LE: loop exit
PB: predicated region body
PF: predicated region fallthrough
CT: control target
= control target key end

     0   :  { %s634_s12 = smov 0   ;;  %s636_s13 = smov 0   ;;  %s684_s0 = inlined_call_operand.vmem [shape: bf16[128,32], index: 0, kind: input, shape index: {}]   ;;  %s685_s1 = inlined_call_operand.vmem [shape: bf16[32,32], index: 1, kind: input, shape index: {}]   ;;  %s686_s2 = inlined_call_operand.vmem [shape: f32[1,32], index: 2, kind: input, shape index: {}]   ;;  %s687_s3 = inlined_call_operand.vmem [shape: bf16[128,32], index: 3, kind: output, shape index: {}]  }
   0x1   :  { %s638_s14 = smov 0  }
   0x2 LB: > { %s25_s15 = sadd.s32 1, %s608_s13  ;;  %p504_p0 = scmp.ge.s32.totalorder %s612_s14, 1  ;;  %s612_s14 = sphi %s638_s14, %s13_s14   ;;  %s608_s13 = sphi %s636_s13, %s689_s13   ;;  %s604_s12 = sphi %s634_s12, %s688_s12  }
   0x3   : > { %p27_p1 = scmp.ge.s32.totalorder %s25_s15, 2  ;;  %p169_p2 = scmp.lt.s32.totalorder %s612_s14, 3 }
   0x5   : > { %s691_s15 = smov (%p27_p1, %s25_s15), 0  ;;  %p170_p3 = pnand %p504_p0, %p169_p2 }
   0x6   : > { %s505_s18 = sshll.u32 (!%p170_p3), %s604_s12, 3 }
   0x7   : > { %173 = sbr.rel (%p170_p3) target bundleno = 225 (0xe1), region = 32  ;;  %p204_p4 = scmp.lt.s32.totalorder (!%p170_p3), %s505_s18, 15 }
   0xc   : > { %v584_v0 = vld [vmem:[%s685_s1 + $0x8] sm:$0xff]   ;;  %v585_v1 = vld [vmem:[%s685_s1] sm:$0xff]   ;;  %s693_s18 = smov (!%p204_p4, %s505_s18), 15  ;;  %vm277_vm0 = vcmask 261120   ;;  %vm387_vm1 = vcmask 257024  }
   0xd   : > { %544 = vmatprep.subr.bf16.mxu0 %v584_v0  ;;  %556 = vmatprep.subr.bf16.mxu1 %v584_v0  ;;  %s506_s21 = sshll.u32 %s693_s18, 2  ;;  %v509_v6 = vld [vmem:[%s686_s2] ss:$0 sm:$0xff] }
   0xe   : > { %545 = vmatpush3.bf16.msra.mxu0 %v584_v0  ;;  %558 = vmatpush3.bf16.msra.mxu1 %v584_v0  ;;  %s207_s24 = scalar_lea.vmem %s684_s0, %s506_s21  ;;  %s223_s29 = scalar_lea.vmem %s687_s3, %s506_s21 }
   0xf   : > { %546 = vmatprep.subr.bf16.mxu0 %v585_v1  ;;  %557 = vmatprep.subr.bf16.mxu1 %v585_v1  ;;  %v586_v2 = vld [vmem:[%s207_s24] sm:$0xff]   ;;  %v587_v3 = vld [vmem:[%s207_s24 + $0x10] sm:$0xff]   ;;  %v588_v4 = vld [vmem:[%s207_s24 + $0x8] sm:$0xff]  }
  0x10   : > { %548 = vmatprep.mubr.msk.bf16.mxu0 %vm277_vm0, %v586_v2  ;;  %552 = vmatprep.mubr.msk.bf16.mxu1 %vm277_vm0, %v587_v3  ;;  %v589_v5 = vld [vmem:[%s207_s24 + $0x18] sm:$0xff]  }
  0x12   : > { %547 = vmatpush3.bf16.msra.mxu0 %v585_v1  ;;  %559 = vmatpush3.bf16.msra.mxu1 %v585_v1 }
  0x15   : > { %549 = vmatmul.mubr.msk.bf16.vlgmr.msra.gmra.mxu0 %vm277_vm0, %v588_v4  ;;  %553 = vmatmul.mubr.msk.bf16.vlgmr.msra.gmra.mxu1 %vm277_vm0, %v589_v5 }
  0xd5   : > { %v550_v7 = vpop.f32.mrf.mxu0  ;;  %v554_v9 = vpop.f32.mrf.mxu1 }
  0xd6   : > { %v333_v8 = vadd.f32 %v550_v7, %v509_v6  ;;  %v349_v10 = vadd.f32 %v554_v9, %v509_v6 }
  0xd7   : > { %v324_v11 = vpop.f32.mrf.mxu0  ;;  %v340_v14 = vpop.f32.mrf.mxu1 }
  0xd8   : > { %v532_v12 = vpack.c.bf16 %v333_v8, %v333_v8  ;;  %v325_v13 = vadd.f32 %v509_v6, %v324_v11  ;;  %v536_v15 = vpack.c.bf16 %v349_v10, %v349_v10  ;;  %v341_v16 = vadd.f32 %v509_v6, %v340_v14 }
  0xd9   : > { %v551_v17 = vpop.f32.mrf.mxu0  ;;  %v555_v20 = vpop.f32.mrf.mxu1 }
  0xda   : > { %390 = vst.msk [vmem:[%s223_s29 + $0x8] sm:$0xf] %vm387_vm1, %v532_v12  ;;  %v530_v18 = vpack.c.bf16 %v325_v13, %v325_v13  ;;  %v336_v19 = vadd.f32 %v551_v17, %v509_v6  ;;  %394 = vst.msk [vmem:[%s223_s29 + $0x18] sm:$0xf] %vm387_vm1, %v536_v15  ;;  %v534_v21 = vpack.c.bf16 %v341_v16, %v341_v16 }
  0xdb   : > { %v352_v22 = vadd.f32 %v555_v20, %v509_v6  ;;  %v327_v23 = vpop.f32.mrf.mxu0  ;;  %v343_v26 = vpop.f32.mrf.mxu1 }
  0xdc   : > { %388 = vst.msk [vmem:[%s223_s29] sm:$0xf] %vm387_vm1, %v530_v18  ;;  %v533_v24 = vpack.c.bf16 %v336_v19, %v336_v19  ;;  %v328_v25 = vadd.f32 %v509_v6, %v327_v23  ;;  %392 = vst.msk [vmem:[%s223_s29 + $0x10] sm:$0xf] %vm387_vm1, %v534_v21  ;;  %v344_v28 = vadd.f32 %v509_v6, %v343_v26 }
  0xdd   : > { %v537_v27 = vpack.c.bf16 %v352_v22, %v352_v22 }
  0xde   : > { %391 = vst.msk [vmem:[%s223_s29 + $0xc] sm:$0xf] %vm387_vm1, %v533_v24  ;;  %v531_v29 = vpack.c.bf16 %v328_v25, %v328_v25  ;;  %v535_v30 = vpack.c.bf16 %v344_v28, %v344_v28 }
  0xdf   : > { %395 = vst.msk [vmem:[%s223_s29 + $0x1c] sm:$0xf] %vm387_vm1, %v537_v27 }
  0xe0   : > { %389 = vst.msk [vmem:[%s223_s29 + $0x4] sm:$0xf] %vm387_vm1, %v531_v29  ;;  %393 = vst.msk [vmem:[%s223_s29 + $0x14] sm:$0xf] %vm387_vm1, %v535_v30 }
  0xe1 PF: > { %s13_s14 = sadd.s32 1, %s612_s14   ;;  %s688_s12 = smov %s608_s13 }
  0xe2   : > { %p10_p5 = scmp.ge.s32.totalorder %s13_s14, 4   ;;  %s689_s13 = smov %s691_s15 }
  0xe4   :  { %12 = sbr.rel (!%p10_p5) target bundleno = 2 (0x2), region = 68 }

// kernel: faster_rcnn_forward.12
= control target key start
LH: loop header
LB: loop body
LE: loop exit
PB: predicated region body
PF: predicated region fallthrough
CT: control target
= control target key end

     0   :  { %vm204_vm0 = vcmask 261120   ;;  %vm329_vm1 = vcmask 519168   ;;  %s550_s1 = inlined_call_operand.vmem [shape: bf16[288,64], index: 1, kind: input, shape index: {}]   ;;  %s551_s0 = inlined_call_operand.vmem [shape: bf16[32,288], index: 0, kind: input, shape index: {}]   ;;  %s552_s2 = inlined_call_operand.vmem [shape: f32[1,64], index: 2, kind: input, shape index: {}]   ;;  %s553_s3 = inlined_call_operand.vmem [shape: bf16[32,64], index: 3, kind: output, shape index: {}]  }
   0x1   :  { %v413_v0 = vld [vmem:[%s550_s1 + $0x78] sm:$0xff]   ;;  %v415_v2 = vld [vmem:[%s550_s1 + $0x70] sm:$0xff]   ;;  %v417_v4 = vld [vmem:[%s550_s1 + $0x68] sm:$0xff]  }
   0x2   :  { %v414_v1 = vld [vmem:[%s550_s1 + $0x38] sm:$0xff]   ;;  %373 = vmatprep.subr.bf16.mxu0 %v413_v0  ;;  %v416_v3 = vld [vmem:[%s550_s1 + $0x30] sm:$0xff]   ;;  %v418_v5 = vld [vmem:[%s550_s1 + $0x28] sm:$0xff]  }
   0x3   :  { %374 = vmatpush3.bf16.msra.mxu0 %v414_v1  ;;  %v419_v6 = vld [vmem:[%s550_s1 + $0x60] sm:$0xff]   ;;  %v421_v8 = vld [vmem:[%s550_s1 + $0x58] sm:$0xff]   ;;  %v428_v10 = vld [vmem:[%s550_s1 + $0x88] sm:$0xff]  }
   0x4   :  { %375 = vmatprep.subr.bf16.mxu0 %v415_v2  ;;  %v420_v7 = vld [vmem:[%s550_s1 + $0x20] sm:$0xff]   ;;  %v422_v9 = vld [vmem:[%s550_s1 + $0x18] sm:$0xff]   ;;  %v423_v11 = vld [vmem:[%s550_s1 + $0x50] sm:$0xff]   ;;  %405 = vmatprep.subr.bf16.mxu1 %v428_v10 }
   0x5   :  { %v424_v12 = vld [vmem:[%s550_s1 + $0x10] sm:$0xff]   ;;  %v425_v13 = vld [vmem:[%s550_s1 + $0x48] sm:$0xff]   ;;  %406 = vmatpush3.bf16.msra.mxu1 %v428_v10  ;;  %v433_v15 = vld [vmem:[%s550_s1 + $0x80] sm:$0xff]  }
   0x6   :  { %v432_v14 = vld [vmem:[%s551_s0 + $0x4] ss:$12 sps:$4 sm:$0xff]   ;;  %v434_v16 = vld [vmem:[%s551_s0 + $0x8] ss:$12 sps:$4 sm:$0xff]   ;;  %407 = vmatprep.subr.bf16.mxu1 %v433_v15  ;;  %v435_v17 = vld [vmem:[%s551_s0 + $0x20] ss:$12 sps:$4 sm:$0xff]  }
   0x7   :  { %376 = vmatpush3.bf16.msra.mxu0 %v416_v3  ;;  %243 = vmatprep.mubr.bf16.mxu0 %v432_v14  ;;  %v426_v18 = vld [vmem:[%s550_s1 + $0x8] sm:$0xff]   ;;  %v427_v19 = vld [vmem:[%s550_s1 + $0x40] sm:$0xff]  }
   0x8   :  { %377 = vmatprep.subr.bf16.mxu0 %v417_v4  ;;  %409 = vmatprep.mubr.msk.bf16.mxu1 %vm204_vm0, %v434_v16  ;;  %v429_v20 = vld [vmem:[%s550_s1] sm:$0xff]   ;;  %v436_v22 = vld [vmem:[%s551_s0 + $0x1c] ss:$12 sps:$4 sm:$0xff]  }
   0x9   :  { %408 = vmatpush3.bf16.msra.mxu1 %v433_v15  ;;  %v430_v21 = vld [vmem:[%s551_s0] ss:$12 sps:$4 sm:$0xff]   ;;  %v438_v23 = vld [vmem:[%s551_s0 + $0x18] ss:$12 sps:$4 sm:$0xff]  }
   0xa   :  { %v338_v28 = vld [vmem:[%s552_s2] ss:$0 sm:$0xff] }
   0xb   :  { %378 = vmatpush3.bf16.msra.mxu0 %v418_v5 }
   0xc   :  { %379 = vmatprep.subr.bf16.mxu0 %v419_v6  ;;  %410 = vmatmul.mubr.msk.bf16.vlgmr.msra.gmra.mxu1 %vm204_vm0, %v435_v17 }
   0xf   :  { %380 = vmatpush3.bf16.msra.mxu0 %v420_v7 }
  0x10   :  { %381 = vmatprep.subr.bf16.mxu0 %v421_v8 }
  0x13   :  { %382 = vmatpush3.bf16.msra.mxu0 %v422_v9 }
  0x14   :  { %383 = vmatprep.subr.bf16.mxu0 %v423_v11 }
  0x17   :  { %384 = vmatpush3.bf16.msra.mxu0 %v424_v12 }
  0x18   :  { %385 = vmatprep.subr.bf16.mxu0 %v425_v13 }
  0x1b   :  { %386 = vmatpush3.bf16.msra.mxu0 %v426_v18 }
  0x1c   :  { %387 = vmatprep.subr.bf16.mxu0 %v427_v19 }
  0x1f   :  { %388 = vmatpush3.bf16.msra.mxu0 %v429_v20 }
  0x22   :  { %244 = vmatmul.mubr.bf16.vlgmr.msra.gmra.mxu0 %v430_v21 }
  0x23   :  { %251 = vmatprep.mubr.bf16.mxu0 %v436_v22 }
  0x2a   :  { %252 = vmatmul.mubr.bf16.gmra.mxu0 %v438_v23 }
  0xcc   :  { %v411_v24 = vpop.f32.mrf.mxu1 }
  0xce   :  { %v294_v26 = vpop.f32.mrf.mxu1 }
  0xd0   :  { %v412_v31 = vpop.f32.mrf.mxu1 }
  0xd2   :  { %v297_v37 = vpop.f32.mrf.mxu1 }
  0xe2   :  { %v389_v25 = vpop.f32.mrf.mxu0 }
  0xe4   :  { %v390_v27 = vpop.f32.mrf.mxu0 }
  0xe5   :  { %v391_v29 = vadd.f32 %v390_v27, %v389_v25 }
  0xe6   :  { %v392_v30 = vpop.f32.mrf.mxu0 }
  0xe7   :  { %v246_v32 = vadd.f32 %v391_v29, %v338_v28 }
  0xe8   :  { %v393_v33 = vpop.f32.mrf.mxu0 }
  0xe9   :  { %v394_v34 = vadd.f32 %v393_v33, %v392_v30  ;;  %v295_v35 = vadd.f32 %v294_v26, %v246_v32 }
  0xea   :  { %v395_v36 = vpop.f32.mrf.mxu0 }
  0xeb   :  { %v309_v38 = vmax.f32 %v295_v35, 0.0  ;;  %v249_v39 = vadd.f32 %v394_v34, %v338_v28 }
  0xec   :  { %v396_v40 = vpop.f32.mrf.mxu0 }
  0xed   :  { %v369_v41 = vpack.c.bf16 %v309_v38, %v309_v38  ;;  %v397_v42 = vadd.f32 %v396_v40, %v395_v36  ;;  %v298_v43 = vadd.f32 %v297_v37, %v249_v39 }
  0xee   :  { %v398_v44 = vpop.f32.mrf.mxu0 }
  0xef   :  { %330 = vst.msk [vmem:[%s553_s3] sm:$0xf] %vm329_vm1, %v369_v41  ;;  %v254_v45 = vadd.f32 %v397_v42, %v338_v28  ;;  %v310_v46 = vmax.f32 %v298_v43, 0.0 }
  0xf0   :  { %v399_v47 = vpop.f32.mrf.mxu0 }
  0xf1   :  { %v303_v48 = vadd.f32 %v411_v24, %v254_v45  ;;  %v370_v49 = vpack.c.bf16 %v310_v46, %v310_v46  ;;  %v400_v50 = vadd.f32 %v399_v47, %v398_v44 }
  0xf3   :  { %v311_v51 = vmax.f32 %v303_v48, 0.0  ;;  %331 = vst.msk [vmem:[%s553_s3 + $0x4] sm:$0xf] %vm329_vm1, %v370_v49  ;;  %v257_v52 = vadd.f32 %v400_v50, %v338_v28 }
  0xf5   :  { %v371_v53 = vpack.c.bf16 %v311_v51, %v311_v51  ;;  %v306_v54 = vadd.f32 %v412_v31, %v257_v52 }
  0xf7   :  { %332 = vst.msk [vmem:[%s553_s3 + $0x8] sm:$0xf] %vm329_vm1, %v371_v53  ;;  %v312_v55 = vmax.f32 %v306_v54, 0.0 }
  0xf9   :  { %v372_v56 = vpack.c.bf16 %v312_v55, %v312_v55 }
  0xfb   :  { %333 = vst.msk [vmem:[%s553_s3 + $0xc] sm:$0xf] %vm329_vm1, %v372_v56 }

// kernel: faster_rcnn_forward.14
= control target key start
LH: loop header
LB: loop body
LE: loop exit
PB: predicated region body
PF: predicated region fallthrough
CT: control target
= control target key end

     0   :  { %vm68_vm0 = vcmask 523264   ;;  %vm140_vm1 = vcmask 257024   ;;  %s243_s1 = inlined_call_operand.vmem [shape: bf16[64,32], index: 1, kind: input, shape index: {}]   ;;  %s244_s0 = inlined_call_operand.vmem [shape: bf16[32,64], index: 0, kind: input, shape index: {}]   ;;  %s245_s2 = inlined_call_operand.vmem [shape: f32[1,32], index: 2, kind: input, shape index: {}]   ;;  %s246_s3 = inlined_call_operand.vmem [shape: bf16[32,32], index: 3, kind: output, shape index: {}]  }
   0x1   :  { %v184_v0 = vld [vmem:[%s243_s1 + $0x18] sm:$0xff]   ;;  %v185_v1 = vld [vmem:[%s243_s1 + $0x10] sm:$0xff]   ;;  %v186_v2 = vld [vmem:[%s243_s1 + $0x8] sm:$0xff]  }
   0x2   :  { %172 = vmatprep.subr.bf16.mxu0 %v184_v0  ;;  %v188_v3 = vld [vmem:[%s244_s0] sm:$0xff]   ;;  %v189_v5 = vld [vmem:[%s244_s0 + $0x8] sm:$0xff]  }
   0x3   :  { %173 = vmatpush3.bf16.msra.mxu0 %v184_v0  ;;  %180 = vmatprep.mubr.msk.bf16.mxu0 %vm68_vm0, %v188_v3  ;;  %v187_v4 = vld [vmem:[%s243_s1] sm:$0xff]  }
   0x4   :  { %174 = vmatprep.subr.bf16.mxu0 %v185_v1  ;;  %v149_v6 = vld [vmem:[%s245_s2] ss:$0 sm:$0xff] }
   0x7   :  { %175 = vmatpush3.bf16.msra.mxu0 %v185_v1 }
   0x8   :  { %176 = vmatprep.subr.bf16.mxu0 %v186_v2 }
   0xb   :  { %177 = vmatpush3.bf16.msra.mxu0 %v186_v2 }
   0xc   :  { %178 = vmatprep.subr.bf16.mxu0 %v187_v4 }
   0xf   :  { %179 = vmatpush3.bf16.msra.mxu0 %v187_v4 }
  0x12   :  { %181 = vmatmul.mubr.msk.bf16.vlgmr.msra.gmra.mxu0 %vm68_vm0, %v189_v5 }
  0xd2   :  { %v182_v7 = vpop.f32.mrf.mxu0 }
  0xd3   :  { %v118_v8 = vadd.f32 %v182_v7, %v149_v6 }
  0xd4   :  { %v109_v9 = vpop.f32.mrf.mxu0 }
  0xd5   :  { %v164_v10 = vpack.c.bf16 %v118_v8, %v118_v8  ;;  %v110_v11 = vadd.f32 %v149_v6, %v109_v9 }
  0xd6   :  { %v183_v12 = vpop.f32.mrf.mxu0 }
  0xd7   :  { %143 = vst.msk [vmem:[%s246_s3 + $0x8] sm:$0xf] %vm140_vm1, %v164_v10  ;;  %v162_v13 = vpack.c.bf16 %v110_v11, %v110_v11  ;;  %v121_v14 = vadd.f32 %v183_v12, %v149_v6 }
  0xd8   :  { %v112_v15 = vpop.f32.mrf.mxu0 }
  0xd9   :  { %141 = vst.msk [vmem:[%s246_s3] sm:$0xf] %vm140_vm1, %v162_v13  ;;  %v165_v16 = vpack.c.bf16 %v121_v14, %v121_v14  ;;  %v113_v17 = vadd.f32 %v149_v6, %v112_v15 }
  0xdb   :  { %144 = vst.msk [vmem:[%s246_s3 + $0xc] sm:$0xf] %vm140_vm1, %v165_v16  ;;  %v163_v18 = vpack.c.bf16 %v113_v17, %v113_v17 }
  0xdd   :  { %142 = vst.msk [vmem:[%s246_s3 + $0x4] sm:$0xf] %vm140_vm1, %v163_v18 }

// kernel: faster_rcnn_forward.15
= control target key start
LH: loop header
LB: loop body
LE: loop exit
PB: predicated region body
PF: predicated region fallthrough
CT: control target
= control target key end

     0   :  { %s983_s12 = smov 0   ;;  %s985_s13 = smov 0   ;;  %s1113_s0 = inlined_call_operand.vmem [shape: bf16[128,288], index: 0, kind: input, shape index: {}]   ;;  %s1114_s1 = inlined_call_operand.vmem [shape: bf16[288,32], index: 1, kind: input, shape index: {}]   ;;  %s1115_s2 = inlined_call_operand.vmem [shape: f32[1,32], index: 2, kind: input, shape index: {}]   ;;  %s1116_s3 = inlined_call_operand.vmem [shape: bf16[128,32], index: 3, kind: output, shape index: {}]  }
   0x1   :  { %s987_s14 = smov 0  }
   0x2 LB: > { %s25_s15 = sadd.s32 1, %s957_s13  ;;  %p748_p0 = scmp.ge.s32.totalorder %s961_s14, 1  ;;  %s961_s14 = sphi %s987_s14, %s13_s14   ;;  %s957_s13 = sphi %s985_s13, %s1118_s13   ;;  %s953_s12 = sphi %s983_s12, %s1117_s12  }
   0x3   : > { %p27_p1 = scmp.ge.s32.totalorder %s25_s15, 2  ;;  %p170_p2 = scmp.lt.s32.totalorder %s961_s14, 3 }
   0x5   : > { %s1120_s15 = smov (%p27_p1, %s25_s15), 0  ;;  %p171_p3 = pnand %p748_p0, %p170_p2 }
   0x6   : > { %s749_s18 = sshll.u32 (!%p171_p3), %s953_s12, 3 }
   0x7   : > { %174 = sbr.rel (%p171_p3) target bundleno = 269 (0x10d), region = 32  ;;  %p206_p4 = scmp.lt.s32.totalorder (!%p171_p3), %s749_s18, 15 }
   0xc   : > { %v905_v0 = vld [vmem:[%s1114_s1 + $0x78] sm:$0xff]   ;;  %v907_v2 = vld [vmem:[%s1114_s1 + $0x70] sm:$0xff]   ;;  %v909_v4 = vld [vmem:[%s1114_s1 + $0x68] sm:$0xff]   ;;  %s1122_s18 = smov (!%p206_p4, %s749_s18), 15  ;;  %vm456_vm0 = vcmask 261120   ;;  %vm631_vm1 = vcmask 257024  }
   0xd   : > { %v906_v1 = vld [vmem:[%s1114_s1 + $0x38] sm:$0xff]   ;;  %806 = vmatprep.subr.bf16.mxu0 %v905_v0  ;;  %864 = vmatprep.subr.bf16.mxu1 %v905_v0  ;;  %v908_v3 = vld [vmem:[%s1114_s1 + $0x30] sm:$0xff]   ;;  %v910_v5 = vld [vmem:[%s1114_s1 + $0x28] sm:$0xff]   ;;  %s880_s4 = smul.u32 12, %s1122_s18  ;;  %s752_s9 = sshll.u32 %s1122_s18, 2 }
   0xe   : > { %807 = vmatpush3.bf16.msra.mxu0 %v906_v1  ;;  %872 = vmatpush3.bf16.msra.mxu1 %v906_v1  ;;  %v911_v6 = vld [vmem:[%s1114_s1 + $0x60] sm:$0xff]   ;;  %v913_v8 = vld [vmem:[%s1114_s1 + $0x58] sm:$0xff]   ;;  %v915_v10 = vld [vmem:[%s1114_s1 + $0x50] sm:$0xff]   ;;  %s1086_s12 = scalar_lea.vmem %s1116_s3, %s752_s9 }
   0xf   : > { %808 = vmatprep.subr.bf16.mxu0 %v907_v2  ;;  %865 = vmatprep.subr.bf16.mxu1 %v907_v2  ;;  %v912_v7 = vld [vmem:[%s1114_s1 + $0x20] sm:$0xff]   ;;  %s1034_s11 = scalar_lea.vmem %s1113_s0, %s880_s4  ;;  %v914_v9 = vld [vmem:[%s1114_s1 + $0x18] sm:$0xff]   ;;  %v916_v13 = vld [vmem:[%s1114_s1 + $0x10] sm:$0xff]  }
  0x10   : > { %v923_v11 = vld [vmem:[%s1034_s11 + $0x4] ss:$12 sps:$4 sm:$0xff]   ;;  %v926_v12 = vld [vmem:[%s1034_s11 + $0x4c] ss:$12 sps:$4 sm:$0xff]   ;;  %v924_v20 = vld [vmem:[%s1034_s11 + $0x48] ss:$12 sps:$4 sm:$0xff]  }
  0x11   : > { %v917_v14 = vld [vmem:[%s1114_s1 + $0x48] sm:$0xff]   ;;  %501 = vmatprep.mubr.bf16.mxu0 %v923_v11  ;;  %525 = vmatprep.mubr.bf16.mxu1 %v926_v12  ;;  %v919_v16 = vld [vmem:[%s1114_s1 + $0x40] sm:$0xff]   ;;  %v937_v28 = vld [vmem:[%s1034_s11 + $0x30] ss:$12 sps:$4 sm:$0xff]  }
  0x12   : > { %809 = vmatpush3.bf16.msra.mxu0 %v908_v3  ;;  %873 = vmatpush3.bf16.msra.mxu1 %v908_v3  ;;  %v918_v15 = vld [vmem:[%s1114_s1 + $0x8] sm:$0xff]   ;;  %v920_v17 = vld [vmem:[%s1114_s1] sm:$0xff]   ;;  %v938_v29 = vld [vmem:[%s1034_s11 + $0x50] ss:$12 sps:$4 sm:$0xff]  }
  0x13   : > { %810 = vmatprep.subr.bf16.mxu0 %v909_v4  ;;  %866 = vmatprep.subr.bf16.mxu1 %v909_v4  ;;  %v927_v18 = vld [vmem:[%s1114_s1 + $0x88] sm:$0xff]   ;;  %v928_v22 = vld [vmem:[%s1114_s1 + $0x80] sm:$0xff]  }
  0x14   : > { %v921_v19 = vld [vmem:[%s1034_s11] ss:$12 sps:$4 sm:$0xff]   ;;  %v929_v21 = vld [vmem:[%s1034_s11 + $0x1c] ss:$12 sps:$4 sm:$0xff]   ;;  %v932_v24 = vld [vmem:[%s1034_s11 + $0x18] ss:$12 sps:$4 sm:$0xff]  }
  0x15   : > { %v931_v23 = vld [vmem:[%s1034_s11 + $0x8] ss:$12 sps:$4 sm:$0xff]   ;;  %v933_v25 = vld [vmem:[%s1034_s11 + $0x20] ss:$12 sps:$4 sm:$0xff]   ;;  %v936_v27 = vld [vmem:[%s1034_s11 + $0x38] ss:$12 sps:$4 sm:$0xff]  }
  0x16   : > { %811 = vmatpush3.bf16.msra.mxu0 %v910_v5  ;;  %874 = vmatpush3.bf16.msra.mxu1 %v910_v5  ;;  %v934_v26 = vld [vmem:[%s1034_s11 + $0x34] ss:$12 sps:$4 sm:$0xff]  }
  0x17   : > { %812 = vmatprep.subr.bf16.mxu0 %v911_v6  ;;  %867 = vmatprep.subr.bf16.mxu1 %v911_v6  ;;  %v753_v39 = vld [vmem:[%s1115_s2] ss:$0 sm:$0xff] }
  0x1a   : > { %813 = vmatpush3.bf16.msra.mxu0 %v912_v7  ;;  %875 = vmatpush3.bf16.msra.mxu1 %v912_v7 }
  0x1b   : > { %814 = vmatprep.subr.bf16.mxu0 %v913_v8  ;;  %868 = vmatprep.subr.bf16.mxu1 %v913_v8 }
  0x1e   : > { %815 = vmatpush3.bf16.msra.mxu0 %v914_v9  ;;  %876 = vmatpush3.bf16.msra.mxu1 %v914_v9 }
  0x1f   : > { %816 = vmatprep.subr.bf16.mxu0 %v915_v10  ;;  %869 = vmatprep.subr.bf16.mxu1 %v915_v10 }
  0x22   : > { %817 = vmatpush3.bf16.msra.mxu0 %v916_v13  ;;  %877 = vmatpush3.bf16.msra.mxu1 %v916_v13 }
  0x23   : > { %818 = vmatprep.subr.bf16.mxu0 %v917_v14  ;;  %870 = vmatprep.subr.bf16.mxu1 %v917_v14 }
  0x26   : > { %819 = vmatpush3.bf16.msra.mxu0 %v918_v15  ;;  %878 = vmatpush3.bf16.msra.mxu1 %v918_v15 }
  0x27   : > { %820 = vmatprep.subr.bf16.mxu0 %v919_v16  ;;  %871 = vmatprep.subr.bf16.mxu1 %v919_v16 }
  0x2a   : > { %821 = vmatpush3.bf16.msra.mxu0 %v920_v17  ;;  %879 = vmatpush3.bf16.msra.mxu1 %v920_v17 }
  0x2b   : > { %852 = vmatprep.subr.bf16.mxu1 %v927_v18 }
  0x2d   : > { %502 = vmatmul.mubr.bf16.vlgmr.msra.gmra.mxu0 %v921_v19  ;;  %526 = vmatmul.mubr.bf16.vlgmr.msra.gmra.mxu1 %v924_v20 }
  0x2e   : > { %853 = vmatpush3.bf16.msra.mxu1 %v927_v18  ;;  %509 = vmatprep.mubr.bf16.mxu0 %v929_v21 }
  0x2f   : > { %854 = vmatprep.subr.bf16.mxu1 %v928_v22  ;;  %856 = vmatprep.mubr.msk.bf16.mxu1 %vm456_vm0, %v931_v23 }
  0x32   : > { %855 = vmatpush3.bf16.msra.mxu1 %v928_v22 }
  0x35   : > { %510 = vmatmul.mubr.bf16.gmra.mxu0 %v932_v24  ;;  %857 = vmatmul.mubr.msk.bf16.vlgmr.msra.gmra.mxu1 %vm456_vm0, %v933_v25 }
  0x36   : > { %517 = vmatprep.mubr.bf16.mxu0 %v934_v26  ;;  %860 = vmatprep.mubr.msk.bf16.mxu1 %vm456_vm0, %v936_v27 }
  0x3d   : > { %518 = vmatmul.mubr.bf16.gmra.mxu0 %v937_v28  ;;  %861 = vmatmul.mubr.msk.bf16.gmra.mxu1 %vm456_vm0, %v938_v29 }
  0xed   : > { %v822_v30 = vpop.f32.mrf.mxu0  ;;  %v840_v31 = vpop.f32.mrf.mxu1 }
  0xef   : > { %v823_v32 = vpop.f32.mrf.mxu0  ;;  %v841_v33 = vpop.f32.mrf.mxu1 }
  0xf0   : > { %v824_v36 = vadd.f32 %v823_v32, %v822_v30  ;;  %v842_v44 = vadd.f32 %v841_v33, %v840_v31 }
  0xf1   : > { %v825_v34 = vpop.f32.mrf.mxu0  ;;  %v843_v35 = vpop.f32.mrf.mxu1 }
  0xf2   : > { %v504_v43 = vadd.f32 %v824_v36, %v753_v39  ;;  %v528_v56 = vadd.f32 %v842_v44, %v753_v39 }
  0xf3   : > { %v826_v37 = vpop.f32.mrf.mxu0  ;;  %v844_v38 = vpop.f32.mrf.mxu1 }
  0xf4   : > { %v827_v42 = vadd.f32 %v826_v37, %v825_v34  ;;  %v845_v57 = vadd.f32 %v844_v38, %v843_v35 }
  0xf5   : > { %v828_v40 = vpop.f32.mrf.mxu0  ;;  %v858_v41 = vpop.f32.mrf.mxu1 }
  0xf6   : > { %v507_v53 = vadd.f32 %v827_v42, %v753_v39  ;;  %v531_v8 = vadd.f32 %v845_v57, %v753_v39 }
  0xf7   : > { %v829_v45 = vpop.f32.mrf.mxu0  ;;  %v568_v46 = vpop.f32.mrf.mxu1 }
  0xf8   : > { %v830_v47 = vadd.f32 %v829_v45, %v828_v40  ;;  %v569_v48 = vadd.f32 %v568_v46, %v504_v43 }
  0xf9   : > { %v831_v49 = vpop.f32.mrf.mxu0  ;;  %v859_v50 = vpop.f32.mrf.mxu1 }
  0xfa   : > { %v512_v51 = vadd.f32 %v830_v47, %v753_v39  ;;  %v798_v52 = vpack.c.bf16 %v569_v48, %v569_v48 }
  0xfb   : > { %v832_v54 = vpop.f32.mrf.mxu0  ;;  %v571_v55 = vpop.f32.mrf.mxu1 }
  0xfc   : > { %v577_v58 = vadd.f32 %v858_v41, %v512_v51  ;;  %632 = vst.msk [vmem:[%s1086_s12] sm:$0xf] %vm631_vm1, %v798_v52  ;;  %v833_v59 = vadd.f32 %v832_v54, %v831_v49  ;;  %v572_v60 = vadd.f32 %v571_v55, %v507_v53 }
  0xfd   : > { %v834_v61 = vpop.f32.mrf.mxu0  ;;  %v862_v62 = vpop.f32.mrf.mxu1 }
  0xfe   : > { %v800_v63 = vpack.c.bf16 %v577_v58, %v577_v58  ;;  %v515_v0 = vadd.f32 %v833_v59, %v753_v39  ;;  %v799_v1 = vpack.c.bf16 %v572_v60, %v572_v60  ;;  %v593_v2 = vadd.f32 %v862_v62, %v528_v56 }
  0xff   : > { %v835_v3 = vpop.f32.mrf.mxu0  ;;  %v584_v4 = vpop.f32.mrf.mxu1 }
 0x100   : > { %634 = vst.msk [vmem:[%s1086_s12 + $0x8] sm:$0xf] %vm631_vm1, %v800_v63  ;;  %v580_v5 = vadd.f32 %v859_v50, %v515_v0  ;;  %633 = vst.msk [vmem:[%s1086_s12 + $0x4] sm:$0xf] %vm631_vm1, %v799_v1  ;;  %v804_v6 = vpack.c.bf16 %v593_v2, %v593_v2  ;;  %v836_v7 = vadd.f32 %v835_v3, %v834_v61 }
 0x101   : > { %v837_v9 = vpop.f32.mrf.mxu0  ;;  %v863_v10 = vpop.f32.mrf.mxu1 }
 0x102   : > { %v801_v11 = vpack.c.bf16 %v580_v5, %v580_v5  ;;  %638 = vst.msk [vmem:[%s1086_s12 + $0x18] sm:$0xf] %vm631_vm1, %v804_v6  ;;  %v520_v12 = vadd.f32 %v836_v7, %v753_v39  ;;  %v596_v13 = vadd.f32 %v863_v10, %v531_v8 }
 0x103   : > { %v838_v14 = vpop.f32.mrf.mxu0  ;;  %v587_v20 = vpop.f32.mrf.mxu1 }
 0x104   : > { %635 = vst.msk [vmem:[%s1086_s12 + $0xc] sm:$0xf] %vm631_vm1, %v801_v11  ;;  %v585_v15 = vadd.f32 %v584_v4, %v520_v12  ;;  %v805_v16 = vpack.c.bf16 %v596_v13, %v596_v13  ;;  %v839_v17 = vadd.f32 %v838_v14, %v837_v9 }
 0x106   : > { %v802_v18 = vpack.c.bf16 %v585_v15, %v585_v15  ;;  %639 = vst.msk [vmem:[%s1086_s12 + $0x1c] sm:$0xf] %vm631_vm1, %v805_v16  ;;  %v523_v19 = vadd.f32 %v839_v17, %v753_v39 }
 0x108   : > { %636 = vst.msk [vmem:[%s1086_s12 + $0x10] sm:$0xf] %vm631_vm1, %v802_v18  ;;  %v588_v21 = vadd.f32 %v587_v20, %v523_v19 }
 0x10a   : > { %v803_v22 = vpack.c.bf16 %v588_v21, %v588_v21 }
 0x10c   : > { %637 = vst.msk [vmem:[%s1086_s12 + $0x14] sm:$0xf] %vm631_vm1, %v803_v22 }
 0x10d PF: > { %s13_s14 = sadd.s32 1, %s961_s14   ;;  %s1117_s12 = smov %s957_s13 }
 0x10e   : > { %p10_p5 = scmp.ge.s32.totalorder %s13_s14, 4   ;;  %s1118_s13 = smov %s1120_s15 }
 0x110   :  { %12 = sbr.rel (!%p10_p5) target bundleno = 2 (0x2), region = 68 }

// kernel: faster_rcnn_forward.18
= control target key start
LH: loop header
LB: loop body
LE: loop exit
PB: predicated region body
PF: predicated region fallthrough
CT: control target
= control target key end

     0   :  { %s853_s9 = smov 0   ;;  %s990_s0 = inlined_call_operand.vmem [shape: bf16[196,64], index: 0, kind: input, shape index: {}]   ;;  %s991_s1 = inlined_call_operand.vmem [shape: bf16[2,64,32], index: 1, kind: input, shape index: {}]   ;;  %s992_s2 = inlined_call_operand.vmem [shape: bf16[2,196,32], index: 2, kind: output, shape index: {}]  }
   0x1 LB: > { %s624_s10 = sadd.s32 4294967295, %s834_s9   ;;  %p628_p0 = scmp.ge.s32.totalorder %s834_s9, 1  ;;  %s834_s9 = sphi %s853_s9, %s12_s9  }
   0x2   : > { %p112_p1 = scmp.lt.s32.totalorder %s834_s9, 3 }
   0x4   : > { %p113_p2 = pnand %p628_p0, %p112_p1 }
   0x5   : > { %p134_p3 = scmp.lt.s32.totalorder (!%p113_p2), %s624_s10, 1 }
   0x6   : > { %116 = sbr.rel (%p113_p2) target bundleno = 278 (0x116), region = 28 }
   0xb   : > { %v836_v0 = vmov 0.0   ;;  %s994_s10 = smov (!%p134_p3, %s624_s10), 1  ;;  %vm837_vm0 = vmmov 0   ;;  %v815_v5 = vld [vmem:[%s990_s0] sm:$0xff]   ;;  %v816_v6 = vld [vmem:[%s990_s0 + $0x38] sm:$0xff]   ;;  %vm265_vm1 = vcmask 523264  }
   0xc   : > { %732 = vmatprep.subr.bf16.mxu0 %v836_v0  ;;  %792 = vmatprep.subr.bf16.mxu1 %v836_v0  ;;  %s689_s11 = sshll.u32 %s994_s10, 5  ;;  %v817_v7 = vld [vmem:[%s990_s0 + $0x8] sm:$0xff]   ;;  %v818_v8 = vld [vmem:[%s990_s0 + $0x40] sm:$0xff]   ;;  %v819_v9 = vld [vmem:[%s990_s0 + $0x10] sm:$0xff]   ;;  %s800_s15 = smul.u32 100, %s994_s10  ;;  %vm542_vm2 = vcmask 257024  }
   0xd   : > { %740 = vmatprep.mubr.msk.bf16.mxu0 %vm837_vm0, %v836_v0  ;;  %768 = vmatprep.mubr.msk.bf16.mxu1 %vm837_vm0, %v836_v0  ;;  %s138_s14 = scalar_lea.vmem %s991_s1, %s689_s11  ;;  %v820_v10 = vld [vmem:[%s990_s0 + $0x48] sm:$0xff]   ;;  %v821_v11 = vld [vmem:[%s990_s0 + $0x18] sm:$0xff]   ;;  %v822_v12 = vld [vmem:[%s990_s0 + $0x50] sm:$0xff]   ;;  %vm567_vm3 = vcmask 254976  }
   0xe   : > { %v811_v1 = vld [vmem:[%s138_s14 + $0x18] sm:$0xff]   ;;  %v812_v2 = vld [vmem:[%s138_s14 + $0x10] sm:$0xff]   ;;  %v813_v3 = vld [vmem:[%s138_s14 + $0x8] sm:$0xff]   ;;  %s936_s18 = scalar_lea.vmem %s992_s2, %s800_s15 }
   0xf   : > { %733 = vmatpush3.bf16.msra.mxu0 %v811_v1  ;;  %796 = vmatpush3.bf16.msra.mxu1 %v811_v1  ;;  %v814_v4 = vld [vmem:[%s138_s14] sm:$0xff]   ;;  %v824_v14 = vld [vmem:[%s990_s0 + $0x58] sm:$0xff]   ;;  %v825_v15 = vld [vmem:[%s990_s0 + $0x28] sm:$0xff]  }
  0x10   : > { %734 = vmatprep.subr.bf16.mxu0 %v836_v0  ;;  %793 = vmatprep.subr.bf16.mxu1 %v836_v0  ;;  %v823_v13 = vld [vmem:[%s990_s0 + $0x20] sm:$0xff]   ;;  %v827_v17 = vld [vmem:[%s990_s0 + $0x30] sm:$0xff]  }
  0x11   : > { %v826_v16 = vld [vmem:[%s990_s0 + $0x60] ss:$0 sps:$4 sm:$0x33]  }
  0x13   : > { %735 = vmatpush3.bf16.msra.mxu0 %v812_v2  ;;  %797 = vmatpush3.bf16.msra.mxu1 %v812_v2 }
  0x14   : > { %736 = vmatprep.subr.bf16.mxu0 %v836_v0  ;;  %794 = vmatprep.subr.bf16.mxu1 %v836_v0 }
  0x17   : > { %737 = vmatpush3.bf16.msra.mxu0 %v813_v3  ;;  %798 = vmatpush3.bf16.msra.mxu1 %v813_v3 }
  0x18   : > { %738 = vmatprep.subr.bf16.mxu0 %v836_v0  ;;  %795 = vmatprep.subr.bf16.mxu1 %v836_v0 }
  0x1b   : > { %739 = vmatpush3.bf16.msra.mxu0 %v814_v4  ;;  %799 = vmatpush3.bf16.msra.mxu1 %v814_v4 }
  0x1e   : > { %741 = vmatmul.mubr.msk.bf16.vlgmr.msra.gmra.mxu0 %vm265_vm1, %v815_v5  ;;  %769 = vmatmul.mubr.msk.bf16.vlgmr.msra.gmra.mxu1 %vm265_vm1, %v816_v6 }
  0x1f   : > { %744 = vmatprep.mubr.msk.bf16.mxu0 %vm837_vm0, %v836_v0  ;;  %772 = vmatprep.mubr.msk.bf16.mxu1 %vm837_vm0, %v836_v0 }
  0x26   : > { %745 = vmatmul.mubr.msk.bf16.gmra.mxu0 %vm265_vm1, %v817_v7  ;;  %773 = vmatmul.mubr.msk.bf16.gmra.mxu1 %vm265_vm1, %v818_v8 }
  0x27   : > { %748 = vmatprep.mubr.msk.bf16.mxu0 %vm837_vm0, %v836_v0  ;;  %776 = vmatprep.mubr.msk.bf16.mxu1 %vm837_vm0, %v836_v0 }
  0x2e   : > { %749 = vmatmul.mubr.msk.bf16.gmra.mxu0 %vm265_vm1, %v819_v9  ;;  %777 = vmatmul.mubr.msk.bf16.gmra.mxu1 %vm265_vm1, %v820_v10 }
  0x2f   : > { %752 = vmatprep.mubr.msk.bf16.mxu0 %vm837_vm0, %v836_v0  ;;  %780 = vmatprep.mubr.msk.bf16.mxu1 %vm837_vm0, %v836_v0 }
  0x36   : > { %753 = vmatmul.mubr.msk.bf16.gmra.mxu0 %vm265_vm1, %v821_v11  ;;  %781 = vmatmul.mubr.msk.bf16.gmra.mxu1 %vm265_vm1, %v822_v12 }
  0x37   : > { %756 = vmatprep.mubr.msk.bf16.mxu0 %vm837_vm0, %v836_v0  ;;  %784 = vmatprep.mubr.msk.bf16.mxu1 %vm837_vm0, %v836_v0 }
  0x3e   : > { %757 = vmatmul.mubr.msk.bf16.gmra.mxu0 %vm265_vm1, %v823_v13  ;;  %785 = vmatmul.mubr.msk.bf16.gmra.mxu1 %vm265_vm1, %v824_v14 }
  0x3f   : > { %760 = vmatprep.mubr.msk.bf16.mxu0 %vm837_vm0, %v836_v0  ;;  %788 = vmatprep.mubr.msk.bf16.mxu1 %vm837_vm0, %v836_v0 }
  0x46   : > { %761 = vmatmul.mubr.msk.bf16.gmra.mxu0 %vm265_vm1, %v825_v15  ;;  %789 = vmatmul.mubr.msk.bf16.gmra.mxu1 %vm265_vm1, %v826_v16 }
  0x47   : > { %764 = vmatprep.mubr.msk.bf16.mxu0 %vm837_vm0, %v836_v0 }
  0x4e   : > { %765 = vmatmul.mubr.msk.bf16.gmra.mxu0 %vm265_vm1, %v827_v17 }
  0xde   : > { %v339_v18 = vpop.f32.mrf.mxu0  ;;  %v395_v19 = vpop.f32.mrf.mxu1 }
  0xdf   : > { %v690_v20 = vpack.c.bf16 %v339_v18, %v339_v18  ;;  %v704_v21 = vpack.c.bf16 %v395_v19, %v395_v19 }
  0xe0   : > { %v742_v22 = vpop.f32.mrf.mxu0  ;;  %v770_v23 = vpop.f32.mrf.mxu1 }
  0xe1   : > { %543 = vst.msk [vmem:[%s936_s18] sm:$0xf] %vm542_vm2, %v690_v20  ;;  %557 = vst.msk [vmem:[%s936_s18 + $0x38] sm:$0xf] %vm542_vm2, %v704_v21 }
  0xe2   : > { %v342_v24 = vpop.f32.mrf.mxu0  ;;  %v398_v25 = vpop.f32.mrf.mxu1 }
  0xe3   : > { %v691_v26 = vpack.c.bf16 %v342_v24, %v342_v24  ;;  %v705_v27 = vpack.c.bf16 %v398_v25, %v398_v25 }
  0xe4   : > { %v743_v28 = vpop.f32.mrf.mxu0  ;;  %v771_v29 = vpop.f32.mrf.mxu1 }
  0xe5   : > { %544 = vst.msk [vmem:[%s936_s18 + $0x4] sm:$0xf] %vm542_vm2, %v691_v26  ;;  %558 = vst.msk [vmem:[%s936_s18 + $0x3c] sm:$0xf] %vm542_vm2, %v705_v27 }
  0xe6   : > { %v347_v30 = vpop.f32.mrf.mxu0  ;;  %v403_v31 = vpop.f32.mrf.mxu1 }
  0xe7   : > { %v692_v32 = vpack.c.bf16 %v347_v30, %v347_v30  ;;  %v706_v33 = vpack.c.bf16 %v403_v31, %v403_v31 }
  0xe8   : > { %v746_v34 = vpop.f32.mrf.mxu0  ;;  %v774_v35 = vpop.f32.mrf.mxu1 }
  0xe9   : > { %545 = vst.msk [vmem:[%s936_s18 + $0x8] sm:$0xf] %vm542_vm2, %v692_v32  ;;  %559 = vst.msk [vmem:[%s936_s18 + $0x40] sm:$0xf] %vm542_vm2, %v706_v33 }
  0xea   : > { %v350_v36 = vpop.f32.mrf.mxu0  ;;  %v406_v37 = vpop.f32.mrf.mxu1 }
  0xeb   : > { %v693_v38 = vpack.c.bf16 %v350_v36, %v350_v36  ;;  %v707_v39 = vpack.c.bf16 %v406_v37, %v406_v37 }
  0xec   : > { %v747_v40 = vpop.f32.mrf.mxu0  ;;  %v775_v41 = vpop.f32.mrf.mxu1 }
  0xed   : > { %546 = vst.msk [vmem:[%s936_s18 + $0xc] sm:$0xf] %vm542_vm2, %v693_v38  ;;  %560 = vst.msk [vmem:[%s936_s18 + $0x44] sm:$0xf] %vm542_vm2, %v707_v39 }
  0xee   : > { %v355_v42 = vpop.f32.mrf.mxu0  ;;  %v411_v43 = vpop.f32.mrf.mxu1 }
  0xef   : > { %v694_v44 = vpack.c.bf16 %v355_v42, %v355_v42  ;;  %v708_v45 = vpack.c.bf16 %v411_v43, %v411_v43 }
  0xf0   : > { %v750_v46 = vpop.f32.mrf.mxu0  ;;  %v778_v47 = vpop.f32.mrf.mxu1 }
  0xf1   : > { %547 = vst.msk [vmem:[%s936_s18 + $0x10] sm:$0xf] %vm542_vm2, %v694_v44  ;;  %561 = vst.msk [vmem:[%s936_s18 + $0x48] sm:$0xf] %vm542_vm2, %v708_v45 }
  0xf2   : > { %v358_v48 = vpop.f32.mrf.mxu0  ;;  %v414_v49 = vpop.f32.mrf.mxu1 }
  0xf3   : > { %v695_v50 = vpack.c.bf16 %v358_v48, %v358_v48  ;;  %v709_v51 = vpack.c.bf16 %v414_v49, %v414_v49 }
  0xf4   : > { %v751_v52 = vpop.f32.mrf.mxu0  ;;  %v779_v53 = vpop.f32.mrf.mxu1 }
  0xf5   : > { %548 = vst.msk [vmem:[%s936_s18 + $0x14] sm:$0xf] %vm542_vm2, %v695_v50  ;;  %562 = vst.msk [vmem:[%s936_s18 + $0x4c] sm:$0xf] %vm542_vm2, %v709_v51 }
  0xf6   : > { %v363_v54 = vpop.f32.mrf.mxu0  ;;  %v419_v55 = vpop.f32.mrf.mxu1 }
  0xf7   : > { %v696_v56 = vpack.c.bf16 %v363_v54, %v363_v54  ;;  %v710_v57 = vpack.c.bf16 %v419_v55, %v419_v55 }
  0xf8   : > { %v754_v58 = vpop.f32.mrf.mxu0  ;;  %v782_v59 = vpop.f32.mrf.mxu1 }
  0xf9   : > { %549 = vst.msk [vmem:[%s936_s18 + $0x18] sm:$0xf] %vm542_vm2, %v696_v56  ;;  %563 = vst.msk [vmem:[%s936_s18 + $0x50] sm:$0xf] %vm542_vm2, %v710_v57 }
  0xfa   : > { %v366_v60 = vpop.f32.mrf.mxu0  ;;  %v422_v61 = vpop.f32.mrf.mxu1 }
  0xfb   : > { %v697_v62 = vpack.c.bf16 %v366_v60, %v366_v60  ;;  %v711_v63 = vpack.c.bf16 %v422_v61, %v422_v61 }
  0xfc   : > { %v755_v0 = vpop.f32.mrf.mxu0  ;;  %v783_v1 = vpop.f32.mrf.mxu1 }
  0xfd   : > { %550 = vst.msk [vmem:[%s936_s18 + $0x1c] sm:$0xf] %vm542_vm2, %v697_v62  ;;  %564 = vst.msk [vmem:[%s936_s18 + $0x54] sm:$0xf] %vm542_vm2, %v711_v63 }
  0xfe   : > { %v371_v2 = vpop.f32.mrf.mxu0  ;;  %v427_v3 = vpop.f32.mrf.mxu1 }
  0xff   : > { %v698_v4 = vpack.c.bf16 %v371_v2, %v371_v2  ;;  %v712_v5 = vpack.c.bf16 %v427_v3, %v427_v3 }
 0x100   : > { %v758_v6 = vpop.f32.mrf.mxu0  ;;  %v786_v7 = vpop.f32.mrf.mxu1 }
 0x101   : > { %551 = vst.msk [vmem:[%s936_s18 + $0x20] sm:$0xf] %vm542_vm2, %v698_v4  ;;  %565 = vst.msk [vmem:[%s936_s18 + $0x58] sm:$0xf] %vm542_vm2, %v712_v5 }
 0x102   : > { %v374_v8 = vpop.f32.mrf.mxu0  ;;  %v430_v9 = vpop.f32.mrf.mxu1 }
 0x103   : > { %v699_v10 = vpack.c.bf16 %v374_v8, %v374_v8  ;;  %v713_v11 = vpack.c.bf16 %v430_v9, %v430_v9 }
 0x104   : > { %v759_v12 = vpop.f32.mrf.mxu0  ;;  %v787_v13 = vpop.f32.mrf.mxu1 }
 0x105   : > { %552 = vst.msk [vmem:[%s936_s18 + $0x24] sm:$0xf] %vm542_vm2, %v699_v10  ;;  %566 = vst.msk [vmem:[%s936_s18 + $0x5c] sm:$0xf] %vm542_vm2, %v713_v11 }
 0x106   : > { %v379_v14 = vpop.f32.mrf.mxu0  ;;  %v435_v15 = vpop.f32.mrf.mxu1 }
 0x107   : > { %v700_v16 = vpack.c.bf16 %v379_v14, %v379_v14  ;;  %v714_v17 = vpack.c.bf16 %v435_v15, %v435_v15 }
 0x108   : > { %v762_v18 = vpop.f32.mrf.mxu0  ;;  %v790_v19 = vpop.f32.mrf.mxu1 }
 0x109   : > { %553 = vst.msk [vmem:[%s936_s18 + $0x28] sm:$0xf] %vm542_vm2, %v700_v16 }
 0x10a   : > { %568 = vst.msk [vmem:[%s936_s18 + $0x60] sm:$0x3] %vm567_vm3, %v714_v17  ;;  %v382_v20 = vpop.f32.mrf.mxu0  ;;  %v438_v21 = vpop.f32.mrf.mxu1 }
 0x10b   : > { %v701_v22 = vpack.c.bf16 %v382_v20, %v382_v20 }
 0x10c   : > { %v763_v23 = vpop.f32.mrf.mxu0  ;;  %v791_v24 = vpop.f32.mrf.mxu1 }
 0x10d   : > { %554 = vst.msk [vmem:[%s936_s18 + $0x2c] sm:$0xf] %vm542_vm2, %v701_v22 }
 0x10e   : > { %v387_v25 = vpop.f32.mrf.mxu0 }
 0x10f   : > { %v702_v26 = vpack.c.bf16 %v387_v25, %v387_v25 }
 0x110   : > { %v766_v27 = vpop.f32.mrf.mxu0 }
 0x111   : > { %555 = vst.msk [vmem:[%s936_s18 + $0x30] sm:$0xf] %vm542_vm2, %v702_v26 }
 0x112   : > { %v390_v28 = vpop.f32.mrf.mxu0 }
 0x113   : > { %v703_v29 = vpack.c.bf16 %v390_v28, %v390_v28 }
 0x114   : > { %v767_v30 = vpop.f32.mrf.mxu0 }
 0x115   : > { %556 = vst.msk [vmem:[%s936_s18 + $0x34] sm:$0xf] %vm542_vm2, %v703_v29 }
 0x116 PF: > { %s12_s9 = sadd.s32 1, %s834_s9  }
 0x117   : > { %p9_p4 = scmp.ge.s32.totalorder %s12_s9, 4  }
 0x119   :  { %11 = sbr.rel (!%p9_p4) target bundleno = 1 (0x1), region = 58 }

// kernel: tile.7
= control target key start
LH: loop header
LB: loop body
LE: loop exit
PB: predicated region body
PF: predicated region fallthrough
CT: control target
= control target key end

     0   :  { %vm22_vm0 = vcmask 31744   ;;  %vm28_vm1 = vcmask 64544   ;;  %s70_s0 = inlined_call_operand.vmem [shape: f32[2,4,4], index: 0, kind: input, shape index: {}]   ;;  %s71_s1 = inlined_call_operand.vmem [shape: f32[8,4], index: 1, kind: output, shape index: {}]  }
   0x1   :  { %v40_v0 = vld [vmem:[%s70_s0 + $0x6] sm:$0x3]  ;;  %v41_v1 = vld [vmem:[%s70_s0 + $0x4] sm:$0x3]  ;;  %v42_v2 = vld [vmem:[%s70_s0 + $0x2] sm:$0x3] }
   0x2   :  { %9 = vst [vmem:[#allocation1 + $0x18] sm:$0x3] %v40_v0  ;;  %14 = vst [vmem:[#allocation1 + $0x10] sm:$0x3] %v41_v1  ;;  %v19_v3 = vld [vmem:[%s70_s0] sm:$0x3] }
   0x3   :  { %18 = vst [vmem:[#allocation1 + $0x8] sm:$0x3] %v42_v2  ;;  %20 = vst [vmem:[#allocation1] sm:$0x3] %v19_v3  ;;  %s44_s0 = smov 4  }
   0xa   :  { %v25_v4 = vld [vmem:[#allocation1 + $0x1] ss:$8 sm:$0xf]   ;;  %v21_v5 = vld [vmem:[#allocation1] ss:$8 sm:$0xf]  }
   0xb   :  { %26 = vrot.lane.b32.xlu0 %v25_v4, %s44_s0  ;;  %23 = vst.msk [vmem:[#allocation0] sm:$0xf] %vm22_vm0, %v21_v5  }
  0x7d   :  { %v27_v6 = vpop.permute.xlu0 %26  }
  0x7e   :  { %29 = vst.msk [vmem:[#allocation0] sm:$0xf] %vm28_vm1, %v27_v6  }
  0x85   :  { %v34_v7 = vld [vmem:[#allocation0] sm:$0xf] }
  0x86   :  { %37 = vst [vmem:[%s71_s1] sm:$0xf] %v34_v7 }

// kernel: faster_rcnn_forward.19
= control target key start
LH: loop header
LB: loop body
LE: loop exit
PB: predicated region body
PF: predicated region fallthrough
CT: control target
= control target key end

     0   :  { %vm1752_vm0 = vmmov 0   ;;  %vm870_vm1 = vcmask 261120   ;;  %vm1195_vm2 = vcmask 523264   ;;  %s2159_s1 = inlined_call_operand.vmem [shape: bf16[1568,64], index: 1, kind: input, shape index: {}]   ;;  %s2160_s0 = inlined_call_operand.vmem [shape: bf16[8,1568], index: 0, kind: input, shape index: {}]   ;;  %s2161_s3 = inlined_call_operand.vmem [shape: bf16[64,64], index: 3, kind: input, shape index: {}]   ;;  %s2162_s5 = inlined_call_operand.vmem [shape: bf16[64,128], index: 5, kind: input, shape index: {}]   ;;  %s2163_s2 = inlined_call_operand.vmem [shape: f32[1,64], index: 2, kind: input, shape index: {}]   ;;  %s2164_s4 = inlined_call_operand.vmem [shape: f32[1,64], index: 4, kind: input, shape index: {}]   ;;  %s2165_s6 = inlined_call_operand.vmem [shape: f32[1,128], index: 6, kind: input, shape index: {}]   ;;  %s2166_s7 = inlined_call_operand.vmem [shape: f32[8,128], index: 7, kind: output, shape index: {}]  }
   0x1   :  { %v1632_v0 = vld [vmem:[%s2159_s1 + $0x78] sm:$0xff]   ;;  %v1636_v4 = vld [vmem:[%s2159_s1 + $0x70] sm:$0xff]   ;;  %v1640_v8 = vld [vmem:[%s2159_s1 + $0x68] sm:$0xff]  }
   0x2   :  { %v1633_v1 = vld [vmem:[%s2159_s1 + $0xf8] sm:$0xff]   ;;  %1453 = vmatprep.subr.bf16.mxu0 %v1632_v0  ;;  %v1637_v5 = vld [vmem:[%s2159_s1 + $0xf0] sm:$0xff]   ;;  %v1641_v9 = vld [vmem:[%s2159_s1 + $0xe8] sm:$0xff]  }
   0x3   :  { %v1634_v2 = vld [vmem:[%s2159_s1 + $0x38] sm:$0xff]   ;;  %1475 = vmatprep.subr.bf16.mxu1 %v1633_v1  ;;  %v1638_v6 = vld [vmem:[%s2159_s1 + $0x30] sm:$0xff]   ;;  %v1642_v10 = vld [vmem:[%s2159_s1 + $0x28] sm:$0xff]  }
   0x4   :  { %v1635_v3 = vld [vmem:[%s2159_s1 + $0xb8] sm:$0xff]   ;;  %1454 = vmatpush3.bf16.msra.mxu0 %v1634_v2  ;;  %v1639_v7 = vld [vmem:[%s2159_s1 + $0xb0] sm:$0xff]   ;;  %v1643_v11 = vld [vmem:[%s2159_s1 + $0xa8] sm:$0xff]  }
   0x5   :  { %1476 = vmatpush3.bf16.msra.mxu1 %v1635_v3  ;;  %1455 = vmatprep.subr.bf16.mxu0 %v1636_v4  ;;  %v1644_v12 = vld [vmem:[%s2159_s1 + $0x60] sm:$0xff]   ;;  %v1648_v16 = vld [vmem:[%s2159_s1 + $0x58] sm:$0xff]   ;;  %v1652_v20 = vld [vmem:[%s2159_s1 + $0x50] sm:$0xff]  }
   0x6   :  { %1477 = vmatprep.subr.bf16.mxu1 %v1637_v5  ;;  %v1645_v13 = vld [vmem:[%s2159_s1 + $0xe0] sm:$0xff]   ;;  %v1649_v17 = vld [vmem:[%s2159_s1 + $0xd8] sm:$0xff]   ;;  %v1653_v21 = vld [vmem:[%s2159_s1 + $0xd0] sm:$0xff]  }
   0x7   :  { %v1646_v14 = vld [vmem:[%s2159_s1 + $0x20] sm:$0xff]   ;;  %v1650_v18 = vld [vmem:[%s2159_s1 + $0x18] sm:$0xff]   ;;  %v1654_v22 = vld [vmem:[%s2159_s1 + $0x10] sm:$0xff]  }
   0x8   :  { %1456 = vmatpush3.bf16.msra.mxu0 %v1638_v6  ;;  %v1647_v15 = vld [vmem:[%s2159_s1 + $0xa0] sm:$0xff]   ;;  %v1651_v19 = vld [vmem:[%s2159_s1 + $0x98] sm:$0xff]   ;;  %v1655_v23 = vld [vmem:[%s2159_s1 + $0x90] sm:$0xff]  }
   0x9   :  { %1478 = vmatpush3.bf16.msra.mxu1 %v1639_v7  ;;  %1457 = vmatprep.subr.bf16.mxu0 %v1640_v8  ;;  %v1656_v24 = vld [vmem:[%s2159_s1 + $0x48] sm:$0xff]   ;;  %v1660_v28 = vld [vmem:[%s2159_s1 + $0x40] sm:$0xff]   ;;  %v1668_v38 = vld [vmem:[%s2159_s1 + $0x178] sm:$0xff]  }
   0xa   :  { %1479 = vmatprep.subr.bf16.mxu1 %v1641_v9  ;;  %v1657_v25 = vld [vmem:[%s2159_s1 + $0xc8] sm:$0xff]   ;;  %v1661_v29 = vld [vmem:[%s2159_s1 + $0xc0] sm:$0xff]   ;;  %v1669_v39 = vld [vmem:[%s2159_s1 + $0x1f8] sm:$0xff]  }
   0xb   :  { %v1658_v26 = vld [vmem:[%s2159_s1 + $0x8] sm:$0xff]   ;;  %v1662_v30 = vld [vmem:[%s2159_s1] sm:$0xff]   ;;  %v1670_v40 = vld [vmem:[%s2159_s1 + $0x138] sm:$0xff]  }
   0xc   :  { %1458 = vmatpush3.bf16.msra.mxu0 %v1642_v10  ;;  %v1659_v27 = vld [vmem:[%s2159_s1 + $0x88] sm:$0xff]   ;;  %v1663_v31 = vld [vmem:[%s2159_s1 + $0x80] sm:$0xff]   ;;  %v1671_v41 = vld [vmem:[%s2159_s1 + $0x1b8] sm:$0xff]  }
   0xd   :  { %1480 = vmatpush3.bf16.msra.mxu1 %v1643_v11  ;;  %1459 = vmatprep.subr.bf16.mxu0 %v1644_v12  ;;  %v27_v32 = vld [vmem:[%s2160_s0] sm:$0xff]  ;;  %v28_v33 = vld [vmem:[%s2160_s0 + $0x8] sm:$0xff]  ;;  %v1672_v42 = vld [vmem:[%s2159_s1 + $0x170] sm:$0xff]  }
   0xe   :  { %1481 = vmatprep.subr.bf16.mxu1 %v1645_v13  ;;  %v1329_v34 = vcombine.low %v27_v32, %v27_v32  ;;  %v1330_v35 = vcombine.high %v27_v32, %v27_v32  ;;  %v1331_v36 = vcombine.low %v28_v33, %v28_v33  ;;  %v1332_v37 = vcombine.high %v28_v33, %v28_v33  ;;  %v1673_v43 = vld [vmem:[%s2159_s1 + $0x1f0] sm:$0xff]   ;;  %v1676_v46 = vld [vmem:[%s2159_s1 + $0x168] sm:$0xff]   ;;  %v1680_v50 = vld [vmem:[%s2159_s1 + $0x160] sm:$0xff]  }
   0xf   :  { %v1674_v44 = vld [vmem:[%s2159_s1 + $0x130] sm:$0xff]   ;;  %v1677_v47 = vld [vmem:[%s2159_s1 + $0x1e8] sm:$0xff]   ;;  %v1681_v51 = vld [vmem:[%s2159_s1 + $0x1e0] sm:$0xff]  }
  0x10   :  { %1460 = vmatpush3.bf16.msra.mxu0 %v1646_v14  ;;  %906 = vmatprep.mubr.bf16.mxu0 %v1330_v35  ;;  %v1675_v45 = vld [vmem:[%s2159_s1 + $0x1b0] sm:$0xff]   ;;  %v1678_v48 = vld [vmem:[%s2159_s1 + $0x128] sm:$0xff]   ;;  %v1682_v52 = vld [vmem:[%s2159_s1 + $0x120] sm:$0xff]  }
  0x11   :  { %1482 = vmatpush3.bf16.msra.mxu1 %v1647_v15  ;;  %1461 = vmatprep.subr.bf16.mxu0 %v1648_v16  ;;  %v1679_v49 = vld [vmem:[%s2159_s1 + $0x1a8] sm:$0xff]   ;;  %v1683_v53 = vld [vmem:[%s2159_s1 + $0x1a0] sm:$0xff]   ;;  %v1684_v54 = vld [vmem:[%s2159_s1 + $0x158] sm:$0xff]  }
  0x12   :  { %1483 = vmatprep.subr.bf16.mxu1 %v1649_v17  ;;  %946 = vmatprep.mubr.bf16.mxu1 %v1332_v37  ;;  %v1685_v55 = vld [vmem:[%s2159_s1 + $0x1d8] sm:$0xff]   ;;  %v1688_v58 = vld [vmem:[%s2159_s1 + $0x150] sm:$0xff]   ;;  %v1692_v62 = vld [vmem:[%s2159_s1 + $0x148] sm:$0xff]  }
  0x13   :  { %v1686_v56 = vld [vmem:[%s2159_s1 + $0x118] sm:$0xff]   ;;  %v1689_v59 = vld [vmem:[%s2159_s1 + $0x1d0] sm:$0xff]   ;;  %v1693_v63 = vld [vmem:[%s2159_s1 + $0x1c8] sm:$0xff]  }
  0x14   :  { %1462 = vmatpush3.bf16.msra.mxu0 %v1650_v18  ;;  %v1687_v57 = vld [vmem:[%s2159_s1 + $0x198] sm:$0xff]   ;;  %v1690_v60 = vld [vmem:[%s2159_s1 + $0x110] sm:$0xff]   ;;  %v1694_v0 = vld [vmem:[%s2159_s1 + $0x108] sm:$0xff]  }
  0x15   :  { %1484 = vmatpush3.bf16.msra.mxu1 %v1651_v19  ;;  %1463 = vmatprep.subr.bf16.mxu0 %v1652_v20  ;;  %v1691_v61 = vld [vmem:[%s2159_s1 + $0x190] sm:$0xff]   ;;  %v1695_v1 = vld [vmem:[%s2159_s1 + $0x188] sm:$0xff]   ;;  %v1696_v2 = vld [vmem:[%s2159_s1 + $0x140] sm:$0xff]  }
  0x16   :  { %1485 = vmatprep.subr.bf16.mxu1 %v1653_v21  ;;  %v1697_v3 = vld [vmem:[%s2159_s1 + $0x1c0] sm:$0xff]   ;;  %v29_v6 = vld [vmem:[%s2160_s0 + $0x10] sm:$0xff]  ;;  %v30_v9 = vld [vmem:[%s2160_s0 + $0x18] sm:$0xff] }
  0x17   :  { %v1698_v4 = vld [vmem:[%s2159_s1 + $0x100] sm:$0xff]   ;;  %v1333_v7 = vcombine.low %v29_v6, %v29_v6  ;;  %v1334_v8 = vcombine.high %v29_v6, %v29_v6  ;;  %v1335_v10 = vcombine.low %v30_v9, %v30_v9  ;;  %v1336_v11 = vcombine.high %v30_v9, %v30_v9  ;;  %v1704_v12 = vld [vmem:[%s2159_s1 + $0x278] sm:$0xff]   ;;  %v1708_v16 = vld [vmem:[%s2159_s1 + $0x270] sm:$0xff]  }
  0x18   :  { %1464 = vmatpush3.bf16.msra.mxu0 %v1654_v22  ;;  %v1699_v5 = vld [vmem:[%s2159_s1 + $0x180] sm:$0xff]   ;;  %v1705_v13 = vld [vmem:[%s2159_s1 + $0x2f8] sm:$0xff]   ;;  %v1709_v17 = vld [vmem:[%s2159_s1 + $0x2f0] sm:$0xff]  }
  0x19   :  { %1486 = vmatpush3.bf16.msra.mxu1 %v1655_v23  ;;  %1465 = vmatprep.subr.bf16.mxu0 %v1656_v24  ;;  %v1706_v14 = vld [vmem:[%s2159_s1 + $0x238] sm:$0xff]   ;;  %v1710_v18 = vld [vmem:[%s2159_s1 + $0x230] sm:$0xff]   ;;  %v1712_v20 = vld [vmem:[%s2159_s1 + $0x268] sm:$0xff]  }
  0x1a   :  { %1487 = vmatprep.subr.bf16.mxu1 %v1657_v25  ;;  %v1707_v15 = vld [vmem:[%s2159_s1 + $0x2b8] sm:$0xff]   ;;  %v1711_v19 = vld [vmem:[%s2159_s1 + $0x2b0] sm:$0xff]   ;;  %v1713_v21 = vld [vmem:[%s2159_s1 + $0x2e8] sm:$0xff]  }
  0x1b   :  { %v1714_v22 = vld [vmem:[%s2159_s1 + $0x228] sm:$0xff]   ;;  %v1716_v24 = vld [vmem:[%s2159_s1 + $0x260] sm:$0xff]   ;;  %v1724_v32 = vld [vmem:[%s2159_s1 + $0x250] sm:$0xff]  }
  0x1c   :  { %1466 = vmatpush3.bf16.msra.mxu0 %v1658_v26  ;;  %v1715_v23 = vld [vmem:[%s2159_s1 + $0x2a8] sm:$0xff]   ;;  %v1717_v25 = vld [vmem:[%s2159_s1 + $0x2e0] sm:$0xff]   ;;  %v1725_v33 = vld [vmem:[%s2159_s1 + $0x2d0] sm:$0xff]  }
  0x1d   :  { %1488 = vmatpush3.bf16.msra.mxu1 %v1659_v27  ;;  %1467 = vmatprep.subr.bf16.mxu0 %v1660_v28  ;;  %v1718_v26 = vld [vmem:[%s2159_s1 + $0x220] sm:$0xff]   ;;  %v1720_v28 = vld [vmem:[%s2159_s1 + $0x258] sm:$0xff]   ;;  %v1727_v35 = vld [vmem:[%s2159_s1 + $0x290] sm:$0xff]  }
  0x1e   :  { %1489 = vmatprep.subr.bf16.mxu1 %v1661_v29  ;;  %v1719_v27 = vld [vmem:[%s2159_s1 + $0x2a0] sm:$0xff]   ;;  %v1721_v29 = vld [vmem:[%s2159_s1 + $0x2d8] sm:$0xff]   ;;  %v1729_v37 = vld [vmem:[%s2159_s1 + $0x2c8] sm:$0xff]  }
  0x20   :  { %1468 = vmatpush3.bf16.msra.mxu0 %v1662_v30  ;;  %v1722_v30 = vld [vmem:[%s2159_s1 + $0x218] sm:$0xff]  }
  0x21   :  { %1490 = vmatpush3.bf16.msra.mxu1 %v1663_v31  ;;  %1497 = vmatprep.subr.bf16.mxu0 %v1668_v38  ;;  %v1723_v31 = vld [vmem:[%s2159_s1 + $0x298] sm:$0xff]   ;;  %v1730_v38 = vld [vmem:[%s2159_s1 + $0x208] sm:$0xff]  }
  0x22   :  { %1519 = vmatprep.subr.bf16.mxu1 %v1669_v39  ;;  %v1731_v39 = vld [vmem:[%s2159_s1 + $0x288] sm:$0xff]  }
  0x23   :  { %907 = vmatmul.mubr.bf16.vlgmr.msra.gmra.mxu0 %v1329_v34  ;;  %v1726_v34 = vld [vmem:[%s2159_s1 + $0x210] sm:$0xff]  }
  0x24   :  { %947 = vmatmul.mubr.bf16.vlgmr.msra.gmra.mxu1 %v1331_v36  ;;  %1498 = vmatpush3.bf16.msra.mxu0 %v1670_v40  ;;  %v1728_v36 = vld [vmem:[%s2159_s1 + $0x248] sm:$0xff]   ;;  %v1732_v40 = vld [vmem:[%s2159_s1 + $0x240] sm:$0xff]  }
  0x25   :  { %1520 = vmatpush3.bf16.msra.mxu1 %v1671_v41  ;;  %1499 = vmatprep.subr.bf16.mxu0 %v1672_v42  ;;  %v1733_v41 = vld [vmem:[%s2159_s1 + $0x2c0] sm:$0xff]  }
  0x26   :  { %1521 = vmatprep.subr.bf16.mxu1 %v1673_v43  ;;  %986 = vmatprep.mubr.bf16.mxu0 %v1334_v8  ;;  %v1734_v42 = vld [vmem:[%s2159_s1 + $0x200] sm:$0xff]  }
  0x27   :  { %1026 = vmatprep.mubr.bf16.mxu1 %v1336_v11  ;;  %v1735_v43 = vld [vmem:[%s2159_s1 + $0x280] sm:$0xff]  }
  0x28   :  { %1500 = vmatpush3.bf16.msra.mxu0 %v1674_v44  ;;  %v31_v44 = vld [vmem:[%s2160_s0 + $0x20] sm:$0xff] }
  0x29   :  { %1522 = vmatpush3.bf16.msra.mxu1 %v1675_v45  ;;  %1501 = vmatprep.subr.bf16.mxu0 %v1676_v46  ;;  %v32_v45 = vld [vmem:[%s2160_s0 + $0x28] sm:$0xff]  ;;  %v1337_v46 = vcombine.low %v31_v44, %v31_v44 }
  0x2a   :  { %1523 = vmatprep.subr.bf16.mxu1 %v1677_v47  ;;  %v1338_v47 = vcombine.high %v31_v44, %v31_v44 }
  0x2c   :  { %1502 = vmatpush3.bf16.msra.mxu0 %v1678_v48  ;;  %v1339_v48 = vcombine.low %v32_v45, %v32_v45 }
  0x2d   :  { %1524 = vmatpush3.bf16.msra.mxu1 %v1679_v49  ;;  %1503 = vmatprep.subr.bf16.mxu0 %v1680_v50  ;;  %v1340_v49 = vcombine.high %v32_v45, %v32_v45  ;;  %v1740_v50 = vld [vmem:[%s2159_s1 + $0x308] sm:$0xff]  }
  0x2e   :  { %1525 = vmatprep.subr.bf16.mxu1 %v1681_v51  ;;  %v1751_v51 = vmov 0.0  }
  0x30   :  { %1504 = vmatpush3.bf16.msra.mxu0 %v1682_v52  ;;  %v1741_v52 = vld [vmem:[%s2159_s1 + $0x300] sm:$0xff]  }
  0x31   :  { %1526 = vmatpush3.bf16.msra.mxu1 %v1683_v53  ;;  %1505 = vmatprep.subr.bf16.mxu0 %v1684_v54  ;;  %v1742_v53 = vld [vmem:[%s2160_s0 + $0x30] ss:$0 sps:$4 sm:$0xff]   ;;  %v1743_v54 = vld [vmem:[%s2161_s3 + $0x18] sm:$0xff]  }
  0x32   :  { %1527 = vmatprep.subr.bf16.mxu1 %v1685_v55  ;;  %v1744_v55 = vld [vmem:[%s2161_s3 + $0x10] sm:$0xff]  }
  0x34   :  { %1506 = vmatpush3.bf16.msra.mxu0 %v1686_v56  ;;  %v1745_v56 = vld [vmem:[%s2161_s3 + $0x8] sm:$0xff]  }
  0x35   :  { %1528 = vmatpush3.bf16.msra.mxu1 %v1687_v57  ;;  %1507 = vmatprep.subr.bf16.mxu0 %v1688_v58  ;;  %v1746_v57 = vld [vmem:[%s2161_s3] sm:$0xff]   ;;  %v1747_v58 = vld [vmem:[%s2162_s5 + $0x18] sm:$0xff]  }
  0x36   :  { %1529 = vmatprep.subr.bf16.mxu1 %v1689_v59  ;;  %v1748_v59 = vld [vmem:[%s2162_s5 + $0x10] sm:$0xff]  }
  0x38   :  { %1508 = vmatpush3.bf16.msra.mxu0 %v1690_v60 }
  0x39   :  { %1530 = vmatpush3.bf16.msra.mxu1 %v1691_v61  ;;  %1509 = vmatprep.subr.bf16.mxu0 %v1692_v62 }
  0x3a   :  { %1531 = vmatprep.subr.bf16.mxu1 %v1693_v63 }
  0x3c   :  { %1510 = vmatpush3.bf16.msra.mxu0 %v1694_v0 }
  0x3d   :  { %1532 = vmatpush3.bf16.msra.mxu1 %v1695_v1  ;;  %1511 = vmatprep.subr.bf16.mxu0 %v1696_v2 }
  0x3e   :  { %1533 = vmatprep.subr.bf16.mxu1 %v1697_v3 }
  0x40   :  { %1512 = vmatpush3.bf16.msra.mxu0 %v1698_v4 }
  0x41   :  { %1534 = vmatpush3.bf16.msra.mxu1 %v1699_v5  ;;  %1541 = vmatprep.subr.bf16.mxu0 %v1704_v12 }
  0x42   :  { %1563 = vmatprep.subr.bf16.mxu1 %v1705_v13  ;;  %v1328_v13 = vld [vmem:[%s2163_s2] ss:$0 sm:$0xff] }
  0x43   :  { %987 = vmatmul.mubr.bf16.vlgmr.msra.gmra.mxu0 %v1333_v7 }
  0x44   :  { %1027 = vmatmul.mubr.bf16.vlgmr.msra.gmra.mxu1 %v1335_v10  ;;  %1542 = vmatpush3.bf16.msra.mxu0 %v1706_v14 }
  0x45   :  { %1564 = vmatpush3.bf16.msra.mxu1 %v1707_v15  ;;  %1543 = vmatprep.subr.bf16.mxu0 %v1708_v16 }
  0x46   :  { %1565 = vmatprep.subr.bf16.mxu1 %v1709_v17  ;;  %1066 = vmatprep.mubr.bf16.mxu0 %v1338_v47 }
  0x47   :  { %1106 = vmatprep.mubr.bf16.mxu1 %v1340_v49 }
  0x48   :  { %1544 = vmatpush3.bf16.msra.mxu0 %v1710_v18 }
  0x49   :  { %1566 = vmatpush3.bf16.msra.mxu1 %v1711_v19  ;;  %1545 = vmatprep.subr.bf16.mxu0 %v1712_v20 }
  0x4a   :  { %1567 = vmatprep.subr.bf16.mxu1 %v1713_v21 }
  0x4c   :  { %1546 = vmatpush3.bf16.msra.mxu0 %v1714_v22 }
  0x4d   :  { %1568 = vmatpush3.bf16.msra.mxu1 %v1715_v23  ;;  %1547 = vmatprep.subr.bf16.mxu0 %v1716_v24 }
  0x4e   :  { %1569 = vmatprep.subr.bf16.mxu1 %v1717_v25 }
  0x50   :  { %1548 = vmatpush3.bf16.msra.mxu0 %v1718_v26 }
  0x51   :  { %1570 = vmatpush3.bf16.msra.mxu1 %v1719_v27  ;;  %1549 = vmatprep.subr.bf16.mxu0 %v1720_v28 }
  0x52   :  { %1571 = vmatprep.subr.bf16.mxu1 %v1721_v29 }
  0x54   :  { %1550 = vmatpush3.bf16.msra.mxu0 %v1722_v30 }
  0x55   :  { %1572 = vmatpush3.bf16.msra.mxu1 %v1723_v31  ;;  %1551 = vmatprep.subr.bf16.mxu0 %v1724_v32 }
  0x56   :  { %1573 = vmatprep.subr.bf16.mxu1 %v1725_v33 }
  0x58   :  { %1552 = vmatpush3.bf16.msra.mxu0 %v1726_v34 }
  0x59   :  { %1574 = vmatpush3.bf16.msra.mxu1 %v1727_v35  ;;  %1553 = vmatprep.subr.bf16.mxu0 %v1728_v36 }
  0x5a   :  { %1575 = vmatprep.subr.bf16.mxu1 %v1729_v37 }
  0x5c   :  { %1554 = vmatpush3.bf16.msra.mxu0 %v1730_v38 }
  0x5d   :  { %1576 = vmatpush3.bf16.msra.mxu1 %v1731_v39  ;;  %1555 = vmatprep.subr.bf16.mxu0 %v1732_v40  ;;  %v1749_v40 = vld [vmem:[%s2162_s5 + $0x8] sm:$0xff]  }
  0x5e   :  { %1577 = vmatprep.subr.bf16.mxu1 %v1733_v41  ;;  %v1750_v41 = vld [vmem:[%s2162_s5] sm:$0xff]  }
  0x60   :  { %1556 = vmatpush3.bf16.msra.mxu0 %v1734_v42  ;;  %v1441_v42 = vld [vmem:[%s2164_s4] ss:$0 sm:$0xff] }
  0x61   :  { %1578 = vmatpush3.bf16.msra.mxu1 %v1735_v43  ;;  %1598 = vmatprep.subr.bf16.mxu0 %v1751_v51 }
  0x62   :  { %1606 = vmatprep.subr.bf16.mxu1 %v1751_v51 }
  0x63   :  { %1067 = vmatmul.mubr.bf16.vlgmr.msra.gmra.mxu0 %v1337_v46 }
  0x64   :  { %1107 = vmatmul.mubr.bf16.vlgmr.msra.gmra.mxu1 %v1339_v48  ;;  %1599 = vmatpush3.bf16.msra.mxu0 %v1740_v50  ;;  %v1447_v50 = vld [vmem:[%s2165_s6] ss:$0 sm:$0xff] }
  0x65   :  { %1600 = vmatprep.subr.bf16.mxu0 %v1751_v51  ;;  %1602 = vmatprep.mubr.msk.bf16.mxu0 %vm1752_vm0, %v1751_v51 }
  0x66   :  { %1614 = vmatprep.mubr.msk.bf16.mxu1 %vm1752_vm0, %v1751_v51  ;;  %1607 = vmatpush3.bf16.msra.mxu1 %v1743_v54 }
  0x67   :  { %1608 = vmatprep.subr.bf16.mxu1 %v1751_v51 }
  0x68   :  { %1601 = vmatpush3.bf16.msra.mxu0 %v1741_v52 }
  0x69   :  { %1618 = vmatprep.subr.bf16.mxu0 %v1751_v51 }
  0x6a   :  { %1609 = vmatpush3.bf16.msra.mxu1 %v1744_v55 }
  0x6b   :  { %1603 = vmatmul.mubr.msk.bf16.vlgmr.msra.gmra.mxu0 %vm870_vm1, %v1742_v53  ;;  %1610 = vmatprep.subr.bf16.mxu1 %v1751_v51 }
  0x6c   :  { %1626 = vmatprep.mubr.msk.bf16.mxu0 %vm1752_vm0, %v1751_v51  ;;  %1619 = vmatpush3.bf16.msra.mxu0 %v1747_v58 }
  0x6d   :  { %1620 = vmatprep.subr.bf16.mxu0 %v1751_v51 }
  0x6e   :  { %1611 = vmatpush3.bf16.msra.mxu1 %v1745_v56 }
  0x6f   :  { %1612 = vmatprep.subr.bf16.mxu1 %v1751_v51 }
  0x70   :  { %1621 = vmatpush3.bf16.msra.mxu0 %v1748_v59 }
  0x71   :  { %1622 = vmatprep.subr.bf16.mxu0 %v1751_v51 }
  0x72   :  { %1613 = vmatpush3.bf16.msra.mxu1 %v1746_v57 }
  0x74   :  { %1623 = vmatpush3.bf16.msra.mxu0 %v1749_v40 }
  0x75   :  { %1624 = vmatprep.subr.bf16.mxu0 %v1751_v51 }
  0x78   :  { %1625 = vmatpush3.bf16.msra.mxu0 %v1750_v41 }
  0xe3   :  { %v1469_v60 = vpop.f32.mrf.mxu0 }
  0xe4   :  { %v1491_v61 = vpop.f32.mrf.mxu1 }
  0xe5   :  { %v1470_v62 = vpop.f32.mrf.mxu0 }
  0xe6   :  { %v1492_v63 = vpop.f32.mrf.mxu1  ;;  %v1471_v12 = vadd.f32 %v1470_v62, %v1469_v60 }
  0xe7   :  { %v1472_v0 = vpop.f32.mrf.mxu0  ;;  %v1493_v15 = vadd.f32 %v1492_v63, %v1491_v61 }
  0xe8   :  { %v1494_v1 = vpop.f32.mrf.mxu1  ;;  %v909_v14 = vadd.f32 %v1471_v12, %v1328_v13 }
  0xe9   :  { %v1473_v2 = vpop.f32.mrf.mxu0 }
  0xea   :  { %v1495_v3 = vpop.f32.mrf.mxu1  ;;  %v949_v17 = vadd.f32 %v1493_v15, %v909_v14 }
 0x103   :  { %v1513_v4 = vpop.f32.mrf.mxu0 }
 0x104   :  { %v1535_v5 = vpop.f32.mrf.mxu1 }
 0x105   :  { %v1514_v6 = vpop.f32.mrf.mxu0 }
 0x106   :  { %v1536_v7 = vpop.f32.mrf.mxu1  ;;  %v1515_v16 = vadd.f32 %v1514_v6, %v1513_v4 }
 0x107   :  { %v1516_v8 = vpop.f32.mrf.mxu0  ;;  %v1537_v19 = vadd.f32 %v1536_v7, %v1535_v5 }
 0x108   :  { %v1538_v9 = vpop.f32.mrf.mxu1  ;;  %v989_v18 = vadd.f32 %v1515_v16, %v949_v17 }
 0x109   :  { %v1517_v10 = vpop.f32.mrf.mxu0 }
 0x10a   :  { %v1539_v11 = vpop.f32.mrf.mxu1  ;;  %v1029_v23 = vadd.f32 %v1537_v19, %v989_v18 }
 0x123   :  { %v1557_v20 = vpop.f32.mrf.mxu0 }
 0x124   :  { %v1579_v21 = vpop.f32.mrf.mxu1 }
 0x125   :  { %v1558_v22 = vpop.f32.mrf.mxu0 }
 0x126   :  { %v1559_v24 = vadd.f32 %v1558_v22, %v1557_v20  ;;  %v1580_v25 = vpop.f32.mrf.mxu1 }
 0x127   :  { %v1560_v26 = vpop.f32.mrf.mxu0  ;;  %v1581_v28 = vadd.f32 %v1580_v25, %v1579_v21 }
 0x128   :  { %v1069_v27 = vadd.f32 %v1559_v24, %v1029_v23  ;;  %v1582_v29 = vpop.f32.mrf.mxu1 }
 0x129   :  { %v1561_v30 = vpop.f32.mrf.mxu0 }
 0x12a   :  { %v1583_v31 = vpop.f32.mrf.mxu1  ;;  %v1109_v32 = vadd.f32 %v1581_v28, %v1069_v27 }
 0x12b   :  { %v1148_v33 = vpop.f32.mrf.mxu0 }
 0x12c   :  { %v1149_v34 = vadd.f32 %v1148_v33, %v1109_v32 }
 0x12d   :  { %v1604_v35 = vpop.f32.mrf.mxu0 }
 0x12e   :  { %v1154_v36 = vmax.f32 %v1149_v34, 0.0 }
 0x12f   :  { %v1151_v37 = vpop.f32.mrf.mxu0 }
 0x130   :  { %v1155_v38 = vpack.c.bf16 %v1154_v36, %v1154_v36 }
 0x131   :  { %v1605_v39 = vpop.f32.mrf.mxu0 }
 0x132   :  { %1615 = vmatmul.mubr.msk.bf16.vlgmr.msra.gmra.mxu1 %vm1195_vm2, %v1155_v38 }
 0x1f2   :  { %v1233_v43 = vpop.f32.mrf.mxu1 }
 0x1f3   :  { %v1234_v44 = vadd.f32 %v1441_v42, %v1233_v43 }
 0x1f4   :  { %v1616_v45 = vpop.f32.mrf.mxu1 }
 0x1f5   :  { %v1239_v46 = vmax.f32 %v1234_v44, 0.0 }
 0x1f6   :  { %v1236_v47 = vpop.f32.mrf.mxu1 }
 0x1f7   :  { %v1240_v48 = vpack.c.bf16 %v1239_v46, %v1239_v46 }
 0x1f8   :  { %v1617_v49 = vpop.f32.mrf.mxu1 }
 0x1f9   :  { %1627 = vmatmul.mubr.msk.bf16.vlgmr.msra.gmra.mxu0 %vm1195_vm2, %v1240_v48 }
 0x2b9   :  { %v1317_v51 = vpop.f32.mrf.mxu0 }
 0x2ba   :  { %v1318_v52 = vadd.f32 %v1447_v50, %v1317_v51 }
 0x2bb   :  { %v1628_v53 = vpop.f32.mrf.mxu0 }
 0x2bc   :  { %1323 = vst [vmem:[%s2166_s7] sm:$0xff] %v1318_v52 }
 0x2bd   :  { %v1320_v54 = vpop.f32.mrf.mxu0 }
 0x2bf   :  { %v1629_v55 = vpop.f32.mrf.mxu0 }

// kernel: faster_rcnn_forward.16
= control target key start
LH: loop header
LB: loop body
LE: loop exit
PB: predicated region body
PF: predicated region fallthrough
CT: control target
= control target key end

     0   :  { %vm204_vm0 = vcmask 261120   ;;  %vm325_vm1 = vcmask 257024   ;;  %s546_s1 = inlined_call_operand.vmem [shape: bf16[288,32], index: 1, kind: input, shape index: {}]   ;;  %s547_s0 = inlined_call_operand.vmem [shape: bf16[32,288], index: 0, kind: input, shape index: {}]   ;;  %s548_s2 = inlined_call_operand.vmem [shape: f32[1,32], index: 2, kind: input, shape index: {}]   ;;  %s549_s3 = inlined_call_operand.vmem [shape: bf16[32,32], index: 3, kind: output, shape index: {}]  }
   0x1   :  { %v409_v0 = vld [vmem:[%s546_s1 + $0x78] sm:$0xff]   ;;  %v411_v2 = vld [vmem:[%s546_s1 + $0x70] sm:$0xff]   ;;  %v413_v4 = vld [vmem:[%s546_s1 + $0x68] sm:$0xff]  }
   0x2   :  { %v410_v1 = vld [vmem:[%s546_s1 + $0x38] sm:$0xff]   ;;  %369 = vmatprep.subr.bf16.mxu0 %v409_v0  ;;  %v412_v3 = vld [vmem:[%s546_s1 + $0x30] sm:$0xff]   ;;  %v414_v5 = vld [vmem:[%s546_s1 + $0x28] sm:$0xff]  }
   0x3   :  { %370 = vmatpush3.bf16.msra.mxu0 %v410_v1  ;;  %v415_v6 = vld [vmem:[%s546_s1 + $0x60] sm:$0xff]   ;;  %v417_v8 = vld [vmem:[%s546_s1 + $0x58] sm:$0xff]   ;;  %v424_v10 = vld [vmem:[%s546_s1 + $0x88] sm:$0xff]  }
   0x4   :  { %371 = vmatprep.subr.bf16.mxu0 %v411_v2  ;;  %v416_v7 = vld [vmem:[%s546_s1 + $0x20] sm:$0xff]   ;;  %v418_v9 = vld [vmem:[%s546_s1 + $0x18] sm:$0xff]   ;;  %v419_v11 = vld [vmem:[%s546_s1 + $0x50] sm:$0xff]   ;;  %401 = vmatprep.subr.bf16.mxu1 %v424_v10 }
   0x5   :  { %v420_v12 = vld [vmem:[%s546_s1 + $0x10] sm:$0xff]   ;;  %v421_v13 = vld [vmem:[%s546_s1 + $0x48] sm:$0xff]   ;;  %402 = vmatpush3.bf16.msra.mxu1 %v424_v10  ;;  %v429_v15 = vld [vmem:[%s546_s1 + $0x80] sm:$0xff]  }
   0x6   :  { %v428_v14 = vld [vmem:[%s547_s0 + $0x4] ss:$12 sps:$4 sm:$0xff]   ;;  %v430_v16 = vld [vmem:[%s547_s0 + $0x8] ss:$12 sps:$4 sm:$0xff]   ;;  %403 = vmatprep.subr.bf16.mxu1 %v429_v15  ;;  %v431_v17 = vld [vmem:[%s547_s0 + $0x20] ss:$12 sps:$4 sm:$0xff]  }
   0x7   :  { %372 = vmatpush3.bf16.msra.mxu0 %v412_v3  ;;  %243 = vmatprep.mubr.bf16.mxu0 %v428_v14  ;;  %v422_v18 = vld [vmem:[%s546_s1 + $0x8] sm:$0xff]   ;;  %v423_v19 = vld [vmem:[%s546_s1 + $0x40] sm:$0xff]  }
   0x8   :  { %373 = vmatprep.subr.bf16.mxu0 %v413_v4  ;;  %405 = vmatprep.mubr.msk.bf16.mxu1 %vm204_vm0, %v430_v16  ;;  %v425_v20 = vld [vmem:[%s546_s1] sm:$0xff]   ;;  %v432_v22 = vld [vmem:[%s547_s0 + $0x1c] ss:$12 sps:$4 sm:$0xff]  }
   0x9   :  { %404 = vmatpush3.bf16.msra.mxu1 %v429_v15  ;;  %v426_v21 = vld [vmem:[%s547_s0] ss:$12 sps:$4 sm:$0xff]   ;;  %v434_v23 = vld [vmem:[%s547_s0 + $0x18] ss:$12 sps:$4 sm:$0xff]  }
   0xa   :  { %v334_v28 = vld [vmem:[%s548_s2] ss:$0 sm:$0xff] }
   0xb   :  { %374 = vmatpush3.bf16.msra.mxu0 %v414_v5 }
   0xc   :  { %375 = vmatprep.subr.bf16.mxu0 %v415_v6  ;;  %406 = vmatmul.mubr.msk.bf16.vlgmr.msra.gmra.mxu1 %vm204_vm0, %v431_v17 }
   0xf   :  { %376 = vmatpush3.bf16.msra.mxu0 %v416_v7 }
  0x10   :  { %377 = vmatprep.subr.bf16.mxu0 %v417_v8 }
  0x13   :  { %378 = vmatpush3.bf16.msra.mxu0 %v418_v9 }
  0x14   :  { %379 = vmatprep.subr.bf16.mxu0 %v419_v11 }
  0x17   :  { %380 = vmatpush3.bf16.msra.mxu0 %v420_v12 }
  0x18   :  { %381 = vmatprep.subr.bf16.mxu0 %v421_v13 }
  0x1b   :  { %382 = vmatpush3.bf16.msra.mxu0 %v422_v18 }
  0x1c   :  { %383 = vmatprep.subr.bf16.mxu0 %v423_v19 }
  0x1f   :  { %384 = vmatpush3.bf16.msra.mxu0 %v425_v20 }
  0x22   :  { %244 = vmatmul.mubr.bf16.vlgmr.msra.gmra.mxu0 %v426_v21 }
  0x23   :  { %251 = vmatprep.mubr.bf16.mxu0 %v432_v22 }
  0x2a   :  { %252 = vmatmul.mubr.bf16.gmra.mxu0 %v434_v23 }
  0xcc   :  { %v407_v24 = vpop.f32.mrf.mxu1 }
  0xce   :  { %v294_v26 = vpop.f32.mrf.mxu1 }
  0xd0   :  { %v408_v31 = vpop.f32.mrf.mxu1 }
  0xd2   :  { %v297_v37 = vpop.f32.mrf.mxu1 }
  0xe2   :  { %v385_v25 = vpop.f32.mrf.mxu0 }
  0xe4   :  { %v386_v27 = vpop.f32.mrf.mxu0 }
  0xe5   :  { %v387_v29 = vadd.f32 %v386_v27, %v385_v25 }
  0xe6   :  { %v388_v30 = vpop.f32.mrf.mxu0 }
  0xe7   :  { %v246_v32 = vadd.f32 %v387_v29, %v334_v28 }
  0xe8   :  { %v389_v33 = vpop.f32.mrf.mxu0 }
  0xe9   :  { %v390_v34 = vadd.f32 %v389_v33, %v388_v30  ;;  %v295_v35 = vadd.f32 %v294_v26, %v246_v32 }
  0xea   :  { %v391_v36 = vpop.f32.mrf.mxu0 }
  0xeb   :  { %v365_v38 = vpack.c.bf16 %v295_v35, %v295_v35  ;;  %v249_v39 = vadd.f32 %v390_v34, %v334_v28 }
  0xec   :  { %v392_v40 = vpop.f32.mrf.mxu0 }
  0xed   :  { %326 = vst.msk [vmem:[%s549_s3] sm:$0xf] %vm325_vm1, %v365_v38  ;;  %v393_v41 = vadd.f32 %v392_v40, %v391_v36  ;;  %v298_v42 = vadd.f32 %v297_v37, %v249_v39 }
  0xee   :  { %v394_v43 = vpop.f32.mrf.mxu0 }
  0xef   :  { %v254_v44 = vadd.f32 %v393_v41, %v334_v28  ;;  %v366_v45 = vpack.c.bf16 %v298_v42, %v298_v42 }
  0xf0   :  { %v395_v46 = vpop.f32.mrf.mxu0 }
  0xf1   :  { %v303_v47 = vadd.f32 %v407_v24, %v254_v44  ;;  %327 = vst.msk [vmem:[%s549_s3 + $0x4] sm:$0xf] %vm325_vm1, %v366_v45  ;;  %v396_v48 = vadd.f32 %v395_v46, %v394_v43 }
  0xf3   :  { %v367_v49 = vpack.c.bf16 %v303_v47, %v303_v47  ;;  %v257_v50 = vadd.f32 %v396_v48, %v334_v28 }
  0xf5   :  { %328 = vst.msk [vmem:[%s549_s3 + $0x8] sm:$0xf] %vm325_vm1, %v367_v49  ;;  %v306_v51 = vadd.f32 %v408_v31, %v257_v50 }
  0xf7   :  { %v368_v52 = vpack.c.bf16 %v306_v51, %v306_v51 }
  0xf9   :  { %329 = vst.msk [vmem:[%s549_s3 + $0xc] sm:$0xf] %vm325_vm1, %v368_v52 }

// kernel: faster_rcnn_forward.17
= control target key start
LH: loop header
LB: loop body
LE: loop exit
PB: predicated region body
PF: predicated region fallthrough
CT: control target
= control target key end

     0   :  { %s1091_s18 = smov 0   ;;  %s1249_s0 = inlined_call_operand.vmem [shape: bf16[160,288], index: 0, kind: input, shape index: {}]   ;;  %s1250_s1 = inlined_call_operand.vmem [shape: bf16[288,32], index: 1, kind: input, shape index: {}]   ;;  %s1251_s2 = inlined_call_operand.vmem [shape: f32[1,32], index: 2, kind: input, shape index: {}]   ;;  %s1252_s3 = inlined_call_operand.vmem [shape: bf16[32,128], index: 3, kind: input, shape index: {}]   ;;  %s1253_s4 = inlined_call_operand.vmem [shape: f32[1,128], index: 4, kind: input, shape index: {}]   ;;  %s1254_s5 = inlined_call_operand.vmem [shape: f32[160,128], index: 5, kind: output, shape index: {}]  }
   0x1 LB: > { %s832_s19 = sadd.s32 4294967295, %s1057_s18   ;;  %p836_p0 = scmp.ge.s32.totalorder %s1057_s18, 1  ;;  %s1057_s18 = sphi %s1091_s18, %s15_s18  }
   0x2   : > { %p189_p1 = scmp.lt.s32.totalorder %s1057_s18, 3 }
   0x4   : > { %p190_p2 = pnand %p836_p0, %p189_p1 }
   0x5   : > { %s218_s22 = smul.u32 (!%p190_p2), 10, %s832_s19 }
   0x6   : > { %193 = sbr.rel (%p190_p2) target bundleno = 519 (0x207), region = 40 }
   0x7   : > { %p219_p3 = scmp.lt.s32.totalorder (!%p190_p2), %s218_s22, 19 }
   0xb   : > { %v1011_v0 = vld [vmem:[%s1250_s1 + $0x78] sm:$0xff]   ;;  %v1013_v2 = vld [vmem:[%s1250_s1 + $0x70] sm:$0xff]   ;;  %v1059_v3 = vmov 0.0   ;;  %v1015_v5 = vld [vmem:[%s1250_s1 + $0x68] sm:$0xff]   ;;  %vm1060_vm0 = vmmov 0   ;;  %s1256_s22 = smov (!%p219_p3, %s218_s22), 19 }
   0xc   : > { %v1012_v1 = vld [vmem:[%s1250_s1 + $0x38] sm:$0xff]   ;;  %888 = vmatprep.subr.bf16.mxu0 %v1011_v0  ;;  %996 = vmatprep.subr.bf16.mxu1 %v1059_v3  ;;  %v1014_v4 = vld [vmem:[%s1250_s1 + $0x30] sm:$0xff]   ;;  %v1016_v6 = vld [vmem:[%s1250_s1 + $0x28] sm:$0xff]   ;;  %s1000_s10 = smul.u32 12, %s1256_s22  ;;  %vm478_vm1 = vcmask 261120   ;;  %s838_s20 = sshll.u32 %s1256_s22, 3 }
   0xd   : > { %889 = vmatpush3.bf16.msra.mxu0 %v1012_v1  ;;  %956 = vmatprep.mubr.msk.bf16.mxu1 %vm1060_vm0, %v1059_v3  ;;  %v1017_v7 = vld [vmem:[%s1250_s1 + $0x60] sm:$0xff]   ;;  %v1019_v9 = vld [vmem:[%s1250_s1 + $0x58] sm:$0xff]   ;;  %v1021_v11 = vld [vmem:[%s1250_s1 + $0x50] sm:$0xff]   ;;  %s1234_s26 = scalar_lea.vmem %s1254_s5, %s838_s20 }
   0xe   : > { %890 = vmatprep.subr.bf16.mxu0 %v1013_v2  ;;  %v1018_v8 = vld [vmem:[%s1250_s1 + $0x20] sm:$0xff]   ;;  %s1135_s17 = scalar_lea.vmem %s1249_s0, %s1000_s10  ;;  %v1020_v10 = vld [vmem:[%s1250_s1 + $0x18] sm:$0xff]   ;;  %v1030_v13 = vld [vmem:[%s1250_s1 + $0x88] sm:$0xff]  }
   0xf   : > { %v1029_v12 = vld [vmem:[%s1135_s17 + $0x4] ss:$12 sps:$4 sm:$0xff]   ;;  %v1023_v15 = vld [vmem:[%s1250_s1 + $0x48] sm:$0xff]   ;;  %998 = vmatpush3.bf16.msra.mxu1 %v1030_v13  ;;  %v1036_v25 = vld [vmem:[%s1135_s17 + $0x34] ss:$12 sps:$4 sm:$0xff]  }
  0x10   : > { %v1022_v14 = vld [vmem:[%s1250_s1 + $0x10] sm:$0xff]   ;;  %526 = vmatprep.mubr.bf16.mxu0 %v1029_v12  ;;  %v1034_v16 = vld [vmem:[%s1250_s1 + $0x80] sm:$0xff]   ;;  %997 = vmatprep.subr.bf16.mxu1 %v1059_v3  ;;  %v1024_v17 = vld [vmem:[%s1250_s1 + $0x8] sm:$0xff]  }
  0x11   : > { %891 = vmatpush3.bf16.msra.mxu0 %v1014_v4  ;;  %v1035_v18 = vld [vmem:[%s1135_s17 + $0x20] ss:$12 sps:$4 sm:$0xff]   ;;  %v1031_v22 = vld [vmem:[%s1135_s17 + $0x1c] ss:$12 sps:$4 sm:$0xff]   ;;  %v1039_v23 = vld [vmem:[%s1135_s17 + $0x38] ss:$12 sps:$4 sm:$0xff]  }
  0x12   : > { %892 = vmatprep.subr.bf16.mxu0 %v1015_v5  ;;  %v1025_v19 = vld [vmem:[%s1250_s1 + $0x40] sm:$0xff]   ;;  %v1043_v26 = vld [vmem:[%s1135_s17 + $0x50] ss:$12 sps:$4 sm:$0xff]   ;;  %v1040_v28 = vld [vmem:[%s1135_s17 + $0x4c] ss:$12 sps:$4 sm:$0xff]  }
  0x13   : > { %999 = vmatpush3.bf16.msra.mxu1 %v1034_v16  ;;  %v1026_v20 = vld [vmem:[%s1250_s1] sm:$0xff]   ;;  %v1038_v27 = vld [vmem:[%s1135_s17 + $0x30] ss:$12 sps:$4 sm:$0xff]   ;;  %v1047_v29 = vld [vmem:[%s1135_s17 + $0x68] ss:$12 sps:$4 sm:$0xff]  }
  0x14   : > { %972 = vmatprep.subr.bf16.mxu1 %v1059_v3  ;;  %v1027_v21 = vld [vmem:[%s1135_s17] ss:$12 sps:$4 sm:$0xff]   ;;  %v1033_v24 = vld [vmem:[%s1135_s17 + $0x18] ss:$12 sps:$4 sm:$0xff]   ;;  %v1042_v30 = vld [vmem:[%s1135_s17 + $0x48] ss:$12 sps:$4 sm:$0xff]  }
  0x15   : > { %893 = vmatpush3.bf16.msra.mxu0 %v1016_v6  ;;  %v1044_v31 = vld [vmem:[%s1135_s17 + $0x64] ss:$12 sps:$4 sm:$0xff]   ;;  %v1046_v32 = vld [vmem:[%s1135_s17 + $0x60] ss:$12 sps:$4 sm:$0xff]   ;;  %v1048_v33 = vld [vmem:[%s1135_s17 + $0x8] ss:$12 sps:$4 sm:$0xff]  }
  0x16   : > { %894 = vmatprep.subr.bf16.mxu0 %v1017_v7  ;;  %957 = vmatmul.mubr.msk.bf16.vlgmr.msra.gmra.mxu1 %vm478_vm1, %v1035_v18  ;;  %v1049_v34 = vld [vmem:[%s1252_s3 + $0x8] sm:$0xff]   ;;  %v1050_v35 = vld [vmem:[%s1252_s3] sm:$0xff]  }
  0x17   : > { %960 = vmatprep.mubr.msk.bf16.mxu1 %vm1060_vm0, %v1059_v3  ;;  %973 = vmatpush3.bf16.msra.mxu1 %v1049_v34 }
  0x18   : > { %974 = vmatprep.subr.bf16.mxu1 %v1059_v3 }
  0x19   : > { %895 = vmatpush3.bf16.msra.mxu0 %v1018_v8 }
  0x1a   : > { %896 = vmatprep.subr.bf16.mxu0 %v1019_v9  ;;  %v839_v9 = vld [vmem:[%s1251_s2] ss:$0 sm:$0xff] }
  0x1b   : > { %975 = vmatpush3.bf16.msra.mxu1 %v1050_v35 }
  0x1d   : > { %897 = vmatpush3.bf16.msra.mxu0 %v1020_v10 }
  0x1e   : > { %898 = vmatprep.subr.bf16.mxu0 %v1021_v11  ;;  %961 = vmatmul.mubr.msk.bf16.gmra.mxu1 %vm478_vm1, %v1039_v23 }
  0x1f   : > { %964 = vmatprep.mubr.msk.bf16.mxu1 %vm1060_vm0, %v1059_v3 }
  0x21   : > { %899 = vmatpush3.bf16.msra.mxu0 %v1022_v14 }
  0x22   : > { %900 = vmatprep.subr.bf16.mxu0 %v1023_v15 }
  0x25   : > { %901 = vmatpush3.bf16.msra.mxu0 %v1024_v17 }
  0x26   : > { %902 = vmatprep.subr.bf16.mxu0 %v1025_v19  ;;  %965 = vmatmul.mubr.msk.bf16.gmra.mxu1 %vm478_vm1, %v1043_v26 }
  0x27   : > { %968 = vmatprep.mubr.msk.bf16.mxu1 %vm1060_vm0, %v1059_v3 }
  0x29   : > { %903 = vmatpush3.bf16.msra.mxu0 %v1026_v20 }
  0x2a   : > { %948 = vmatprep.subr.bf16.mxu0 %v1059_v3 }
  0x2c   : > { %527 = vmatmul.mubr.bf16.vlgmr.msra.gmra.mxu0 %v1027_v21 }
  0x2d   : > { %949 = vmatpush3.bf16.msra.mxu0 %v1030_v13  ;;  %534 = vmatprep.mubr.bf16.mxu0 %v1031_v22 }
  0x2e   : > { %950 = vmatprep.subr.bf16.mxu0 %v1059_v3  ;;  %969 = vmatmul.mubr.msk.bf16.gmra.mxu1 %vm478_vm1, %v1047_v29 }
  0x2f   : > { %976 = vmatprep.mubr.msk.bf16.mxu1 %vm1060_vm0, %v1059_v3 }
  0x31   : > { %951 = vmatpush3.bf16.msra.mxu0 %v1034_v16 }
  0x34   : > { %535 = vmatmul.mubr.bf16.gmra.mxu0 %v1033_v24 }
  0x35   : > { %542 = vmatprep.mubr.bf16.mxu0 %v1036_v25 }
  0x3c   : > { %543 = vmatmul.mubr.bf16.gmra.mxu0 %v1038_v27 }
  0x3d   : > { %550 = vmatprep.mubr.bf16.mxu0 %v1040_v28 }
  0x44   : > { %551 = vmatmul.mubr.bf16.gmra.mxu0 %v1042_v30 }
  0x45   : > { %558 = vmatprep.mubr.bf16.mxu0 %v1044_v31 }
  0x4c   : > { %559 = vmatmul.mubr.bf16.gmra.mxu0 %v1046_v32 }
  0x4d   : > { %952 = vmatprep.mubr.msk.bf16.mxu0 %vm1060_vm0, %v1059_v3 }
  0x54   : > { %953 = vmatmul.mubr.msk.bf16.vlgmr.msra.gmra.mxu0 %vm478_vm1, %v1048_v33 }
  0xd6   : > { %v609_v36 = vpop.f32.mrf.mxu1 }
  0xd8   : > { %v958_v37 = vpop.f32.mrf.mxu1 }
  0xda   : > { %v612_v38 = vpop.f32.mrf.mxu1 }
  0xdc   : > { %v959_v39 = vpop.f32.mrf.mxu1 }
  0xde   : > { %v617_v42 = vpop.f32.mrf.mxu1 }
  0xe0   : > { %v962_v44 = vpop.f32.mrf.mxu1 }
  0xe2   : > { %v620_v46 = vpop.f32.mrf.mxu1 }
  0xe4   : > { %v963_v48 = vpop.f32.mrf.mxu1 }
  0xe6   : > { %v1205_v50 = vpop.f32.mrf.mxu1 }
  0xe8   : > { %v966_v52 = vpop.f32.mrf.mxu1 }
  0xea   : > { %v628_v54 = vpop.f32.mrf.mxu1 }
  0xec   : > { %v904_v40 = vpop.f32.mrf.mxu0  ;;  %v967_v56 = vpop.f32.mrf.mxu1 }
  0xee   : > { %v905_v41 = vpop.f32.mrf.mxu0  ;;  %v1207_v58 = vpop.f32.mrf.mxu1 }
  0xef   : > { %v906_v8 = vadd.f32 %v905_v41, %v904_v40 }
  0xf0   : > { %v907_v43 = vpop.f32.mrf.mxu0  ;;  %v970_v60 = vpop.f32.mrf.mxu1 }
  0xf1   : > { %v529_v14 = vadd.f32 %v906_v8, %v839_v9  ;;  %v878_v60 = vld [vmem:[%s1253_s4] ss:$0 sm:$0xff] }
  0xf2   : > { %v908_v45 = vpop.f32.mrf.mxu0  ;;  %v636_v62 = vpop.f32.mrf.mxu1 }
  0xf3   : > { %v909_v11 = vadd.f32 %v908_v45, %v907_v43 }
  0xf4   : > { %v910_v47 = vpop.f32.mrf.mxu0  ;;  %v971_v0 = vpop.f32.mrf.mxu1 }
  0xf5   : > { %v532_v18 = vadd.f32 %v909_v11, %v839_v9 }
  0xf6   : > { %v911_v49 = vpop.f32.mrf.mxu0 }
  0xf7   : > { %v912_v16 = vadd.f32 %v911_v49, %v910_v47 }
  0xf8   : > { %v913_v51 = vpop.f32.mrf.mxu0 }
  0xf9   : > { %v537_v23 = vadd.f32 %v912_v16, %v839_v9 }
  0xfa   : > { %v914_v53 = vpop.f32.mrf.mxu0 }
  0xfb   : > { %v915_v13 = vadd.f32 %v914_v53, %v913_v51  ;;  %v610_v29 = vadd.f32 %v609_v36, %v537_v23 }
  0xfc   : > { %v916_v55 = vpop.f32.mrf.mxu0 }
  0xfd   : > { %v540_v20 = vadd.f32 %v915_v13, %v839_v9  ;;  %v642_v33 = vmax.f32 %v610_v29, 0.0 }
  0xfe   : > { %v917_v57 = vpop.f32.mrf.mxu0 }
  0xff   : > { %v613_v26 = vadd.f32 %v612_v38, %v540_v20  ;;  %v918_v30 = vadd.f32 %v917_v57, %v916_v55 }
 0x100   : > { %v919_v59 = vpop.f32.mrf.mxu0 }
 0x101   : > { %v643_v31 = vmax.f32 %v613_v26, 0.0  ;;  %v545_v34 = vadd.f32 %v918_v30, %v839_v9 }
 0x102   : > { %v920_v61 = vpop.f32.mrf.mxu0 }
 0x103   : > { %v921_v27 = vadd.f32 %v920_v61, %v919_v59  ;;  %v651_v35 = vpack.c.bf16 %v643_v31, %v642_v33  ;;  %v618_v40 = vadd.f32 %v617_v42, %v545_v34 }
 0x104   : > { %v922_v63 = vpop.f32.mrf.mxu0 }
 0x105   : > { %v548_v32 = vadd.f32 %v921_v27, %v839_v9  ;;  %v644_v43 = vmax.f32 %v618_v40, 0.0 }
 0x106   : > { %v923_v1 = vpop.f32.mrf.mxu0 }
 0x107   : > { %v621_v37 = vadd.f32 %v620_v46, %v548_v32  ;;  %v924_v41 = vadd.f32 %v923_v1, %v922_v63 }
 0x108   : > { %v925_v2 = vpop.f32.mrf.mxu0 }
 0x109   : > { %v645_v36 = vmax.f32 %v621_v37, 0.0  ;;  %v553_v44 = vadd.f32 %v924_v41, %v839_v9 }
 0x10a   : > { %v926_v4 = vpop.f32.mrf.mxu0 }
 0x10b   : > { %v927_v39 = vadd.f32 %v926_v4, %v925_v2  ;;  %v652_v45 = vpack.c.bf16 %v645_v36, %v644_v43  ;;  %v626_v49 = vadd.f32 %v1205_v50, %v553_v44 }
 0x10c   : > { %v928_v5 = vpop.f32.mrf.mxu0 }
 0x10d   : > { %v556_v38 = vadd.f32 %v927_v39, %v839_v9  ;;  %v646_v52 = vmax.f32 %v626_v49, 0.0 }
 0x10e   : > { %v929_v6 = vpop.f32.mrf.mxu0 }
 0x10f   : > { %v629_v47 = vadd.f32 %v628_v54, %v556_v38  ;;  %v930_v51 = vadd.f32 %v929_v6, %v928_v5 }
 0x110   : > { %v931_v7 = vpop.f32.mrf.mxu0 }
 0x111   : > { %v647_v42 = vmax.f32 %v629_v47, 0.0  ;;  %v561_v53 = vadd.f32 %v930_v51, %v839_v9 }
 0x112   : > { %v932_v10 = vpop.f32.mrf.mxu0 }
 0x113   : > { %v933_v48 = vadd.f32 %v932_v10, %v931_v7  ;;  %v653_v55 = vpack.c.bf16 %v647_v42, %v646_v52  ;;  %v634_v57 = vadd.f32 %v1207_v58, %v561_v53 }
 0x114   : > { %v601_v12 = vpop.f32.mrf.mxu0 }
 0x115   : > { %v602_v17 = vadd.f32 %v601_v12, %v529_v14  ;;  %v564_v46 = vadd.f32 %v933_v48, %v839_v9  ;;  %v648_v54 = vmax.f32 %v634_v57, 0.0 }
 0x116   : > { %v954_v15 = vpop.f32.mrf.mxu0 }
 0x117   : > { %v640_v24 = vmax.f32 %v602_v17, 0.0  ;;  %v637_v56 = vadd.f32 %v636_v62, %v564_v46 }
 0x118   : > { %v604_v19 = vpop.f32.mrf.mxu0 }
 0x119   : > { %v605_v21 = vadd.f32 %v604_v19, %v532_v18  ;;  %v649_v50 = vmax.f32 %v637_v56, 0.0 }
 0x11a   : > { %v955_v22 = vpop.f32.mrf.mxu0 }
 0x11b   : > { %v641_v25 = vmax.f32 %v605_v21, 0.0  ;;  %v654_v59 = vpack.c.bf16 %v649_v50, %v648_v54 }
 0x11d   : > { %v650_v28 = vpack.c.bf16 %v641_v25, %v640_v24 }
 0x11f   : > { %977 = vmatmul.mubr.msk.bf16.vlgmr.msra.gmra.mxu1 %vm478_vm1, %v650_v28 }
 0x120   : > { %980 = vmatprep.mubr.msk.bf16.mxu1 %vm1060_vm0, %v1059_v3 }
 0x127   : > { %981 = vmatmul.mubr.msk.bf16.gmra.mxu1 %vm478_vm1, %v651_v35 }
 0x128   : > { %984 = vmatprep.mubr.msk.bf16.mxu1 %vm1060_vm0, %v1059_v3 }
 0x12f   : > { %985 = vmatmul.mubr.msk.bf16.gmra.mxu1 %vm478_vm1, %v652_v45 }
 0x130   : > { %988 = vmatprep.mubr.msk.bf16.mxu1 %vm1060_vm0, %v1059_v3 }
 0x137   : > { %989 = vmatmul.mubr.msk.bf16.gmra.mxu1 %vm478_vm1, %v653_v55 }
 0x138   : > { %992 = vmatprep.mubr.msk.bf16.mxu1 %vm1060_vm0, %v1059_v3 }
 0x13f   : > { %993 = vmatmul.mubr.msk.bf16.gmra.mxu1 %vm478_vm1, %v654_v59 }
 0x1df   : > { %v727_v3 = vpop.f32.mrf.mxu1 }
 0x1e0   : > { %v728_v58 = vadd.f32 %v878_v60, %v727_v3 }
 0x1e1   : > { %v978_v61 = vpop.f32.mrf.mxu1 }
 0x1e2   : > { %766 = vst [vmem:[%s1234_s26] sm:$0xff] %v728_v58 }
 0x1e3   : > { %v730_v62 = vpop.f32.mrf.mxu1 }
 0x1e4   : > { %v731_v63 = vadd.f32 %v878_v60, %v730_v62 }
 0x1e5   : > { %v979_v0 = vpop.f32.mrf.mxu1 }
 0x1e6   : > { %767 = vst [vmem:[%s1234_s26 + $0x8] sm:$0xff] %v731_v63 }
 0x1e7   : > { %v735_v1 = vpop.f32.mrf.mxu1 }
 0x1e8   : > { %v736_v2 = vadd.f32 %v878_v60, %v735_v1 }
 0x1e9   : > { %v982_v4 = vpop.f32.mrf.mxu1 }
 0x1ea   : > { %768 = vst [vmem:[%s1234_s26 + $0x10] sm:$0xff] %v736_v2 }
 0x1eb   : > { %v738_v5 = vpop.f32.mrf.mxu1 }
 0x1ec   : > { %v739_v6 = vadd.f32 %v878_v60, %v738_v5 }
 0x1ed   : > { %v983_v7 = vpop.f32.mrf.mxu1 }
 0x1ee   : > { %769 = vst [vmem:[%s1234_s26 + $0x18] sm:$0xff] %v739_v6 }
 0x1ef   : > { %v743_v8 = vpop.f32.mrf.mxu1 }
 0x1f0   : > { %v744_v9 = vadd.f32 %v878_v60, %v743_v8 }
 0x1f1   : > { %v986_v10 = vpop.f32.mrf.mxu1 }
 0x1f2   : > { %770 = vst [vmem:[%s1234_s26 + $0x20] sm:$0xff] %v744_v9 }
 0x1f3   : > { %v746_v11 = vpop.f32.mrf.mxu1 }
 0x1f4   : > { %v747_v12 = vadd.f32 %v878_v60, %v746_v11 }
 0x1f5   : > { %v987_v13 = vpop.f32.mrf.mxu1 }
 0x1f6   : > { %771 = vst [vmem:[%s1234_s26 + $0x28] sm:$0xff] %v747_v12 }
 0x1f7   : > { %v751_v14 = vpop.f32.mrf.mxu1 }
 0x1f8   : > { %v752_v15 = vadd.f32 %v878_v60, %v751_v14 }
 0x1f9   : > { %v990_v16 = vpop.f32.mrf.mxu1 }
 0x1fa   : > { %772 = vst [vmem:[%s1234_s26 + $0x30] sm:$0xff] %v752_v15 }
 0x1fb   : > { %v754_v17 = vpop.f32.mrf.mxu1 }
 0x1fc   : > { %v755_v18 = vadd.f32 %v878_v60, %v754_v17 }
 0x1fd   : > { %v991_v19 = vpop.f32.mrf.mxu1 }
 0x1fe   : > { %773 = vst [vmem:[%s1234_s26 + $0x38] sm:$0xff] %v755_v18 }
 0x1ff   : > { %v759_v20 = vpop.f32.mrf.mxu1 }
 0x200   : > { %v760_v21 = vadd.f32 %v878_v60, %v759_v20 }
 0x201   : > { %v994_v22 = vpop.f32.mrf.mxu1 }
 0x202   : > { %774 = vst [vmem:[%s1234_s26 + $0x40] sm:$0xff] %v760_v21 }
 0x203   : > { %v762_v23 = vpop.f32.mrf.mxu1 }
 0x204   : > { %v763_v24 = vadd.f32 %v878_v60, %v762_v23 }
 0x205   : > { %v995_v25 = vpop.f32.mrf.mxu1 }
 0x206   : > { %775 = vst [vmem:[%s1234_s26 + $0x48] sm:$0xff] %v763_v24 }
 0x207 PF: > { %s15_s18 = sadd.s32 1, %s1057_s18  }
 0x208   : > { %p12_p4 = scmp.ge.s32.totalorder %s15_s18, 4  }
 0x20a   :  { %14 = sbr.rel (!%p12_p4) target bundleno = 1 (0x1), region = 70 }

</bundles_post_ra>
